<compile_context>
chip_gen: v7x
topology: tpu7x:2x2x1
jax: 0.10.0
libtpu: 0.0.40
codegen_flags: <defaults>
</compile_context>

<pallas_src>
import jax
import jax.numpy as jnp
from jax.experimental import pallas as pl
from jax.experimental.pallas import tpu as pltpu

# ----------------------- config consistent with the module -------------------
S = 64            # sequence length (e.g. an 8x8 feature map flattened)
B = 2             # batch
D = 32            # hidden_dim
NHEAD = 4
HEAD_DIM = D // NHEAD
FFN = 64          # dim_feedforward (d_inner of MoE experts)
NUM_EXPERT = 4    # moe_nume
TOP_K = 2         # moe_topk (gate math below hard-codes top-2)
LN_EPS = 1e-5     # PyTorch LayerNorm default

assert TOP_K == 2


# ----------------------------- fused Pallas kernel ----------------------------
def _share_en_layer_kernel(src_ref, pos_ref,
                           wqk_ref, bqk_ref, wv_ref, bv_ref, wo_ref, bo_ref,
                           g_ref, beta_ref,
                           wg_ref, bg_ref, w1_ref, b1_ref, w2_ref, b2_ref,
                           o_ref):
    f32 = jnp.float32
    src = src_ref[...]                                    # (S, D): one batch per grid step
    qk_in = src + pos_ref[...]                            # with_pos_embed for q and k

    # --- fused Q/K projection (one (S,D)@(D,2D) matmul); V projection -------
    qk = jnp.dot(qk_in, wqk_ref[...], preferred_element_type=f32) + bqk_ref[...]
    v = jnp.dot(src, wv_ref[...], preferred_element_type=f32) + bv_ref[...]
    q = qk[:, :D] * (HEAD_DIM ** -0.5)                    # fold 1/sqrt(hd) into q once
    k = qk[:, D:]

    # --- multi-head attention: heads unrolled in this kernel ----------------
    head_outs = []
    for h in range(NHEAD):
        cols = slice(h * HEAD_DIM, (h + 1) * HEAD_DIM)
        s = jax.lax.dot_general(q[:, cols], k[:, cols],
                                (((1,), (1,)), ((), ())),
                                preferred_element_type=f32)          # (S, S)
        s = s - jnp.max(s, axis=-1, keepdims=True)
        p = jnp.exp(s)
        p = p * pl.reciprocal(jnp.sum(p, axis=-1, keepdims=True), approx=True)
        head_outs.append(jnp.dot(p, v[:, cols],
                                 preferred_element_type=f32))        # (S, hd)
    attn = jnp.concatenate(head_outs, axis=-1)                       # (S, D)

    # --- attention out-proj + residual + LayerNorm (norm1), fused -----------
    attn = jnp.dot(attn, wo_ref[...], preferred_element_type=f32) + bo_ref[...]
    x = src + attn
    mu = jnp.mean(x, axis=-1, keepdims=True)
    d = x - mu
    var = jnp.mean(d * d, axis=-1, keepdims=True)
    xn = d * jax.lax.rsqrt(var + LN_EPS) * g_ref[...] + beta_ref[...]

    # --- MoE NaiveGate (top-2 of 4) computed in-kernel -----------------------
    logits = jnp.dot(xn, wg_ref[...], preferred_element_type=f32) + bg_ref[...]  # (S, E)
    m1 = jnp.max(logits, axis=-1, keepdims=True)
    m2 = jnp.max(jnp.where(logits >= m1, -jnp.inf, logits), axis=-1, keepdims=True)
    # softmax over the two selected logits; zero weight for the other experts
    denom = 1.0 + jnp.exp(m2 - m1)
    gate = (jnp.where(logits >= m2, jnp.exp(logits - m1), 0.0)
            * pl.reciprocal(denom, approx=True))                                 # (S, E)

    # --- experts (dense top-k, unrolled) + MoE residual ----------------------
    acc = xn                                              # output = inp + sum_e gate_e*expert_e
    for e in range(NUM_EXPERT):
        h1 = jnp.maximum(
            jnp.dot(xn, w1_ref[e], preferred_element_type=f32) + b1_ref[e], 0.0)
        y = jnp.dot(h1, w2_ref[e], preferred_element_type=f32) + b2_ref[e]
        acc = acc + gate[:, e:e + 1] * y

    o_ref[...] = acc.astype(o_ref.dtype)


# ----------------------------- wrapper ----------------------------------------
def share_en_layer_forward(src, pos, p):
    """src, pos: (S, B, D) seq-first (PyTorch nn.MultiheadAttention layout).

    TODO(synk): attn_mask / src_key_padding_mask are not supported (module is called
    with None here); dropout layers are identity (eval semantics); FMoE balance/aux
    statistics are training-only and not computed.
    """
    Sx, Bx, Dx = src.shape
    src2 = jnp.transpose(src, (1, 0, 2)).reshape(Bx * Sx, Dx)   # batch-major tokens
    pos2 = jnp.transpose(pos, (1, 0, 2)).reshape(Bx * Sx, Dx)

    def rep(shape):                       # grid-invariant (weights stay VMEM-resident)
        nd = len(shape)
        return pl.BlockSpec(shape, lambda b, _nd=nd: (0,) * _nd)

    tok = pl.BlockSpec((Sx, Dx), lambda b: (b, 0))              # one batch's token slab

    out2 = pl.pallas_call(
        _share_en_layer_kernel,
        out_shape=jax.ShapeDtypeStruct((Bx * Sx, Dx), src.dtype),
        grid=(Bx,),
        in_specs=[
            tok, tok,                                             # src, pos
            rep((Dx, 2 * Dx)), rep((1, 2 * Dx)),                  # fused Wq|Wk, bias
            rep((Dx, Dx)), rep((1, Dx)),                          # Wv, bv
            rep((Dx, Dx)), rep((1, Dx)),                          # Wo, bo
            rep((1, Dx)), rep((1, Dx)),                           # norm1 gamma, beta
            rep((Dx, NUM_EXPERT)), rep((1, NUM_EXPERT)),          # gate W, b
            rep((NUM_EXPERT, Dx, FFN)), rep((NUM_EXPERT, 1, FFN)),  # expert W1, b1
            rep((NUM_EXPERT, FFN, Dx)), rep((NUM_EXPERT, 1, Dx)),   # expert W2, b2
        ],
        out_specs=tok,
        compiler_params=pltpu.CompilerParams(dimension_semantics=("parallel",)),
    )(
        src2, pos2,
        p["wqk"], p["bqk"].reshape(1, -1),
        p["wv"], p["bv"].reshape(1, -1),
        p["wo"], p["bo"].reshape(1, -1),
        p["ln_g"].reshape(1, -1), p["ln_b"].reshape(1, -1),
        p["wg"], p["bg"].reshape(1, -1),
        p["w1"], p["b1"], p["w2"], p["b2"],
    )
    return out2.reshape(Bx, Sx, Dx).transpose(1, 0, 2)            # back to (S, B, D)


# ----------------------------- parameter init ---------------------------------
def init_params(key):
    keys = iter(jax.random.split(key, 16))

    def nrm(shape, scale):
        return jax.random.normal(next(keys), shape, jnp.float32) * scale

    return {
        # attention: q/k projections concatenated along output dim, v separate
        "wqk": nrm((D, 2 * D), D ** -0.5), "bqk": nrm((2 * D,), 0.02),
        "wv": nrm((D, D), D ** -0.5), "bv": nrm((D,), 0.02),
        "wo": nrm((D, D), D ** -0.5), "bo": nrm((D,), 0.02),
        # norm1
        "ln_g": jnp.ones((D,), jnp.float32), "ln_b": jnp.zeros((D,), jnp.float32),
        # MoE: NaiveGate linear + per-expert MLPs
        "wg": nrm((D, NUM_EXPERT), D ** -0.5), "bg": nrm((NUM_EXPERT,), 0.02),
        "w1": nrm((NUM_EXPERT, D, FFN), D ** -0.5),
        "b1": nrm((NUM_EXPERT, 1, FFN), 0.02),
        "w2": nrm((NUM_EXPERT, FFN, D), FFN ** -0.5),
        "b2": nrm((NUM_EXPERT, 1, D), 0.02),
    }


# ----------------------------------- main --------------------------------------
if __name__ == "__main__":
    key = jax.random.PRNGKey(0)
    k_src, k_pos, k_p = jax.random.split(key, 3)
    src = jax.random.normal(k_src, (S, B, D), jnp.float32)
    pos = jax.random.normal(k_pos, (S, B, D), jnp.float32) * 0.1
    params = init_params(k_p)

    fwd = jax.jit(share_en_layer_forward)
    out = jax.block_until_ready(fwd(src, pos, params))

    assert out.shape == (S, B, D)
    assert bool(jnp.all(jnp.isfinite(out)))
    print("KERNEL_OK")
</pallas_src>

<mosaic_0001>
module attributes {stable_mosaic.version = 11 : i64} {
  func.func @_share_en_layer_kernel(%arg0: i32, %arg1: memref<64x32xf32, #tpu.memory_space<vmem>>, %arg2: memref<64x32xf32, #tpu.memory_space<vmem>>, %arg3: memref<32x64xf32, #tpu.memory_space<vmem>>, %arg4: memref<1x64xf32, #tpu.memory_space<vmem>>, %arg5: memref<32x32xf32, #tpu.memory_space<vmem>>, %arg6: memref<1x32xf32, #tpu.memory_space<vmem>>, %arg7: memref<32x32xf32, #tpu.memory_space<vmem>>, %arg8: memref<1x32xf32, #tpu.memory_space<vmem>>, %arg9: memref<1x32xf32, #tpu.memory_space<vmem>>, %arg10: memref<1x32xf32, #tpu.memory_space<vmem>>, %arg11: memref<32x4xf32, #tpu.memory_space<vmem>>, %arg12: memref<1x4xf32, #tpu.memory_space<vmem>>, %arg13: memref<4x32x64xf32, #tpu.memory_space<vmem>>, %arg14: memref<4x1x64xf32, #tpu.memory_space<vmem>>, %arg15: memref<4x64x32xf32, #tpu.memory_space<vmem>>, %arg16: memref<4x1x32xf32, #tpu.memory_space<vmem>>, %arg17: memref<64x32xf32, #tpu.memory_space<vmem>>) attributes {dimension_semantics = [#tpu.dimension_semantics<parallel>], iteration_bounds = array<i64: 2>, scalar_prefetch = 0 : i64, scratch_operands = 0 : i64, tpu.core_type = #tpu.core_type<tc>, window_params = [{transform_indices = @transform_0, window_bounds = array<i64: 64, 32>}, {transform_indices = @transform_1, window_bounds = array<i64: 64, 32>}, {pipeline_mode = #tpu.pipeline_mode<synchronous>, transform_indices = @transform_2, window_bounds = array<i64: 32, 64>}, {pipeline_mode = #tpu.pipeline_mode<synchronous>, transform_indices = @transform_3, window_bounds = array<i64: 1, 64>}, {pipeline_mode = #tpu.pipeline_mode<synchronous>, transform_indices = @transform_4, window_bounds = array<i64: 32, 32>}, {pipeline_mode = #tpu.pipeline_mode<synchronous>, transform_indices = @transform_5, window_bounds = array<i64: 1, 32>}, {pipeline_mode = #tpu.pipeline_mode<synchronous>, transform_indices = @transform_6, window_bounds = array<i64: 32, 32>}, {pipeline_mode = #tpu.pipeline_mode<synchronous>, transform_indices = @transform_7, window_bounds = array<i64: 1, 32>}, {pipeline_mode = #tpu.pipeline_mode<synchronous>, transform_indices = @transform_8, window_bounds = array<i64: 1, 32>}, {pipeline_mode = #tpu.pipeline_mode<synchronous>, transform_indices = @transform_9, window_bounds = array<i64: 1, 32>}, {pipeline_mode = #tpu.pipeline_mode<synchronous>, transform_indices = @transform_10, window_bounds = array<i64: 32, 4>}, {pipeline_mode = #tpu.pipeline_mode<synchronous>, transform_indices = @transform_11, window_bounds = array<i64: 1, 4>}, {pipeline_mode = #tpu.pipeline_mode<synchronous>, transform_indices = @transform_12, window_bounds = array<i64: 4, 32, 64>}, {pipeline_mode = #tpu.pipeline_mode<synchronous>, transform_indices = @transform_13, window_bounds = array<i64: 4, 1, 64>}, {pipeline_mode = #tpu.pipeline_mode<synchronous>, transform_indices = @transform_14, window_bounds = array<i64: 4, 64, 32>}, {pipeline_mode = #tpu.pipeline_mode<synchronous>, transform_indices = @transform_15, window_bounds = array<i64: 4, 1, 32>}, {transform_indices = @transform_16, window_bounds = array<i64: 64, 32>}]} {
    %c0 = arith.constant 0 : index
    %c0_0 = arith.constant 0 : index
    %0 = vector.load %arg1[%c0, %c0_0] : memref<64x32xf32, #tpu.memory_space<vmem>>, vector<64x32xf32>
    %c0_1 = arith.constant 0 : index
    %c0_2 = arith.constant 0 : index
    %1 = vector.load %arg2[%c0_1, %c0_2] : memref<64x32xf32, #tpu.memory_space<vmem>>, vector<64x32xf32>
    %2 = arith.addf %0, %1 : vector<64x32xf32>
    %c0_3 = arith.constant 0 : index
    %c0_4 = arith.constant 0 : index
    %3 = vector.load %arg3[%c0_3, %c0_4] : memref<32x64xf32, #tpu.memory_space<vmem>>, vector<32x64xf32>
    %cst = arith.constant dense<0.000000e+00> : vector<64x64xf32>
    %4 = tpu.matmul %2, %3, %cst {dimension_numbers = #tpu.dot_dimension_numbers<[1], [0], [0], [1], [0, 0, 1, 1], [], []>} : vector<64x32xf32>, vector<32x64xf32>, vector<64x64xf32> -> vector<64x64xf32>
    %c0_5 = arith.constant 0 : index
    %c0_6 = arith.constant 0 : index
    %5 = vector.load %arg4[%c0_5, %c0_6] : memref<1x64xf32, #tpu.memory_space<vmem>>, vector<1x64xf32>
    %6 = vector.broadcast %5 : vector<1x64xf32> to vector<64x64xf32>
    %7 = arith.addf %4, %6 : vector<64x64xf32>
    %c0_7 = arith.constant 0 : index
    %c0_8 = arith.constant 0 : index
    %8 = vector.load %arg5[%c0_7, %c0_8] : memref<32x32xf32, #tpu.memory_space<vmem>>, vector<32x32xf32>
    %cst_9 = arith.constant dense<0.000000e+00> : vector<64x32xf32>
    %9 = tpu.matmul %0, %8, %cst_9 {dimension_numbers = #tpu.dot_dimension_numbers<[1], [0], [0], [1], [0, 0, 1, 1], [], []>} : vector<64x32xf32>, vector<32x32xf32>, vector<64x32xf32> -> vector<64x32xf32>
    %c0_10 = arith.constant 0 : index
    %c0_11 = arith.constant 0 : index
    %10 = vector.load %arg6[%c0_10, %c0_11] : memref<1x32xf32, #tpu.memory_space<vmem>>, vector<1x32xf32>
    %11 = vector.broadcast %10 : vector<1x32xf32> to vector<64x32xf32>
    %12 = arith.addf %9, %11 : vector<64x32xf32>
    %13 = vector.extract_strided_slice %7 {offsets = [0, 0], sizes = [64, 32], strides = [1, 1]} : vector<64x64xf32> to vector<64x32xf32>
    %cst_12 = arith.constant 0.353553385 : f32
    %14 = vector.broadcast %cst_12 : f32 to vector<64x32xf32>
    %15 = arith.mulf %13, %14 : vector<64x32xf32>
    %16 = vector.extract_strided_slice %7 {offsets = [0, 32], sizes = [64, 32], strides = [1, 1]} : vector<64x64xf32> to vector<64x32xf32>
    %17 = vector.extract_strided_slice %15 {offsets = [0, 0], sizes = [64, 8], strides = [1, 1]} : vector<64x32xf32> to vector<64x8xf32>
    %18 = vector.extract_strided_slice %16 {offsets = [0, 0], sizes = [64, 8], strides = [1, 1]} : vector<64x32xf32> to vector<64x8xf32>
    %cst_13 = arith.constant dense<0.000000e+00> : vector<64x64xf32>
    %19 = tpu.matmul %17, %18, %cst_13 {dimension_numbers = #tpu.dot_dimension_numbers<[1], [1], [0], [0], [0, 0, 1, 0], [], []>} : vector<64x8xf32>, vector<64x8xf32>, vector<64x64xf32> -> vector<64x64xf32>
    %cst_14 = arith.constant dense<0xFF800000> : vector<64xf32>
    %20 = vector.multi_reduction <maximumf>, %19, %cst_14 [1] : vector<64x64xf32> to vector<64xf32>
    %21 = vector.shape_cast %20 : vector<64xf32> to vector<64x1xf32>
    %22 = vector.broadcast %21 : vector<64x1xf32> to vector<64x64xf32>
    %23 = arith.subf %19, %22 : vector<64x64xf32>
    %24 = math.exp %23 : vector<64x64xf32>
    %cst_15 = arith.constant dense<0.000000e+00> : vector<64xf32>
    %25 = vector.multi_reduction <add>, %24, %cst_15 [1] : vector<64x64xf32> to vector<64xf32>
    %26 = vector.shape_cast %25 : vector<64xf32> to vector<64x1xf32>
    %27 = tpu.reciprocal %26 {approx = true} : vector<64x1xf32> -> vector<64x1xf32>
    %28 = vector.broadcast %27 : vector<64x1xf32> to vector<64x64xf32>
    %29 = arith.mulf %24, %28 : vector<64x64xf32>
    %30 = vector.extract_strided_slice %12 {offsets = [0, 0], sizes = [64, 8], strides = [1, 1]} : vector<64x32xf32> to vector<64x8xf32>
    %cst_16 = arith.constant dense<0.000000e+00> : vector<64x8xf32>
    %31 = tpu.matmul %29, %30, %cst_16 {dimension_numbers = #tpu.dot_dimension_numbers<[1], [0], [0], [1], [0, 0, 1, 1], [], []>} : vector<64x64xf32>, vector<64x8xf32>, vector<64x8xf32> -> vector<64x8xf32>
    %32 = vector.extract_strided_slice %15 {offsets = [0, 8], sizes = [64, 8], strides = [1, 1]} : vector<64x32xf32> to vector<64x8xf32>
    %33 = vector.extract_strided_slice %16 {offsets = [0, 8], sizes = [64, 8], strides = [1, 1]} : vector<64x32xf32> to vector<64x8xf32>
    %cst_17 = arith.constant dense<0.000000e+00> : vector<64x64xf32>
    %34 = tpu.matmul %32, %33, %cst_17 {dimension_numbers = #tpu.dot_dimension_numbers<[1], [1], [0], [0], [0, 0, 1, 0], [], []>} : vector<64x8xf32>, vector<64x8xf32>, vector<64x64xf32> -> vector<64x64xf32>
    %cst_18 = arith.constant dense<0xFF800000> : vector<64xf32>
    %35 = vector.multi_reduction <maximumf>, %34, %cst_18 [1] : vector<64x64xf32> to vector<64xf32>
    %36 = vector.shape_cast %35 : vector<64xf32> to vector<64x1xf32>
    %37 = vector.broadcast %36 : vector<64x1xf32> to vector<64x64xf32>
    %38 = arith.subf %34, %37 : vector<64x64xf32>
    %39 = math.exp %38 : vector<64x64xf32>
    %cst_19 = arith.constant dense<0.000000e+00> : vector<64xf32>
    %40 = vector.multi_reduction <add>, %39, %cst_19 [1] : vector<64x64xf32> to vector<64xf32>
    %41 = vector.shape_cast %40 : vector<64xf32> to vector<64x1xf32>
    %42 = tpu.reciprocal %41 {approx = true} : vector<64x1xf32> -> vector<64x1xf32>
    %43 = vector.broadcast %42 : vector<64x1xf32> to vector<64x64xf32>
    %44 = arith.mulf %39, %43 : vector<64x64xf32>
    %45 = vector.extract_strided_slice %12 {offsets = [0, 8], sizes = [64, 8], strides = [1, 1]} : vector<64x32xf32> to vector<64x8xf32>
    %cst_20 = arith.constant dense<0.000000e+00> : vector<64x8xf32>
    %46 = tpu.matmul %44, %45, %cst_20 {dimension_numbers = #tpu.dot_dimension_numbers<[1], [0], [0], [1], [0, 0, 1, 1], [], []>} : vector<64x64xf32>, vector<64x8xf32>, vector<64x8xf32> -> vector<64x8xf32>
    %47 = vector.extract_strided_slice %15 {offsets = [0, 16], sizes = [64, 8], strides = [1, 1]} : vector<64x32xf32> to vector<64x8xf32>
    %48 = vector.extract_strided_slice %16 {offsets = [0, 16], sizes = [64, 8], strides = [1, 1]} : vector<64x32xf32> to vector<64x8xf32>
    %cst_21 = arith.constant dense<0.000000e+00> : vector<64x64xf32>
    %49 = tpu.matmul %47, %48, %cst_21 {dimension_numbers = #tpu.dot_dimension_numbers<[1], [1], [0], [0], [0, 0, 1, 0], [], []>} : vector<64x8xf32>, vector<64x8xf32>, vector<64x64xf32> -> vector<64x64xf32>
    %cst_22 = arith.constant dense<0xFF800000> : vector<64xf32>
    %50 = vector.multi_reduction <maximumf>, %49, %cst_22 [1] : vector<64x64xf32> to vector<64xf32>
    %51 = vector.shape_cast %50 : vector<64xf32> to vector<64x1xf32>
    %52 = vector.broadcast %51 : vector<64x1xf32> to vector<64x64xf32>
    %53 = arith.subf %49, %52 : vector<64x64xf32>
    %54 = math.exp %53 : vector<64x64xf32>
    %cst_23 = arith.constant dense<0.000000e+00> : vector<64xf32>
    %55 = vector.multi_reduction <add>, %54, %cst_23 [1] : vector<64x64xf32> to vector<64xf32>
    %56 = vector.shape_cast %55 : vector<64xf32> to vector<64x1xf32>
    %57 = tpu.reciprocal %56 {approx = true} : vector<64x1xf32> -> vector<64x1xf32>
    %58 = vector.broadcast %57 : vector<64x1xf32> to vector<64x64xf32>
    %59 = arith.mulf %54, %58 : vector<64x64xf32>
    %60 = vector.extract_strided_slice %12 {offsets = [0, 16], sizes = [64, 8], strides = [1, 1]} : vector<64x32xf32> to vector<64x8xf32>
    %cst_24 = arith.constant dense<0.000000e+00> : vector<64x8xf32>
    %61 = tpu.matmul %59, %60, %cst_24 {dimension_numbers = #tpu.dot_dimension_numbers<[1], [0], [0], [1], [0, 0, 1, 1], [], []>} : vector<64x64xf32>, vector<64x8xf32>, vector<64x8xf32> -> vector<64x8xf32>
    %62 = vector.extract_strided_slice %15 {offsets = [0, 24], sizes = [64, 8], strides = [1, 1]} : vector<64x32xf32> to vector<64x8xf32>
    %63 = vector.extract_strided_slice %16 {offsets = [0, 24], sizes = [64, 8], strides = [1, 1]} : vector<64x32xf32> to vector<64x8xf32>
    %cst_25 = arith.constant dense<0.000000e+00> : vector<64x64xf32>
    %64 = tpu.matmul %62, %63, %cst_25 {dimension_numbers = #tpu.dot_dimension_numbers<[1], [1], [0], [0], [0, 0, 1, 0], [], []>} : vector<64x8xf32>, vector<64x8xf32>, vector<64x64xf32> -> vector<64x64xf32>
    %cst_26 = arith.constant dense<0xFF800000> : vector<64xf32>
    %65 = vector.multi_reduction <maximumf>, %64, %cst_26 [1] : vector<64x64xf32> to vector<64xf32>
    %66 = vector.shape_cast %65 : vector<64xf32> to vector<64x1xf32>
    %67 = vector.broadcast %66 : vector<64x1xf32> to vector<64x64xf32>
    %68 = arith.subf %64, %67 : vector<64x64xf32>
    %69 = math.exp %68 : vector<64x64xf32>
    %cst_27 = arith.constant dense<0.000000e+00> : vector<64xf32>
    %70 = vector.multi_reduction <add>, %69, %cst_27 [1] : vector<64x64xf32> to vector<64xf32>
    %71 = vector.shape_cast %70 : vector<64xf32> to vector<64x1xf32>
    %72 = tpu.reciprocal %71 {approx = true} : vector<64x1xf32> -> vector<64x1xf32>
    %73 = vector.broadcast %72 : vector<64x1xf32> to vector<64x64xf32>
    %74 = arith.mulf %69, %73 : vector<64x64xf32>
    %75 = vector.extract_strided_slice %12 {offsets = [0, 24], sizes = [64, 8], strides = [1, 1]} : vector<64x32xf32> to vector<64x8xf32>
    %cst_28 = arith.constant dense<0.000000e+00> : vector<64x8xf32>
    %76 = tpu.matmul %74, %75, %cst_28 {dimension_numbers = #tpu.dot_dimension_numbers<[1], [0], [0], [1], [0, 0, 1, 1], [], []>} : vector<64x64xf32>, vector<64x8xf32>, vector<64x8xf32> -> vector<64x8xf32>
    %77 = tpu.concatenate %31, %46, %61, %76 in 1 : vector<64x8xf32>, vector<64x8xf32>, vector<64x8xf32>, vector<64x8xf32> -> vector<64x32xf32>
    %c0_29 = arith.constant 0 : index
    %c0_30 = arith.constant 0 : index
    %78 = vector.load %arg7[%c0_29, %c0_30] : memref<32x32xf32, #tpu.memory_space<vmem>>, vector<32x32xf32>
    %cst_31 = arith.constant dense<0.000000e+00> : vector<64x32xf32>
    %79 = tpu.matmul %77, %78, %cst_31 {dimension_numbers = #tpu.dot_dimension_numbers<[1], [0], [0], [1], [0, 0, 1, 1], [], []>} : vector<64x32xf32>, vector<32x32xf32>, vector<64x32xf32> -> vector<64x32xf32>
    %c0_32 = arith.constant 0 : index
    %c0_33 = arith.constant 0 : index
    %80 = vector.load %arg8[%c0_32, %c0_33] : memref<1x32xf32, #tpu.memory_space<vmem>>, vector<1x32xf32>
    %81 = vector.broadcast %80 : vector<1x32xf32> to vector<64x32xf32>
    %82 = arith.addf %79, %81 : vector<64x32xf32>
    %83 = arith.addf %0, %82 : vector<64x32xf32>
    %cst_34 = arith.constant dense<0.000000e+00> : vector<64xf32>
    %84 = vector.multi_reduction <add>, %83, %cst_34 [1] : vector<64x32xf32> to vector<64xf32>
    %85 = vector.shape_cast %84 : vector<64xf32> to vector<64x1xf32>
    %cst_35 = arith.constant 3.200000e+01 : f32
    %86 = vector.broadcast %cst_35 : f32 to vector<64x1xf32>
    %87 = arith.divf %85, %86 : vector<64x1xf32>
    %88 = vector.broadcast %87 : vector<64x1xf32> to vector<64x32xf32>
    %89 = arith.subf %83, %88 : vector<64x32xf32>
    %90 = arith.mulf %89, %89 : vector<64x32xf32>
    %cst_36 = arith.constant dense<0.000000e+00> : vector<64xf32>
    %91 = vector.multi_reduction <add>, %90, %cst_36 [1] : vector<64x32xf32> to vector<64xf32>
    %92 = vector.shape_cast %91 : vector<64xf32> to vector<64x1xf32>
    %cst_37 = arith.constant 3.200000e+01 : f32
    %93 = vector.broadcast %cst_37 : f32 to vector<64x1xf32>
    %94 = arith.divf %92, %93 : vector<64x1xf32>
    %cst_38 = arith.constant 9.99999974E-6 : f32
    %95 = vector.broadcast %cst_38 : f32 to vector<64x1xf32>
    %96 = arith.addf %94, %95 : vector<64x1xf32>
    %97 = math.rsqrt %96 : vector<64x1xf32>
    %98 = vector.broadcast %97 : vector<64x1xf32> to vector<64x32xf32>
    %99 = arith.mulf %89, %98 : vector<64x32xf32>
    %c0_39 = arith.constant 0 : index
    %c0_40 = arith.constant 0 : index
    %100 = vector.load %arg9[%c0_39, %c0_40] : memref<1x32xf32, #tpu.memory_space<vmem>>, vector<1x32xf32>
    %101 = vector.broadcast %100 : vector<1x32xf32> to vector<64x32xf32>
    %102 = arith.mulf %99, %101 : vector<64x32xf32>
    %c0_41 = arith.constant 0 : index
    %c0_42 = arith.constant 0 : index
    %103 = vector.load %arg10[%c0_41, %c0_42] : memref<1x32xf32, #tpu.memory_space<vmem>>, vector<1x32xf32>
    %104 = vector.broadcast %103 : vector<1x32xf32> to vector<64x32xf32>
    %105 = arith.addf %102, %104 : vector<64x32xf32>
    %c0_43 = arith.constant 0 : index
    %c0_44 = arith.constant 0 : index
    %106 = vector.load %arg11[%c0_43, %c0_44] : memref<32x4xf32, #tpu.memory_space<vmem>>, vector<32x4xf32>
    %cst_45 = arith.constant dense<0.000000e+00> : vector<64x4xf32>
    %107 = tpu.matmul %105, %106, %cst_45 {dimension_numbers = #tpu.dot_dimension_numbers<[1], [0], [0], [1], [0, 0, 1, 1], [], []>} : vector<64x32xf32>, vector<32x4xf32>, vector<64x4xf32> -> vector<64x4xf32>
    %c0_46 = arith.constant 0 : index
    %c0_47 = arith.constant 0 : index
    %108 = vector.load %arg12[%c0_46, %c0_47] : memref<1x4xf32, #tpu.memory_space<vmem>>, vector<1x4xf32>
    %109 = vector.broadcast %108 : vector<1x4xf32> to vector<64x4xf32>
    %110 = arith.addf %107, %109 : vector<64x4xf32>
    %cst_48 = arith.constant dense<0xFF800000> : vector<64xf32>
    %111 = vector.multi_reduction <maximumf>, %110, %cst_48 [1] : vector<64x4xf32> to vector<64xf32>
    %112 = vector.shape_cast %111 : vector<64xf32> to vector<64x1xf32>
    %113 = vector.broadcast %112 : vector<64x1xf32> to vector<64x4xf32>
    %114 = arith.cmpf oge, %110, %113 : vector<64x4xf32>
    %cst_49 = arith.constant 0xFF800000 : f32
    %115 = vector.broadcast %cst_49 : f32 to vector<64x4xf32>
    %116 = arith.select %114, %115, %110 : vector<64x4xi1>, vector<64x4xf32>
    %cst_50 = arith.constant dense<0xFF800000> : vector<64xf32>
    %117 = vector.multi_reduction <maximumf>, %116, %cst_50 [1] : vector<64x4xf32> to vector<64xf32>
    %118 = vector.shape_cast %117 : vector<64xf32> to vector<64x1xf32>
    %119 = arith.subf %118, %112 : vector<64x1xf32>
    %120 = math.exp %119 : vector<64x1xf32>
    %cst_51 = arith.constant 1.000000e+00 : f32
    %121 = vector.broadcast %cst_51 : f32 to vector<64x1xf32>
    %122 = arith.addf %121, %120 : vector<64x1xf32>
    %123 = vector.broadcast %118 : vector<64x1xf32> to vector<64x4xf32>
    %124 = arith.cmpf oge, %110, %123 : vector<64x4xf32>
    %125 = vector.broadcast %112 : vector<64x1xf32> to vector<64x4xf32>
    %126 = arith.subf %110, %125 : vector<64x4xf32>
    %127 = math.exp %126 : vector<64x4xf32>
    %cst_52 = arith.constant 0.000000e+00 : f32
    %128 = vector.broadcast %cst_52 : f32 to vector<64x4xf32>
    %129 = arith.select %124, %127, %128 : vector<64x4xi1>, vector<64x4xf32>
    %130 = tpu.reciprocal %122 {approx = true} : vector<64x1xf32> -> vector<64x1xf32>
    %131 = vector.broadcast %130 : vector<64x1xf32> to vector<64x4xf32>
    %132 = arith.mulf %129, %131 : vector<64x4xf32>
    %c0_53 = arith.constant 0 : index
    %c0_54 = arith.constant 0 : index
    %c0_55 = arith.constant 0 : index
    %133 = vector.load %arg13[%c0_53, %c0_54, %c0_55] : memref<4x32x64xf32, #tpu.memory_space<vmem>>, vector<1x32x64xf32>
    %134 = vector.shape_cast %133 : vector<1x32x64xf32> to vector<32x64xf32>
    %cst_56 = arith.constant dense<0.000000e+00> : vector<64x64xf32>
    %135 = tpu.matmul %105, %134, %cst_56 {dimension_numbers = #tpu.dot_dimension_numbers<[1], [0], [0], [1], [0, 0, 1, 1], [], []>} : vector<64x32xf32>, vector<32x64xf32>, vector<64x64xf32> -> vector<64x64xf32>
    %c0_57 = arith.constant 0 : index
    %c0_58 = arith.constant 0 : index
    %c0_59 = arith.constant 0 : index
    %136 = vector.load %arg14[%c0_57, %c0_58, %c0_59] : memref<4x1x64xf32, #tpu.memory_space<vmem>>, vector<1x1x64xf32>
    %137 = vector.shape_cast %136 : vector<1x1x64xf32> to vector<1x64xf32>
    %138 = vector.broadcast %137 : vector<1x64xf32> to vector<64x64xf32>
    %139 = arith.addf %135, %138 : vector<64x64xf32>
    %cst_60 = arith.constant 0.000000e+00 : f32
    %140 = vector.broadcast %cst_60 : f32 to vector<64x64xf32>
    %141 = arith.maximumf %139, %140 : vector<64x64xf32>
    %c0_61 = arith.constant 0 : index
    %c0_62 = arith.constant 0 : index
    %c0_63 = arith.constant 0 : index
    %142 = vector.load %arg15[%c0_61, %c0_62, %c0_63] : memref<4x64x32xf32, #tpu.memory_space<vmem>>, vector<1x64x32xf32>
    %143 = vector.shape_cast %142 : vector<1x64x32xf32> to vector<64x32xf32>
    %cst_64 = arith.constant dense<0.000000e+00> : vector<64x32xf32>
    %144 = tpu.matmul %141, %143, %cst_64 {dimension_numbers = #tpu.dot_dimension_numbers<[1], [0], [0], [1], [0, 0, 1, 1], [], []>} : vector<64x64xf32>, vector<64x32xf32>, vector<64x32xf32> -> vector<64x32xf32>
    %c0_65 = arith.constant 0 : index
    %c0_66 = arith.constant 0 : index
    %c0_67 = arith.constant 0 : index
    %145 = vector.load %arg16[%c0_65, %c0_66, %c0_67] : memref<4x1x32xf32, #tpu.memory_space<vmem>>, vector<1x1x32xf32>
    %146 = vector.shape_cast %145 : vector<1x1x32xf32> to vector<1x32xf32>
    %147 = vector.broadcast %146 : vector<1x32xf32> to vector<64x32xf32>
    %148 = arith.addf %144, %147 : vector<64x32xf32>
    %149 = vector.extract_strided_slice %132 {offsets = [0, 0], sizes = [64, 1], strides = [1, 1]} : vector<64x4xf32> to vector<64x1xf32>
    %150 = vector.broadcast %149 : vector<64x1xf32> to vector<64x32xf32>
    %151 = arith.mulf %150, %148 : vector<64x32xf32>
    %152 = arith.addf %105, %151 : vector<64x32xf32>
    %c1 = arith.constant 1 : index
    %c0_68 = arith.constant 0 : index
    %c0_69 = arith.constant 0 : index
    %153 = vector.load %arg13[%c1, %c0_68, %c0_69] : memref<4x32x64xf32, #tpu.memory_space<vmem>>, vector<1x32x64xf32>
    %154 = vector.shape_cast %153 : vector<1x32x64xf32> to vector<32x64xf32>
    %cst_70 = arith.constant dense<0.000000e+00> : vector<64x64xf32>
    %155 = tpu.matmul %105, %154, %cst_70 {dimension_numbers = #tpu.dot_dimension_numbers<[1], [0], [0], [1], [0, 0, 1, 1], [], []>} : vector<64x32xf32>, vector<32x64xf32>, vector<64x64xf32> -> vector<64x64xf32>
    %c1_71 = arith.constant 1 : index
    %c0_72 = arith.constant 0 : index
    %c0_73 = arith.constant 0 : index
    %156 = vector.load %arg14[%c1_71, %c0_72, %c0_73] : memref<4x1x64xf32, #tpu.memory_space<vmem>>, vector<1x1x64xf32>
    %157 = vector.shape_cast %156 : vector<1x1x64xf32> to vector<1x64xf32>
    %158 = vector.broadcast %157 : vector<1x64xf32> to vector<64x64xf32>
    %159 = arith.addf %155, %158 : vector<64x64xf32>
    %cst_74 = arith.constant 0.000000e+00 : f32
    %160 = vector.broadcast %cst_74 : f32 to vector<64x64xf32>
    %161 = arith.maximumf %159, %160 : vector<64x64xf32>
    %c1_75 = arith.constant 1 : index
    %c0_76 = arith.constant 0 : index
    %c0_77 = arith.constant 0 : index
    %162 = vector.load %arg15[%c1_75, %c0_76, %c0_77] : memref<4x64x32xf32, #tpu.memory_space<vmem>>, vector<1x64x32xf32>
    %163 = vector.shape_cast %162 : vector<1x64x32xf32> to vector<64x32xf32>
    %cst_78 = arith.constant dense<0.000000e+00> : vector<64x32xf32>
    %164 = tpu.matmul %161, %163, %cst_78 {dimension_numbers = #tpu.dot_dimension_numbers<[1], [0], [0], [1], [0, 0, 1, 1], [], []>} : vector<64x64xf32>, vector<64x32xf32>, vector<64x32xf32> -> vector<64x32xf32>
    %c1_79 = arith.constant 1 : index
    %c0_80 = arith.constant 0 : index
    %c0_81 = arith.constant 0 : index
    %165 = vector.load %arg16[%c1_79, %c0_80, %c0_81] : memref<4x1x32xf32, #tpu.memory_space<vmem>>, vector<1x1x32xf32>
    %166 = vector.shape_cast %165 : vector<1x1x32xf32> to vector<1x32xf32>
    %167 = vector.broadcast %166 : vector<1x32xf32> to vector<64x32xf32>
    %168 = arith.addf %164, %167 : vector<64x32xf32>
    %169 = vector.extract_strided_slice %132 {offsets = [0, 1], sizes = [64, 1], strides = [1, 1]} : vector<64x4xf32> to vector<64x1xf32>
    %170 = vector.broadcast %169 : vector<64x1xf32> to vector<64x32xf32>
    %171 = arith.mulf %170, %168 : vector<64x32xf32>
    %172 = arith.addf %152, %171 : vector<64x32xf32>
    %c2 = arith.constant 2 : index
    %c0_82 = arith.constant 0 : index
    %c0_83 = arith.constant 0 : index
    %173 = vector.load %arg13[%c2, %c0_82, %c0_83] : memref<4x32x64xf32, #tpu.memory_space<vmem>>, vector<1x32x64xf32>
    %174 = vector.shape_cast %173 : vector<1x32x64xf32> to vector<32x64xf32>
    %cst_84 = arith.constant dense<0.000000e+00> : vector<64x64xf32>
    %175 = tpu.matmul %105, %174, %cst_84 {dimension_numbers = #tpu.dot_dimension_numbers<[1], [0], [0], [1], [0, 0, 1, 1], [], []>} : vector<64x32xf32>, vector<32x64xf32>, vector<64x64xf32> -> vector<64x64xf32>
    %c2_85 = arith.constant 2 : index
    %c0_86 = arith.constant 0 : index
    %c0_87 = arith.constant 0 : index
    %176 = vector.load %arg14[%c2_85, %c0_86, %c0_87] : memref<4x1x64xf32, #tpu.memory_space<vmem>>, vector<1x1x64xf32>
    %177 = vector.shape_cast %176 : vector<1x1x64xf32> to vector<1x64xf32>
    %178 = vector.broadcast %177 : vector<1x64xf32> to vector<64x64xf32>
    %179 = arith.addf %175, %178 : vector<64x64xf32>
    %cst_88 = arith.constant 0.000000e+00 : f32
    %180 = vector.broadcast %cst_88 : f32 to vector<64x64xf32>
    %181 = arith.maximumf %179, %180 : vector<64x64xf32>
    %c2_89 = arith.constant 2 : index
    %c0_90 = arith.constant 0 : index
    %c0_91 = arith.constant 0 : index
    %182 = vector.load %arg15[%c2_89, %c0_90, %c0_91] : memref<4x64x32xf32, #tpu.memory_space<vmem>>, vector<1x64x32xf32>
    %183 = vector.shape_cast %182 : vector<1x64x32xf32> to vector<64x32xf32>
    %cst_92 = arith.constant dense<0.000000e+00> : vector<64x32xf32>
    %184 = tpu.matmul %181, %183, %cst_92 {dimension_numbers = #tpu.dot_dimension_numbers<[1], [0], [0], [1], [0, 0, 1, 1], [], []>} : vector<64x64xf32>, vector<64x32xf32>, vector<64x32xf32> -> vector<64x32xf32>
    %c2_93 = arith.constant 2 : index
    %c0_94 = arith.constant 0 : index
    %c0_95 = arith.constant 0 : index
    %185 = vector.load %arg16[%c2_93, %c0_94, %c0_95] : memref<4x1x32xf32, #tpu.memory_space<vmem>>, vector<1x1x32xf32>
    %186 = vector.shape_cast %185 : vector<1x1x32xf32> to vector<1x32xf32>
    %187 = vector.broadcast %186 : vector<1x32xf32> to vector<64x32xf32>
    %188 = arith.addf %184, %187 : vector<64x32xf32>
    %189 = vector.extract_strided_slice %132 {offsets = [0, 2], sizes = [64, 1], strides = [1, 1]} : vector<64x4xf32> to vector<64x1xf32>
    %190 = vector.broadcast %189 : vector<64x1xf32> to vector<64x32xf32>
    %191 = arith.mulf %190, %188 : vector<64x32xf32>
    %192 = arith.addf %172, %191 : vector<64x32xf32>
    %c3 = arith.constant 3 : index
    %c0_96 = arith.constant 0 : index
    %c0_97 = arith.constant 0 : index
    %193 = vector.load %arg13[%c3, %c0_96, %c0_97] : memref<4x32x64xf32, #tpu.memory_space<vmem>>, vector<1x32x64xf32>
    %194 = vector.shape_cast %193 : vector<1x32x64xf32> to vector<32x64xf32>
    %cst_98 = arith.constant dense<0.000000e+00> : vector<64x64xf32>
    %195 = tpu.matmul %105, %194, %cst_98 {dimension_numbers = #tpu.dot_dimension_numbers<[1], [0], [0], [1], [0, 0, 1, 1], [], []>} : vector<64x32xf32>, vector<32x64xf32>, vector<64x64xf32> -> vector<64x64xf32>
    %c3_99 = arith.constant 3 : index
    %c0_100 = arith.constant 0 : index
    %c0_101 = arith.constant 0 : index
    %196 = vector.load %arg14[%c3_99, %c0_100, %c0_101] : memref<4x1x64xf32, #tpu.memory_space<vmem>>, vector<1x1x64xf32>
    %197 = vector.shape_cast %196 : vector<1x1x64xf32> to vector<1x64xf32>
    %198 = vector.broadcast %197 : vector<1x64xf32> to vector<64x64xf32>
    %199 = arith.addf %195, %198 : vector<64x64xf32>
    %cst_102 = arith.constant 0.000000e+00 : f32
    %200 = vector.broadcast %cst_102 : f32 to vector<64x64xf32>
    %201 = arith.maximumf %199, %200 : vector<64x64xf32>
    %c3_103 = arith.constant 3 : index
    %c0_104 = arith.constant 0 : index
    %c0_105 = arith.constant 0 : index
    %202 = vector.load %arg15[%c3_103, %c0_104, %c0_105] : memref<4x64x32xf32, #tpu.memory_space<vmem>>, vector<1x64x32xf32>
    %203 = vector.shape_cast %202 : vector<1x64x32xf32> to vector<64x32xf32>
    %cst_106 = arith.constant dense<0.000000e+00> : vector<64x32xf32>
    %204 = tpu.matmul %201, %203, %cst_106 {dimension_numbers = #tpu.dot_dimension_numbers<[1], [0], [0], [1], [0, 0, 1, 1], [], []>} : vector<64x64xf32>, vector<64x32xf32>, vector<64x32xf32> -> vector<64x32xf32>
    %c3_107 = arith.constant 3 : index
    %c0_108 = arith.constant 0 : index
    %c0_109 = arith.constant 0 : index
    %205 = vector.load %arg16[%c3_107, %c0_108, %c0_109] : memref<4x1x32xf32, #tpu.memory_space<vmem>>, vector<1x1x32xf32>
    %206 = vector.shape_cast %205 : vector<1x1x32xf32> to vector<1x32xf32>
    %207 = vector.broadcast %206 : vector<1x32xf32> to vector<64x32xf32>
    %208 = arith.addf %204, %207 : vector<64x32xf32>
    %209 = vector.extract_strided_slice %132 {offsets = [0, 3], sizes = [64, 1], strides = [1, 1]} : vector<64x4xf32> to vector<64x1xf32>
    %210 = vector.broadcast %209 : vector<64x1xf32> to vector<64x32xf32>
    %211 = arith.mulf %210, %208 : vector<64x32xf32>
    %212 = arith.addf %192, %211 : vector<64x32xf32>
    %c0_110 = arith.constant 0 : index
    %c0_111 = arith.constant 0 : index
    %213 = vector.load %arg17[%c0_110, %c0_111] : memref<64x32xf32, #tpu.memory_space<vmem>>, vector<64x32xf32>
    tpu.vector_store %arg17[%c0_110, %c0_111], %212 {strides = array<i32>} : memref<64x32xf32, #tpu.memory_space<vmem>>, vector<64x32xf32>,
    return
  }
  func.func @transform_0(%arg0: i32) -> (i32, i32) {
    %c0_i32 = arith.constant 0 : i32
    %c0_i32_0 = arith.constant 0 : i32
    return %arg0, %c0_i32 : i32, i32
  }
  func.func @transform_1(%arg0: i32) -> (i32, i32) {
    %c0_i32 = arith.constant 0 : i32
    %c0_i32_0 = arith.constant 0 : i32
    return %arg0, %c0_i32 : i32, i32
  }
  func.func @transform_2(%arg0: i32) -> (i32, i32) {
    %c0_i32 = arith.constant 0 : i32
    %c0_i32_0 = arith.constant 0 : i32
    %c0_i32_1 = arith.constant 0 : i32
    return %c0_i32, %c0_i32_0 : i32, i32
  }
  func.func @transform_3(%arg0: i32) -> (i32, i32) {
    %c0_i32 = arith.constant 0 : i32
    %c0_i32_0 = arith.constant 0 : i32
    %c0_i32_1 = arith.constant 0 : i32
    return %c0_i32, %c0_i32_0 : i32, i32
  }
  func.func @transform_4(%arg0: i32) -> (i32, i32) {
    %c0_i32 = arith.constant 0 : i32
    %c0_i32_0 = arith.constant 0 : i32
    %c0_i32_1 = arith.constant 0 : i32
    return %c0_i32, %c0_i32_0 : i32, i32
  }
  func.func @transform_5(%arg0: i32) -> (i32, i32) {
    %c0_i32 = arith.constant 0 : i32
    %c0_i32_0 = arith.constant 0 : i32
    %c0_i32_1 = arith.constant 0 : i32
    return %c0_i32, %c0_i32_0 : i32, i32
  }
  func.func @transform_6(%arg0: i32) -> (i32, i32) {
    %c0_i32 = arith.constant 0 : i32
    %c0_i32_0 = arith.constant 0 : i32
    %c0_i32_1 = arith.constant 0 : i32
    return %c0_i32, %c0_i32_0 : i32, i32
  }
  func.func @transform_7(%arg0: i32) -> (i32, i32) {
    %c0_i32 = arith.constant 0 : i32
    %c0_i32_0 = arith.constant 0 : i32
    %c0_i32_1 = arith.constant 0 : i32
    return %c0_i32, %c0_i32_0 : i32, i32
  }
  func.func @transform_8(%arg0: i32) -> (i32, i32) {
    %c0_i32 = arith.constant 0 : i32
    %c0_i32_0 = arith.constant 0 : i32
    %c0_i32_1 = arith.constant 0 : i32
    return %c0_i32, %c0_i32_0 : i32, i32
  }
  func.func @transform_9(%arg0: i32) -> (i32, i32) {
    %c0_i32 = arith.constant 0 : i32
    %c0_i32_0 = arith.constant 0 : i32
    %c0_i32_1 = arith.constant 0 : i32
    return %c0_i32, %c0_i32_0 : i32, i32
  }
  func.func @transform_10(%arg0: i32) -> (i32, i32) {
    %c0_i32 = arith.constant 0 : i32
    %c0_i32_0 = arith.constant 0 : i32
    %c0_i32_1 = arith.constant 0 : i32
    return %c0_i32, %c0_i32_0 : i32, i32
  }
  func.func @transform_11(%arg0: i32) -> (i32, i32) {
    %c0_i32 = arith.constant 0 : i32
    %c0_i32_0 = arith.constant 0 : i32
    %c0_i32_1 = arith.constant 0 : i32
    return %c0_i32, %c0_i32_0 : i32, i32
  }
  func.func @transform_12(%arg0: i32) -> (i32, i32, i32) {
    %c0_i32 = arith.constant 0 : i32
    %c0_i32_0 = arith.constant 0 : i32
    %c0_i32_1 = arith.constant 0 : i32
    %c0_i32_2 = arith.constant 0 : i32
    return %c0_i32, %c0_i32_0, %c0_i32_1 : i32, i32, i32
  }
  func.func @transform_13(%arg0: i32) -> (i32, i32, i32) {
    %c0_i32 = arith.constant 0 : i32
    %c0_i32_0 = arith.constant 0 : i32
    %c0_i32_1 = arith.constant 0 : i32
    %c0_i32_2 = arith.constant 0 : i32
    return %c0_i32, %c0_i32_0, %c0_i32_1 : i32, i32, i32
  }
  func.func @transform_14(%arg0: i32) -> (i32, i32, i32) {
    %c0_i32 = arith.constant 0 : i32
    %c0_i32_0 = arith.constant 0 : i32
    %c0_i32_1 = arith.constant 0 : i32
    %c0_i32_2 = arith.constant 0 : i32
    return %c0_i32, %c0_i32_0, %c0_i32_1 : i32, i32, i32
  }
  func.func @transform_15(%arg0: i32) -> (i32, i32, i32) {
    %c0_i32 = arith.constant 0 : i32
    %c0_i32_0 = arith.constant 0 : i32
    %c0_i32_1 = arith.constant 0 : i32
    %c0_i32_2 = arith.constant 0 : i32
    return %c0_i32, %c0_i32_0, %c0_i32_1 : i32, i32, i32
  }
  func.func @transform_16(%arg0: i32) -> (i32, i32) {
    %c0_i32 = arith.constant 0 : i32
    %c0_i32_0 = arith.constant 0 : i32
    return %arg0, %c0_i32 : i32, i32
  }
}

</mosaic_0001>

<bundles_post_ra>
// kernel: share_en_layer_forward.1
= control target key start
LH: loop header
LB: loop body
LE: loop exit
PB: predicated region body
PF: predicated region fallthrough
CT: control target
= control target key end

     0   :  { %s6376_s21 = smov 0   ;;  %s7889_s0 = inlined_call_operand.vmem [shape: f32[128,32], index: 0, kind: input, shape index: {}]   ;;  %s7890_s1 = inlined_call_operand.vmem [shape: f32[128,32], index: 1, kind: input, shape index: {}]   ;;  %s7891_s2 = inlined_call_operand.vmem [shape: f32[32,64], index: 2, kind: input, shape index: {}]   ;;  %s7892_s3 = inlined_call_operand.vmem [shape: f32[1,64], index: 3, kind: input, shape index: {}]   ;;  %s7893_s4 = inlined_call_operand.vmem [shape: f32[32,32], index: 4, kind: input, shape index: {}]   ;;  %s7894_s5 = inlined_call_operand.vmem [shape: f32[1,32], index: 5, kind: input, shape index: {}]   ;;  %s7895_s6 = inlined_call_operand.vmem [shape: f32[32,32], index: 6, kind: input, shape index: {}]   ;;  %s7896_s7 = inlined_call_operand.vmem [shape: f32[1,32], index: 7, kind: input, shape index: {}]   ;;  %s7897_s8 = inlined_call_operand.vmem [shape: f32[1,32], index: 8, kind: input, shape index: {}]   ;;  %s7898_s9 = inlined_call_operand.vmem [shape: f32[1,32], index: 9, kind: input, shape index: {}]   ;;  %s7899_s10 = inlined_call_operand.vmem [shape: f32[32,4], index: 10, kind: input, shape index: {}]   ;;  %s7900_s11 = inlined_call_operand.vmem [shape: f32[1,4], index: 11, kind: input, shape index: {}]   ;;  %s7901_s12 = inlined_call_operand.vmem [shape: f32[4,32,64], index: 12, kind: input, shape index: {}]   ;;  %s7902_s13 = inlined_call_operand.vmem [shape: f32[4,1,64], index: 13, kind: input, shape index: {}]   ;;  %s7903_s14 = inlined_call_operand.vmem [shape: f32[4,64,32], index: 14, kind: input, shape index: {}]   ;;  %s7904_s15 = inlined_call_operand.vmem [shape: f32[4,1,32], index: 15, kind: input, shape index: {}]   ;;  %s7905_s16 = inlined_call_operand.vmem [shape: f32[128,32], index: 16, kind: output, shape index: {}]  }
   0x1   :  { %7913 = sst [smem:[#allocation17_spill]] %s7889_s0 }
   0x2 LB: > { %s4544_s22 = sadd.s32 4294967295, %s6275_s21   ;;  %p4548_p0 = scmp.ge.s32.totalorder %s6275_s21, 1  ;;  %s6275_s21 = sphi %s6376_s21, %s26_s21  }
   0x3   : > { %p474_p1 = scmp.lt.s32.totalorder %s6275_s21, 3 }
   0x5   : > { %p475_p2 = pnand %p4548_p0, %p474_p1 }
   0x7   : > { %478 = sbr.rel (%p475_p2) target bundleno = 4441 (0x1159), region = 84 }
   0xe   : > { %v571_v0 = vld [vmem:[%s7891_s2] sm:$0xff]  ;;  %v572_v1 = vld [vmem:[%s7891_s2 + $0x8] sm:$0xff]  ;;  %v573_v2 = vld [vmem:[%s7891_s2 + $0x10] sm:$0xff]  ;;  %s4549_s29 = sshll.u32 %s4544_s22, 3  ;;  %s7914_s20 = sld [smem:[#allocation17_spill]]  ;;  %vm582_vm0 = vcmask 261120  }
   0xf   : > { %v5589_v3 = vpack.c.bf16 %v572_v1, %v571_v0  ;;  %v574_v4 = vld [vmem:[%s7891_s2 + $0x18] sm:$0xff]  ;;  %p530_p3 = scmp.lt.s32.totalorder %s4549_s29, 15  ;;  %v4555_v30 = vld [vmem:[%s7892_s3] ss:$0 sm:$0xff]  ;;  %vm884_vm1 = vcmask 64512   ;;  %s6277_s28 = smov 96  }
  0x10   : > { %v5593_v5 = vpack.c.bf16 %v574_v4, %v573_v2  ;;  %v712_v52 = vld [vmem:[%s7893_s4] sm:$0xff]  ;;  %v713_v53 = vld [vmem:[%s7893_s4 + $0x8] sm:$0xff]  ;;  %v714_v54 = vld [vmem:[%s7893_s4 + $0x10] sm:$0xff]  ;;  %vm1030_vm3 = vcmask 523264   ;;  %s6278_s27 = smov 88   ;;  %s6281_s30 = smov 112  }
  0x11   : > { %5590 = vmatprep.subr.bf16.mxu0 %v5589_v3  ;;  %s7950_s29 = smov (!%p530_p3, %s4549_s29), 15  ;;  %v5597_v55 = vpack.c.bf16 %v713_v53, %v712_v52  ;;  %v715_v56 = vld [vmem:[%s7893_s4 + $0x18] sm:$0xff]  ;;  %vm6497_vm2 = vmpackc.low %vm884_vm1, %vm884_vm1  ;;  %s6282_s0 = smov 72   ;;  %vm2590_vm4 = vcmask 130048   ;;  %vm2599_vm5 = vcmask 195584   ;;  %vm3031_vm6 = vcmask 31744  }
  0x12   : > { %5592 = vmatpush3.bf16.msra.mxu0 %v5589_v3  ;;  %s6396_s17 = sshll.u32 %s7950_s29, 3  ;;  %v5601_v57 = vpack.c.bf16 %v715_v56, %v714_v54  ;;  %s6280_s29 = smov 80  }
  0x13   : > { %5594 = vmatprep.subr.bf16.mxu0 %v5593_v5  ;;  %s6408_s25 = scalar_lea.vmem %s7890_s1, %s6396_s17  ;;  %5598 = vmatprep.subr.bf16.mxu1 %v5597_v55  ;;  %s6283_s18 = smov 104  }
  0x14   : > { %s6402_s23 = scalar_lea.vmem %s7914_s20, %s6396_s17  ;;  %v555_v7 = vld [vmem:[%s6408_s25] sm:$0xff]  ;;  %v556_v10 = vld [vmem:[%s6408_s25 + $0x8] sm:$0xff]  ;;  %v557_v12 = vld [vmem:[%s6408_s25 + $0x10] sm:$0xff]  ;;  %5600 = vmatpush3.bf16.msra.mxu1 %v5597_v55  ;;  %s6284_s19 = smov 8  }
  0x15   : > { %v547_v6 = vld [vmem:[%s6402_s23] sm:$0xff]  ;;  %v6413_v8 = vld [vmem:[%s6402_s23 + $0x8] sm:$0xff]  ;;  %v6417_v11 = vld [vmem:[%s6402_s23 + $0x10] sm:$0xff]  ;;  %5602 = vmatprep.subr.bf16.mxu1 %v5601_v57  ;;  %s6285_s20 = smov 16  }
  0x16   : > { %5596 = vmatpush3.bf16.msra.mxu0 %v5593_v5  ;;  %v563_v9 = vadd.f32 %v555_v7, %v547_v6  ;;  %5121 = vmatprep.mubr.msk.f32.mxu1 %vm582_vm0, %v547_v6  ;;  %v564_v13 = vadd.f32 %v556_v10, %v6413_v8  ;;  %v565_v14 = vadd.f32 %v557_v12, %v6417_v11  ;;  %v6424_v15 = vld [vmem:[%s6402_s23 + $0x18] sm:$0xff]  ;;  %v6428_v17 = vld [vmem:[%s6402_s23 + $0x20] sm:$0xff]  ;;  %v552_v21 = vld [vmem:[%s6402_s23 + $0x28] sm:$0xff] }
  0x17   : > { %v558_v16 = vld [vmem:[%s6408_s25 + $0x18] sm:$0xff]  ;;  %v559_v18 = vld [vmem:[%s6408_s25 + $0x20] sm:$0xff]  ;;  %v560_v22 = vld [vmem:[%s6408_s25 + $0x28] sm:$0xff] }
  0x18   : > { %5101 = vmatprep.mubr.msk.f32.mxu0 %vm582_vm0, %v563_v9  ;;  %v566_v19 = vadd.f32 %v558_v16, %v6424_v15  ;;  %v567_v20 = vadd.f32 %v559_v18, %v6428_v17  ;;  %v553_v23 = vld [vmem:[%s6402_s23 + $0x30] sm:$0xff]  ;;  %v568_v25 = vadd.f32 %v560_v22, %v552_v21  ;;  %v554_v27 = vld [vmem:[%s6402_s23 + $0x38] sm:$0xff]  ;;  %5604 = vmatpush3.bf16.msra.mxu1 %v5601_v57 }
  0x19   : > { %5102 = vmatmul.mubr.msk.f32.vlgmr.msra.gmra.mrb[0].mxu0 %vm582_vm0, %v564_v13  ;;  %v561_v24 = vld [vmem:[%s6408_s25 + $0x30] sm:$0xff]  ;;  %v562_v28 = vld [vmem:[%s6408_s25 + $0x38] sm:$0xff] }
  0x1a   : > { %5104 = vmatprep.mubr.msk.f32.mxu0 %vm582_vm0, %v565_v14  ;;  %v569_v26 = vadd.f32 %v561_v24, %v553_v23  ;;  %v570_v29 = vadd.f32 %v562_v28, %v554_v27 }
  0x1b   : > { %5122 = vmatmul.mubr.msk.f32.vlgmr.msra.gmra.mrb[0].mxu1 %vm582_vm0, %v6413_v8 }
  0x1c   : > { %5124 = vmatprep.mubr.msk.f32.mxu1 %vm582_vm0, %v6417_v11 }
  0x1d   : > { %5105 = vmatmul.mubr.msk.f32.gmra.mrb[2].mxu0 %vm582_vm0, %v566_v19 }
  0x1e   : > { %5107 = vmatprep.mubr.msk.f32.mxu0 %vm582_vm0, %v567_v20 }
  0x1f   : > { %5125 = vmatmul.mubr.msk.f32.gmra.mrb[2].mxu1 %vm582_vm0, %v6424_v15 }
  0x20   : > { %5127 = vmatprep.mubr.msk.f32.mxu1 %vm582_vm0, %v6428_v17 }
  0x21   : > { %5108 = vmatmul.mubr.msk.f32.gmra.mrb[4].mxu0 %vm582_vm0, %v568_v25 }
  0x22   : > { %5110 = vmatprep.mubr.msk.f32.mxu0 %vm582_vm0, %v569_v26 }
  0x23   : > { %5128 = vmatmul.mubr.msk.f32.gmra.mrb[4].mxu1 %vm582_vm0, %v552_v21 }
  0x24   : > { %5130 = vmatprep.mubr.msk.f32.mxu1 %vm582_vm0, %v553_v23 }
  0x25   : > { %5111 = vmatmul.mubr.msk.f32.gmra.mrb[6].mxu0 %vm582_vm0, %v570_v29 }
  0x27   : > { %5131 = vmatmul.mubr.msk.f32.gmra.mrb[6].mxu1 %vm582_vm0, %v554_v27 }
  0xec   : > { %v5103_v31 = vpop.f32.mrb[0].mxu0 }
  0xed   : > { %v6450_v32 = vadd.f32 %v5103_v31, %v4555_v30  ;;  %v673_v33 = vpop.f32.mrb[1].mxu0 }
  0xee   : > { %v674_v34 = vadd.f32 %v4555_v30, %v673_v33  ;;  %v5123_v33 = vpop.f32.mrb[0].mxu1 }
  0xef   : > { %v6518_v11 = vmul.f32 0.35355338, %v6450_v32 }
  0xf0   : > { %v6453_v35 = vpack.i.bf16 %v6450_v32, %v674_v34  ;;  %v6455_v36 = vmul.f32 0.35355338, %v674_v34  ;;  %v5106_v37 = vpop.f32.mrb[2].mxu0 }
  0xf1   : > { %v6457_v38 = vadd.f32 %v5106_v37, %v4555_v30  ;;  %v683_v39 = vpop.f32.mrb[3].mxu0  ;;  %v4564_v37 = vld [vmem:[%s7894_s5] ss:$0 sm:$0xff] }
  0xf2   : > { %5900 = vrot.lane.b32.xlu0 %v6453_v35, %s6277_s28  ;;  %5149 = vmatprep.mubr.msk.f32.mxu0 %vm884_vm1, %v6455_v36  ;;  %v684_v40 = vadd.f32 %v4555_v30, %v683_v39  ;;  %v6570_v39 = vadd.f32 %v5123_v33, %v4564_v37 }
  0xf3   : > { %v6527_v13 = vmul.f32 0.35355338, %v6457_v38 }
  0xf4   : > { %v6463_v41 = vpack.i.bf16 %v6457_v38, %v684_v40  ;;  %v5109_v42 = vpop.f32.mrb[4].mxu0  ;;  %v6520_v12 = vmul.f32 0.35355338, %v684_v40  ;;  %v813_v38 = vpop.f32.mrb[1].mxu1 }
  0xf5   : > { %v699_v43 = vadd.f32 %v5109_v42, %v4555_v30  ;;  %v693_v44 = vpop.f32.mrb[5].mxu0  ;;  %v6572_v40 = vadd.f32 %v4564_v37, %v813_v38  ;;  %v5126_v42 = vpop.f32.mrb[2].mxu1 }
  0xf6   : > { %5905 = vrot.lane.b32.xlu0 %v6463_v41, %s6277_s28  ;;  %v694_v45 = vadd.f32 %v4555_v30, %v693_v44  ;;  %v823_v44 = vpop.f32.mrb[3].mxu1 }
  0xf7   : > { %v6535_v15 = vmul.f32 0.35355338, %v699_v43 }
  0xf8   : > { %v6466_v46 = vpack.i.bf16 %v699_v43, %v694_v45  ;;  %v5112_v47 = vpop.f32.mrb[6].mxu0  ;;  %v6529_v14 = vmul.f32 0.35355338, %v694_v45  ;;  %v5629_v43 = vpack.c.bf16 %v6570_v39, %v6572_v40  ;;  %v6576_v45 = vadd.f32 %v5126_v42, %v4564_v37 }
  0xf9   : > { %v709_v48 = vadd.f32 %v5112_v47, %v4555_v30  ;;  %v703_v49 = vpop.f32.mrb[7].mxu0  ;;  %v6578_v47 = vadd.f32 %v4564_v37, %v823_v44 }
  0xfa   : > { %5910 = vrot.lane.b32.xlu1 %v6466_v46, %s6277_s28  ;;  %v704_v50 = vadd.f32 %v4555_v30, %v703_v49  ;;  %5630 = vmatprep.subr.bf16.mxu1 %v5629_v43 }
  0xfb   : > { %v6543_v17 = vmul.f32 0.35355338, %v709_v48  ;;  %5632 = vmatpush3.bf16.msra.mxu1 %v5629_v43  ;;  %v5633_v49 = vpack.c.bf16 %v6576_v45, %v6578_v47 }
  0xfc   : > { %v6469_v51 = vpack.i.bf16 %v709_v48, %v704_v50  ;;  %v6537_v16 = vmul.f32 0.35355338, %v704_v50  ;;  %v5129_v48 = vpop.f32.mrb[4].mxu1 }
  0xfd   : > { %v833_v50 = vpop.f32.mrb[5].mxu1  ;;  %v6582_v52 = vadd.f32 %v5129_v48, %v4564_v37  ;;  %5634 = vmatprep.subr.bf16.mxu1 %v5633_v49 }
  0xfe   : > { %5915 = vrot.lane.b32.xlu1 %v6469_v51, %s6277_s28  ;;  %v6584_v53 = vadd.f32 %v4564_v37, %v833_v50  ;;  %v5132_v54 = vpop.f32.mrb[6].mxu1  ;;  %s6279_s28 = smov 120  }
  0xff   : > { %5636 = vmatpush3.bf16.msra.mxu1 %v5633_v49  ;;  %v843_v56 = vpop.f32.mrb[7].mxu1  ;;  %v6590_v57 = vadd.f32 %v5132_v54, %v4564_v37 }
 0x100   : > { %v5637_v55 = vpack.c.bf16 %v6582_v52, %v6584_v53 }
 0x102   : > { %5638 = vmatprep.subr.bf16.mxu1 %v5637_v55 }
 0x103   : > { %5640 = vmatpush3.bf16.msra.mxu1 %v5637_v55 }
 0x164   : > { %v5901_v58 = vpop.permute.xlu0 %5900 }
 0x165   : > { %v5903_v59 = vunpack.i.h.bf16 %v5901_v58  ;;  %v5902_v60 = vunpack.i.l.bf16 %v5901_v58  ;;  %v6592_v58 = vadd.f32 %v4564_v37, %v843_v56 }
 0x167   : > { %v5605_v62 = vpack.c.bf16 %v5903_v59, %v5902_v60  ;;  %v5641_v59 = vpack.c.bf16 %v6590_v57, %v6592_v58 }
 0x168   : > { %v5906_v63 = vpop.permute.xlu0 %5905 }
 0x169   : > { %5607 = vmatprep.subr.msk.bf16.mxu0 %vm6497_vm2, %v5605_v62  ;;  %v5908_v0 = vunpack.i.h.bf16 %v5906_v63  ;;  %v5907_v1 = vunpack.i.l.bf16 %v5906_v63  ;;  %5642 = vmatprep.subr.bf16.mxu1 %v5641_v59 }
 0x16a   : > { %5610 = vmatpush3.bf16.xpose.msk.msra.mxu0 %vm6497_vm2, %v5605_v62  ;;  %5644 = vmatpush3.bf16.msra.mxu1 %v5641_v59 }
 0x16b   : > { %v5611_v2 = vpack.c.bf16 %v5908_v0, %v5907_v1 }
 0x16c   : > { %v5911_v3 = vpop.permute.xlu1 %5910 }
 0x16d   : > { %5613 = vmatprep.subr.msk.bf16.mxu0 %vm6497_vm2, %v5611_v2  ;;  %v5913_v4 = vunpack.i.h.bf16 %v5911_v3  ;;  %v5912_v5 = vunpack.i.l.bf16 %v5911_v3 }
 0x16f   : > { %v5617_v6 = vpack.c.bf16 %v5913_v4, %v5912_v5 }
 0x170   : > { %v5916_v7 = vpop.permute.xlu1 %5915 }
 0x171   : > { %v5918_v8 = vunpack.i.h.bf16 %v5916_v7  ;;  %v5917_v9 = vunpack.i.l.bf16 %v5916_v7 }
 0x172   : > { %5616 = vmatpush3.bf16.xpose.msk.msra.mxu0 %vm6497_vm2, %v5611_v2 }
 0x173   : > { %5619 = vmatprep.subr.msk.bf16.mxu0 %vm6497_vm2, %v5617_v6  ;;  %v5623_v10 = vpack.c.bf16 %v5918_v8, %v5917_v9 }
 0x17a   : > { %5622 = vmatpush3.bf16.xpose.msk.msra.mxu0 %vm6497_vm2, %v5617_v6 }
 0x17b   : > { %5625 = vmatprep.subr.msk.bf16.mxu0 %vm6497_vm2, %v5623_v10 }
 0x182   : > { %5628 = vmatpush3.bf16.xpose.msk.msra.mxu0 %vm6497_vm2, %v5623_v10 }
 0x189   : > { %5150 = vmatmul.mubr.msk.f32.vlgmr.msra.gmra.mrb[8].mxu0 %vm884_vm1, %v6518_v11 }
 0x18a   : > { %5152 = vmatprep.mubr.msk.f32.mxu0 %vm884_vm1, %v6520_v12 }
 0x18d   : > { %5153 = vmatmul.mubr.msk.f32.gmra.mrb[10].mxu0 %vm884_vm1, %v6527_v13 }
 0x18e   : > { %5155 = vmatprep.mubr.msk.f32.mxu0 %vm884_vm1, %v6529_v14 }
 0x191   : > { %5156 = vmatmul.mubr.msk.f32.gmra.mrb[12].mxu0 %vm884_vm1, %v6535_v15 }
 0x192   : > { %5158 = vmatprep.mubr.msk.f32.mxu0 %vm884_vm1, %v6537_v16 }
 0x195   : > { %5159 = vmatmul.mubr.msk.f32.gmra.mrb[14].mxu0 %vm884_vm1, %v6543_v17 }
 0x25c   : > { %v5151_v18 = vpop.f32.mrb[8].mxu0 }
 0x25d   : > { %v991_v19 = vpop.f32.mrb[9].mxu0  ;;  %v1034_v20 = vsel %vm1030_vm3, %v5151_v18, -inf }
 0x25e   : > { %1035 = vmax.xlane.f32.xlu1 %v1034_v20  ;;  %v1031_v21 = vsel %vm1030_vm3, %v991_v19, -inf }
 0x25f   : > { %1032 = vmax.xlane.f32.xlu0 %v1031_v21 }
 0x260   : > { %v6549_v22 = vpop.f32.mrb[10].mxu0 }
 0x261   : > { %v1001_v23 = vpop.f32.mrb[11].mxu0  ;;  %v1040_v27 = vsel %vm1030_vm3, %v6549_v22, -inf }
 0x262   : > { %v1037_v24 = vsel %vm1030_vm3, %v1001_v23, -inf }
 0x263   : > { %1038 = vmax.xlane.f32.xlu0 %v1037_v24 }
 0x264   : > { %v6552_v25 = vpop.f32.mrb[12].mxu0 }
 0x265   : > { %v1011_v26 = vpop.f32.mrb[13].mxu0  ;;  %v1046_v31 = vsel %vm1030_vm3, %v6552_v25, -inf }
 0x266   : > { %v1043_v28 = vsel %vm1030_vm3, %v1011_v26, -inf }
 0x267   : > { %1041 = vmax.xlane.f32.xlu0 %v1040_v27  ;;  %1044 = vmax.xlane.f32.xlu1 %v1043_v28 }
 0x268   : > { %v6557_v29 = vpop.f32.mrb[14].mxu0 }
 0x269   : > { %v6559_v30 = vpop.f32.mrb[15].mxu0  ;;  %v1052_v34 = vsel %vm1030_vm3, %v6557_v29, -inf }
 0x26a   : > { %v1049_v32 = vsel %vm1030_vm3, %v6559_v30, -inf }
 0x26b   : > { %1047 = vmax.xlane.f32.xlu0 %v1046_v31  ;;  %1050 = vmax.xlane.f32.xlu1 %v1049_v32 }
 0x26f   : > { %1053 = vmax.xlane.f32.xlu0 %v1052_v34 }
 0x27c   : > { %5920 = vrot.lane.b32.xlu1 %v6453_v35, %s6278_s27 }
 0x2eb   : > { %v1036_v60 = vpop.xlane.xlu1 %1035 }
 0x2ec   : > { %v1056_v62 = vsub.f32 %v5151_v18, %v1036_v60  ;;  %v1033_v63 = vpop.xlane.xlu0 %1032 }
 0x2ed   : > { %v1055_v0 = vsub.f32 %v991_v19, %v1033_v63 }
 0x2ee   : > { %v1065_v1 = vmul.f32 1.442695, %v1056_v62 }
 0x2ef   : > { %v1063_v2 = vmul.f32 1.442695, %v1055_v0 }
 0x2f0   : > { %6069 = vpow2.f32 %v1065_v1  ;;  %v1039_v3 = vpop.xlane.xlu0 %1038 }
 0x2f1   : > { %6071 = vpow2.f32 %v1063_v2  ;;  %v1057_v4 = vsub.f32 %v1001_v23, %v1039_v3 }
 0x2f3   : > { %v1067_v5 = vmul.f32 1.442695, %v1057_v4 }
 0x2f4   : > { %v1042_v6 = vpop.xlane.xlu0 %1041  ;;  %v1045_v7 = vpop.xlane.xlu1 %1044 }
 0x2f5   : > { %6073 = vpow2.f32 %v1067_v5  ;;  %v1058_v8 = vsub.f32 %v6549_v22, %v1042_v6  ;;  %v1059_v9 = vsub.f32 %v1011_v26, %v1045_v7 }
 0x2f7   : > { %v1069_v10 = vmul.f32 1.442695, %v1058_v8  ;;  %v1071_v20 = vmul.f32 1.442695, %v1059_v9 }
 0x2f8   : > { %v1048_v21 = vpop.xlane.xlu0 %1047  ;;  %v1051_v24 = vpop.xlane.xlu1 %1050 }
 0x2f9   : > { %6075 = vpow2.f32 %v1069_v10  ;;  %v1060_v18 = vsub.f32 %v6552_v25, %v1048_v21  ;;  %v1061_v23 = vsub.f32 %v6559_v30, %v1051_v24 }
 0x2fa   : > { %v6598_v19 = vpop.eup %6069  ;;  %6077 = vpow2.f32 %v1071_v20 }
 0x2fb   : > { %v6072_v27 = vpop.eup %6071  ;;  %v1073_v28 = vmul.f32 1.442695, %v1060_v18  ;;  %v1082_v31 = vsel %vm1030_vm3, %v6598_v19, 0.0  ;;  %v1075_v38 = vmul.f32 1.442695, %v1061_v23 }
 0x2fc   : > { %1083 = vadd.xlane.f32.xlu0 %v1082_v31  ;;  %v1054_v22 = vpop.xlane.xlu0 %1053  ;;  %v5921_v26 = vpop.permute.xlu1 %5920  ;;  %v1079_v32 = vsel %vm1030_vm3, %v6072_v27, 0.0 }
 0x2fd   : > { %6079 = vpow2.f32 %v1073_v28  ;;  %v1062_v33 = vsub.f32 %v6557_v29, %v1054_v22  ;;  %v5923_v34 = vunpack.i.h.bf16 %v5921_v26  ;;  %v5922_v25 = vunpack.i.l.bf16 %v5921_v26  ;;  %1080 = vadd.xlane.f32.xlu1 %v1079_v32 }
 0x2ff   : > { %v6074_v37 = vpop.eup %6073  ;;  %v1077_v42 = vmul.f32 1.442695, %v1062_v33  ;;  %v5645_v43 = vpack.c.bf16 %v5923_v34, %v5922_v25 }
 0x300   : > { %v1085_v30 = vsel %vm1030_vm3, %v6074_v37, 0.0 }
 0x301   : > { %6081 = vpow2.f32 %v1077_v42  ;;  %1086 = vadd.xlane.f32.xlu1 %v1085_v30  ;;  %5647 = vmatprep.subr.msk.bf16.mxu1 %vm6497_vm2, %v5645_v43 }
 0x302   : > { %6083 = vpow2.f32 %v1075_v38 }
 0x303   : > { %v6076_v44 = vpop.eup %6075 }
 0x304   : > { %v6078_v48 = vpop.eup %6077  ;;  %v1088_v49 = vsel %vm1030_vm3, %v6076_v44, 0.0 }
 0x305   : > { %1089 = vadd.xlane.f32.xlu0 %v1088_v49  ;;  %v1091_v29 = vsel %vm1030_vm3, %v6078_v48, 0.0 }
 0x306   : > { %1092 = vadd.xlane.f32.xlu1 %v1091_v29 }
 0x307   : > { %v6080_v50 = vpop.eup %6079 }
 0x308   : > { %v1094_v54 = vsel %vm1030_vm3, %v6080_v50, 0.0 }
 0x309   : > { %1095 = vadd.xlane.f32.xlu0 %v1094_v54 }
 0x30b   : > { %v6611_v55 = vpop.eup %6081 }
 0x30c   : > { %v1100_v56 = vsel %vm1030_vm3, %v6611_v55, 0.0  ;;  %v6615_v59 = vpop.eup %6083 }
 0x30d   : > { %1101 = vadd.xlane.f32.xlu0 %v1100_v56  ;;  %v1097_v60 = vsel %vm1030_vm3, %v6615_v59, 0.0 }
 0x311   : > { %1098 = vadd.xlane.f32.xlu0 %v1097_v60 }
 0x317   : > { %5930 = vrot.lane.b32.xlu1 %v6466_v46, %s6278_s27 }
 0x31b   : > { %5935 = vrot.lane.b32.xlu1 %v6469_v51, %s6278_s27 }
 0x31f   : > { %1248 = vrot.lane.b32.xlu1 %v6455_v36, %s6279_s28 }
 0x323   : > { %1250 = vrot.lane.b32.xlu1 %v6518_v11, %s6279_s28 }
 0x327   : > { %1254 = vrot.lane.b32.xlu1 %v6527_v13, %s6279_s28  ;;  %5925 = vrot.lane.b32.xlu0 %v6463_v41, %s6278_s27 }
 0x32b   : > { %1258 = vrot.lane.b32.xlu1 %v6535_v15, %s6279_s28  ;;  %1252 = vrot.lane.b32.xlu0 %v6520_v12, %s6279_s28 }
 0x32f   : > { %1262 = vrot.lane.b32.xlu1 %v6543_v17, %s6279_s28  ;;  %1256 = vrot.lane.b32.xlu0 %v6529_v14, %s6279_s28 }
 0x333   : > { %1260 = vrot.lane.b32.xlu0 %v6537_v16, %s6279_s28 }
 0x389   : > { %v1084_v62 = vpop.xlane.xlu0 %1083 }
 0x38a   : > { %6085 = vrcp.f32 %v1084_v62  ;;  %v1081_v63 = vpop.xlane.xlu1 %1080 }
 0x38b   : > { %6087 = vrcp.f32 %v1081_v63 }
 0x38e   : > { %v1087_v0 = vpop.xlane.xlu1 %1086 }
 0x38f   : > { %6089 = vrcp.f32 %v1087_v0 }
 0x392   : > { %v1090_v1 = vpop.xlane.xlu0 %1089 }
 0x393   : > { %6091 = vrcp.f32 %v1090_v1  ;;  %v1093_v2 = vpop.xlane.xlu1 %1092 }
 0x394   : > { %v6086_v3 = vpop.eup %6085  ;;  %6093 = vrcp.f32 %v1093_v2 }
 0x395   : > { %v6088_v4 = vpop.eup %6087  ;;  %v1112_v7 = vmul.f32 %v6086_v3, %v6598_v19 }
 0x396   : > { %v1096_v5 = vpop.xlane.xlu0 %1095  ;;  %v1111_v6 = vmul.f32 %v6088_v4, %v6072_v27 }
 0x397   : > { %6095 = vrcp.f32 %v1096_v5  ;;  %v5931_v27 = vpop.permute.xlu1 %5930 }
 0x398   : > { %5177 = vmatprep.mubr.msk.f32.mxu1 %vm1030_vm3, %v1111_v6  ;;  %v5933_v22 = vunpack.i.h.bf16 %v5931_v27  ;;  %v5932_v26 = vunpack.i.l.bf16 %v5931_v27 }
 0x399   : > { %v6090_v8 = vpop.eup %6089  ;;  %5178 = vmatmul.mubr.msk.f32.vlgmr.msra.gmra.mrb[8].mxu1 %vm1030_vm3, %v1112_v7 }
 0x39a   : > { %5650 = vmatpush3.bf16.xpose.msk.msra.mxu1 %vm6497_vm2, %v5645_v43  ;;  %v1102_v9 = vpop.xlane.xlu0 %1101  ;;  %v1113_v10 = vmul.f32 %v6090_v8, %v6074_v37  ;;  %v5657_v25 = vpack.c.bf16 %v5933_v22, %v5932_v26  ;;  %v6706_v22 = vpack.i.bf16 %v6570_v39, %v6572_v40  ;;  %v6722_v39 = vpack.i.bf16 %v6582_v52, %v6584_v53 }
 0x39b   : > { %6097 = vrcp.f32 %v1102_v9  ;;  %v5936_v37 = vpop.permute.xlu1 %5935 }
 0x39c   : > { %5180 = vmatprep.mubr.msk.f32.mxu1 %vm1030_vm3, %v1113_v10  ;;  %v5938_v30 = vunpack.i.h.bf16 %v5936_v37 }
 0x39d   : > { %v6092_v20 = vpop.eup %6091 }
 0x39e   : > { %v6094_v21 = vpop.eup %6093  ;;  %v1099_v24 = vpop.xlane.xlu0 %1098  ;;  %v1114_v18 = vmul.f32 %v6092_v20, %v6076_v44  ;;  %v5937_v44 = vunpack.i.l.bf16 %v5936_v37 }
 0x39f   : > { %6099 = vrcp.f32 %v1099_v24  ;;  %v1115_v19 = vmul.f32 %v6094_v21, %v6078_v48  ;;  %v1249_v49 = vpop.permute.xlu1 %1248 }
 0x3a0   : > { %5181 = vmatmul.mubr.msk.f32.gmra.mrb[10].mxu1 %vm1030_vm3, %v1114_v18  ;;  %v5663_v29 = vpack.c.bf16 %v5938_v30, %v5937_v44 }
 0x3a1   : > { %v6096_v28 = vpop.eup %6095  ;;  %5183 = vmatprep.mubr.msk.f32.mxu1 %vm1030_vm3, %v1115_v19 }
 0x3a2   : > { %v5926_v23 = vpop.permute.xlu0 %5925  ;;  %v1116_v31 = vmul.f32 %v6096_v28, %v6080_v50 }
 0x3a3   : > { %v5928_v32 = vunpack.i.h.bf16 %v5926_v23  ;;  %v5927_v33 = vunpack.i.l.bf16 %v5926_v23  ;;  %v1251_v50 = vpop.permute.xlu1 %1250 }
 0x3a4   : > { %5184 = vmatmul.mubr.msk.f32.gmra.mrb[12].mxu1 %vm1030_vm3, %v1116_v31 }
 0x3a5   : > { %v5651_v34 = vpack.c.bf16 %v5928_v32, %v5927_v33  ;;  %v6098_v38 = vpop.eup %6097  ;;  %v6714_v32 = vpack.i.bf16 %v6576_v45, %v6578_v47  ;;  %v6730_v45 = vpack.i.bf16 %v6590_v57, %v6592_v58 }
 0x3a6   : > { %v1118_v48 = vmul.f32 %v6098_v38, %v6611_v55  ;;  %v1253_v54 = vpop.permute.xlu0 %1252 }
 0x3a7   : > { %5653 = vmatprep.subr.msk.bf16.mxu1 %vm6497_vm2, %v5651_v34  ;;  %v1255_v55 = vpop.permute.xlu1 %1254 }
 0x3a8   : > { %5656 = vmatpush3.bf16.xpose.msk.msra.mxu1 %vm6497_vm2, %v5651_v34 }
 0x3a9   : > { %v6100_v42 = vpop.eup %6099  ;;  %5659 = vmatprep.subr.msk.bf16.mxu1 %vm6497_vm2, %v5657_v25 }
 0x3aa   : > { %v1117_v43 = vmul.f32 %v6100_v42, %v6615_v59  ;;  %v1257_v56 = vpop.permute.xlu0 %1256 }
 0x3ab   : > { %v1259_v59 = vpop.permute.xlu1 %1258 }
 0x3ac   : > { %5186 = vmatprep.mubr.msk.f32.mxu1 %vm1030_vm3, %v1117_v43 }
 0x3ad   : > { %5187 = vmatmul.mubr.msk.f32.gmra.mrb[14].mxu1 %vm1030_vm3, %v1118_v48 }
 0x3ae   : > { %5205 = vmatprep.mubr.msk.f32.mxu1 %vm884_vm1, %v1249_v49  ;;  %v1261_v60 = vpop.permute.xlu0 %1260 }
 0x3af   : > { %v1263_v62 = vpop.permute.xlu1 %1262 }
 0x3b0   : > { %5662 = vmatpush3.bf16.xpose.msk.msra.mxu1 %vm6497_vm2, %v5657_v25 }
 0x3b1   : > { %5665 = vmatprep.subr.msk.bf16.mxu1 %vm6497_vm2, %v5663_v29 }
 0x3b8   : > { %5668 = vmatpush3.bf16.xpose.msk.msra.mxu1 %vm6497_vm2, %v5663_v29 }
 0x3bf   : > { %5206 = vmatmul.mubr.msk.f32.vlgmr.msra.gmra.mrb[16].mxu1 %vm884_vm1, %v1251_v50 }
 0x3c0   : > { %5208 = vmatprep.mubr.msk.f32.mxu1 %vm884_vm1, %v1253_v54 }
 0x3c3   : > { %5209 = vmatmul.mubr.msk.f32.gmra.mrb[18].mxu1 %vm884_vm1, %v1255_v55 }
 0x3c4   : > { %5211 = vmatprep.mubr.msk.f32.mxu1 %vm884_vm1, %v1257_v56 }
 0x3c7   : > { %5212 = vmatmul.mubr.msk.f32.gmra.mrb[20].mxu1 %vm884_vm1, %v1259_v59 }
 0x3c8   : > { %5214 = vmatprep.mubr.msk.f32.mxu1 %vm884_vm1, %v1261_v60 }
 0x3cb   : > { %5215 = vmatmul.mubr.msk.f32.gmra.mrb[22].mxu1 %vm884_vm1, %v1263_v62 }
 0x46c   : > { %v6674_v63 = vpop.f32.mrb[8].mxu1 }
 0x46d   : > { %v6676_v0 = vpop.f32.mrb[9].mxu1 }
 0x473   : > { %v6678_v1 = vpop.f32.mrb[10].mxu1 }
 0x474   : > { %v6680_v2 = vpop.f32.mrb[11].mxu1 }
 0x477   : > { %v6682_v3 = vpop.f32.mrb[12].mxu1 }
 0x478   : > { %v6684_v4 = vpop.f32.mrb[13].mxu1 }
 0x480   : > { %v6686_v5 = vpop.f32.mrb[14].mxu1 }
 0x481   : > { %v6688_v6 = vpop.f32.mrb[15].mxu1 }
 0x492   : > { %v5207_v7 = vpop.f32.mrb[16].mxu1 }
 0x493   : > { %v1378_v8 = vpop.f32.mrb[17].mxu1  ;;  %v1420_v9 = vsel %vm1030_vm3, %v5207_v7, -inf }
 0x494   : > { %1421 = vmax.xlane.f32.xlu1 %v1420_v9  ;;  %v1417_v10 = vsel %vm1030_vm3, %v1378_v8, -inf }
 0x495   : > { %1418 = vmax.xlane.f32.xlu0 %v1417_v10 }
 0x496   : > { %v6692_v20 = vpop.f32.mrb[18].mxu1 }
 0x497   : > { %v1388_v21 = vpop.f32.mrb[19].mxu1  ;;  %v1426_v24 = vsel %vm1030_vm3, %v6692_v20, -inf }
 0x498   : > { %v1423_v27 = vsel %vm1030_vm3, %v1388_v21, -inf }
 0x499   : > { %1427 = vmax.xlane.f32.xlu0 %v1426_v24 }
 0x49a   : > { %v5213_v18 = vpop.f32.mrb[20].mxu1 }
 0x49b   : > { %v6696_v19 = vpop.f32.mrb[21].mxu1  ;;  %v1432_v31 = vsel %vm1030_vm3, %v5213_v18, -inf }
 0x49c   : > { %v1429_v33 = vsel %vm1030_vm3, %v6696_v19, -inf }
 0x49d   : > { %1424 = vmax.xlane.f32.xlu0 %v1423_v27 }
 0x49e   : > { %v6699_v28 = vpop.f32.mrb[22].mxu1 }
 0x49f   : > { %v6701_v23 = vpop.f32.mrb[23].mxu1  ;;  %v1438_v26 = vsel %vm1030_vm3, %v6699_v28, -inf }
 0x4a0   : > { %v1435_v40 = vsel %vm1030_vm3, %v6701_v23, -inf }
 0x4a1   : > { %1433 = vmax.xlane.f32.xlu0 %v1432_v31 }
 0x4a5   : > { %5940 = vrot.lane.b32.xlu1 %v6706_v22, %s6279_s28  ;;  %1439 = vmax.xlane.f32.xlu0 %v1438_v26 }
 0x4bb   : > { %5945 = vrot.lane.b32.xlu0 %v6714_v32, %s6279_s28 }
 0x4c9   : > { %1430 = vmax.xlane.f32.xlu1 %v1429_v33 }
 0x4da   : > { %5950 = vrot.lane.b32.xlu1 %v6722_v39, %s6279_s28 }
 0x4fe   : > { %1436 = vmax.xlane.f32.xlu1 %v1435_v40 }
 0x50f   : > { %5955 = vrot.lane.b32.xlu1 %v6730_v45, %s6279_s28 }
 0x521   : > { %v1422_v47 = vpop.xlane.xlu1 %1421 }
 0x522   : > { %v1442_v34 = vsub.f32 %v5207_v7, %v1422_v47  ;;  %v1419_v25 = vpop.xlane.xlu0 %1418 }
 0x523   : > { %v1441_v37 = vsub.f32 %v1378_v8, %v1419_v25 }
 0x524   : > { %v1451_v52 = vmul.f32 1.442695, %v1442_v34 }
 0x525   : > { %v1449_v53 = vmul.f32 1.442695, %v1441_v37  ;;  %v5941_v38 = vpop.permute.xlu1 %5940 }
 0x526   : > { %6101 = vpow2.f32 %v1451_v52  ;;  %v5943_v42 = vunpack.i.h.bf16 %v5941_v38  ;;  %v5942_v43 = vunpack.i.l.bf16 %v5941_v38  ;;  %v1428_v30 = vpop.xlane.xlu0 %1427 }
 0x527   : > { %6103 = vpow2.f32 %v1449_v53  ;;  %v1444_v27 = vsub.f32 %v6692_v20, %v1428_v30 }
 0x528   : > { %v5669_v44 = vpack.c.bf16 %v5943_v42, %v5942_v43 }
 0x529   : > { %v1455_v26 = vmul.f32 1.442695, %v1444_v27 }
 0x52a   : > { %5670 = vmatprep.subr.bf16.mxu0 %v5669_v44  ;;  %v1425_v48 = vpop.xlane.xlu0 %1424 }
 0x52b   : > { %v1443_v57 = vsub.f32 %v1388_v21, %v1425_v48  ;;  %5672 = vmatpush3.bf16.msra.mxu0 %v5669_v44 }
 0x52d   : > { %v1453_v58 = vmul.f32 1.442695, %v1443_v57 }
 0x52e   : > { %v1434_v49 = vpop.xlane.xlu0 %1433 }
 0x52f   : > { %6105 = vpow2.f32 %v1453_v58  ;;  %v1446_v29 = vsub.f32 %v5213_v18, %v1434_v49 }
 0x530   : > { %v6734_v50 = vpop.eup %6101 }
 0x531   : > { %v6736_v54 = vpop.eup %6103  ;;  %v1459_v55 = vmul.f32 1.442695, %v1446_v29  ;;  %v1468_v56 = vsel %vm1030_vm3, %v6734_v50, 0.0 }
 0x532   : > { %1469 = vadd.xlane.f32.xlu0 %v1468_v56  ;;  %v1440_v59 = vpop.xlane.xlu0 %1439  ;;  %v1465_v60 = vsel %vm1030_vm3, %v6736_v54, 0.0 }
 0x533   : > { %6107 = vpow2.f32 %v1459_v55  ;;  %1466 = vadd.xlane.f32.xlu1 %v1465_v60  ;;  %v1448_v31 = vsub.f32 %v6699_v28, %v1440_v59 }
 0x534   : > { %6109 = vpow2.f32 %v1455_v26 }
 0x535   : > { %v1463_v47 = vmul.f32 1.442695, %v1448_v31 }
 0x536   : > { %v5946_v62 = vpop.permute.xlu0 %5945 }
 0x537   : > { %v5948_v7 = vunpack.i.h.bf16 %v5946_v62  ;;  %v5947_v8 = vunpack.i.l.bf16 %v5946_v62 }
 0x539   : > { %v6742_v9 = vpop.eup %6105  ;;  %v5673_v10 = vpack.c.bf16 %v5948_v7, %v5947_v8 }
 0x53a   : > { %v1471_v21 = vsel %vm1030_vm3, %v6742_v9, 0.0 }
 0x53b   : > { %1472 = vadd.xlane.f32.xlu0 %v1471_v21  ;;  %5674 = vmatprep.subr.bf16.mxu0 %v5673_v10 }
 0x53c   : > { %5676 = vmatpush3.bf16.msra.mxu0 %v5673_v10 }
 0x53d   : > { %v6746_v24 = vpop.eup %6107 }
 0x53e   : > { %v1480_v18 = vsel %vm1030_vm3, %v6746_v24, 0.0  ;;  %v6755_v38 = vpop.eup %6109 }
 0x53f   : > { %1481 = vadd.xlane.f32.xlu0 %v1480_v18 }
 0x544   : > { %5960 = vrot.lane.b32.xlu1 %v6453_v35, %s6280_s29 }
 0x556   : > { %v1431_v33 = vpop.xlane.xlu1 %1430 }
 0x557   : > { %v1445_v40 = vsub.f32 %v6696_v19, %v1431_v33  ;;  %v1474_v19 = vsel %vm1030_vm3, %v6755_v38, 0.0 }
 0x559   : > { %v1457_v34 = vmul.f32 1.442695, %v1445_v40 }
 0x55a   : > { %v5951_v25 = vpop.permute.xlu1 %5950 }
 0x55b   : > { %6111 = vpow2.f32 %v1457_v34  ;;  %v5953_v37 = vunpack.i.h.bf16 %v5951_v25  ;;  %v5952_v52 = vunpack.i.l.bf16 %v5951_v25 }
 0x55c   : > { %6113 = vpow2.f32 %v1463_v47 }
 0x55d   : > { %v5677_v53 = vpack.c.bf16 %v5953_v37, %v5952_v52 }
 0x55f   : > { %5678 = vmatprep.subr.bf16.mxu0 %v5677_v53 }
 0x560   : > { %5680 = vmatpush3.bf16.msra.mxu0 %v5677_v53 }
 0x565   : > { %v6757_v20 = vpop.eup %6111 }
 0x566   : > { %v1477_v28 = vsel %vm1030_vm3, %v6757_v20, 0.0  ;;  %v6761_v42 = vpop.eup %6113 }
 0x567   : > { %1478 = vadd.xlane.f32.xlu0 %v1477_v28  ;;  %v1486_v43 = vsel %vm1030_vm3, %v6761_v42, 0.0 }
 0x568   : > { %1475 = vadd.xlane.f32.xlu1 %v1474_v19 }
 0x56b   : > { %1487 = vadd.xlane.f32.xlu0 %v1486_v43 }
 0x579   : > { %5970 = vrot.lane.b32.xlu1 %v6466_v46, %s6280_s29 }
 0x57d   : > { %5975 = vrot.lane.b32.xlu1 %v6469_v51, %s6280_s29 }
 0x581   : > { %1666 = vrot.lane.b32.xlu1 %v6455_v36, %s6281_s30 }
 0x585   : > { %1668 = vrot.lane.b32.xlu1 %v6518_v11, %s6281_s30 }
 0x589   : > { %1672 = vrot.lane.b32.xlu1 %v6527_v13, %s6281_s30 }
 0x58b   : > { %v1437_v30 = vpop.xlane.xlu1 %1436 }
 0x58c   : > { %v1447_v44 = vsub.f32 %v6701_v23, %v1437_v30 }
 0x58d   : > { %1676 = vrot.lane.b32.xlu1 %v6535_v15, %s6281_s30 }
 0x58e   : > { %v1461_v48 = vmul.f32 1.442695, %v1447_v44 }
 0x58f   : > { %v5956_v57 = vpop.permute.xlu1 %5955 }
 0x590   : > { %6115 = vpow2.f32 %v1461_v48  ;;  %v5958_v58 = vunpack.i.h.bf16 %v5956_v57  ;;  %v5957_v49 = vunpack.i.l.bf16 %v5956_v57 }
 0x591   : > { %1680 = vrot.lane.b32.xlu1 %v6543_v17, %s6281_s30 }
 0x592   : > { %v5681_v29 = vpack.c.bf16 %v5958_v58, %v5957_v49 }
 0x594   : > { %5682 = vmatprep.subr.bf16.mxu0 %v5681_v29 }
 0x595   : > { %5684 = vmatpush3.bf16.msra.mxu0 %v5681_v29 }
 0x59a   : > { %v6116_v55 = vpop.eup %6115 }
 0x59b   : > { %v1483_v56 = vsel %vm1030_vm3, %v6116_v55, 0.0 }
 0x59c   : > { %1484 = vadd.xlane.f32.xlu0 %v1483_v56 }
 0x5b2   : > { %5965 = vrot.lane.b32.xlu0 %v6463_v41, %s6280_s29 }
 0x5b6   : > { %1670 = vrot.lane.b32.xlu0 %v6520_v12, %s6281_s30 }
 0x5ba   : > { %1674 = vrot.lane.b32.xlu0 %v6529_v14, %s6281_s30 }
 0x5be   : > { %1678 = vrot.lane.b32.xlu0 %v6537_v16, %s6281_s30 }
 0x5bf   : > { %v1470_v23 = vpop.xlane.xlu0 %1469 }
 0x5c0   : > { %6117 = vrcp.f32 %v1470_v23  ;;  %v1467_v59 = vpop.xlane.xlu1 %1466 }
 0x5c1   : > { %6119 = vrcp.f32 %v1467_v59 }
 0x5c4   : > { %v5961_v60 = vpop.permute.xlu1 %5960 }
 0x5c5   : > { %v5963_v62 = vunpack.i.h.bf16 %v5961_v60  ;;  %v5962_v7 = vunpack.i.l.bf16 %v5961_v60 }
 0x5c7   : > { %v5685_v8 = vpack.c.bf16 %v5963_v62, %v5962_v7 }
 0x5c8   : > { %v1473_v10 = vpop.xlane.xlu0 %1472 }
 0x5c9   : > { %6121 = vrcp.f32 %v1473_v10  ;;  %5687 = vmatprep.subr.msk.bf16.mxu0 %vm6497_vm2, %v5685_v8 }
 0x5ca   : > { %v6118_v21 = vpop.eup %6117 }
 0x5cb   : > { %v6120_v18 = vpop.eup %6119  ;;  %v1498_v31 = vmul.f32 %v6118_v21, %v6734_v50 }
 0x5cc   : > { %v1497_v27 = vmul.f32 %v6120_v18, %v6736_v54  ;;  %v1482_v40 = vpop.xlane.xlu0 %1481 }
 0x5ce   : > { %5233 = vmatprep.mubr.msk.f32.mxu0 %vm1030_vm3, %v1497_v27 }
 0x5cf   : > { %5234 = vmatmul.mubr.msk.f32.vlgmr.msra.gmra.mrb[16].mxu0 %vm1030_vm3, %v1498_v31 }
 0x5d0   : > { %5690 = vmatpush3.bf16.xpose.msk.msra.mxu0 %vm6497_vm2, %v5685_v8 }
 0x5d3   : > { %v6122_v26 = vpop.eup %6121 }
 0x5d4   : > { %v1499_v33 = vmul.f32 %v6122_v26, %v6742_v9 }
 0x5d6   : > { %5236 = vmatprep.mubr.msk.f32.mxu0 %vm1030_vm3, %v1499_v33 }
 0x5f4   : > { %v1479_v47 = vpop.xlane.xlu0 %1478 }
 0x5f5   : > { %6123 = vrcp.f32 %v1479_v47  ;;  %v1476_v34 = vpop.xlane.xlu1 %1475 }
 0x5f6   : > { %6125 = vrcp.f32 %v1476_v34 }
 0x5f7   : > { %6127 = vrcp.f32 %v1482_v40 }
 0x5f8   : > { %v1488_v53 = vpop.xlane.xlu0 %1487 }
 0x5f9   : > { %6129 = vrcp.f32 %v1488_v53  ;;  %v5971_v19 = vpop.permute.xlu1 %5970 }
 0x5fa   : > { %v5973_v30 = vunpack.i.h.bf16 %v5971_v19  ;;  %v5972_v44 = vunpack.i.l.bf16 %v5971_v19 }
 0x5fd   : > { %v5976_v58 = vpop.permute.xlu1 %5975 }
 0x5fe   : > { %v5978_v56 = vunpack.i.h.bf16 %v5976_v58  ;;  %v5977_v23 = vunpack.i.l.bf16 %v5976_v58 }
 0x5ff   : > { %v6124_v54 = vpop.eup %6123 }
 0x600   : > { %v6126_v50 = vpop.eup %6125  ;;  %v1501_v52 = vmul.f32 %v6124_v54, %v6757_v20  ;;  %v5697_v20 = vpack.c.bf16 %v5973_v30, %v5972_v44  ;;  %v5703_v62 = vpack.c.bf16 %v5978_v56, %v5977_v23 }
 0x601   : > { %v1500_v25 = vmul.f32 %v6126_v50, %v6755_v38  ;;  %v6128_v37 = vpop.eup %6127  ;;  %v1667_v60 = vpop.permute.xlu1 %1666 }
 0x602   : > { %v1502_v9 = vmul.f32 %v6128_v37, %v6746_v24 }
 0x603   : > { %5237 = vmatmul.mubr.msk.f32.gmra.mrb[18].mxu0 %vm1030_vm3, %v1500_v25  ;;  %v6130_v49 = vpop.eup %6129 }
 0x604   : > { %5239 = vmatprep.mubr.msk.f32.mxu0 %vm1030_vm3, %v1501_v52  ;;  %v1504_v59 = vmul.f32 %v6130_v49, %v6761_v42 }
 0x605   : > { %v1669_v7 = vpop.permute.xlu1 %1668 }
 0x607   : > { %5240 = vmatmul.mubr.msk.f32.gmra.mrb[20].mxu0 %vm1030_vm3, %v1502_v9 }
 0x609   : > { %v1673_v42 = vpop.permute.xlu1 %1672 }
 0x60d   : > { %v1677_v10 = vpop.permute.xlu1 %1676 }
 0x611   : > { %v1681_v18 = vpop.permute.xlu1 %1680 }
 0x629   : > { %v1485_v28 = vpop.xlane.xlu0 %1484 }
 0x62a   : > { %6131 = vrcp.f32 %v1485_v28 }
 0x62d   : > { %v5966_v43 = vpop.permute.xlu0 %5965 }
 0x62e   : > { %v5968_v38 = vunpack.i.h.bf16 %v5966_v43  ;;  %v5967_v48 = vunpack.i.l.bf16 %v5966_v43 }
 0x630   : > { %v5691_v57 = vpack.c.bf16 %v5968_v38, %v5967_v48 }
 0x632   : > { %5693 = vmatprep.subr.msk.bf16.mxu0 %vm6497_vm2, %v5691_v57 }
 0x633   : > { %5696 = vmatpush3.bf16.xpose.msk.msra.mxu0 %vm6497_vm2, %v5691_v57 }
 0x634   : > { %v6132_v24 = vpop.eup %6131  ;;  %5699 = vmatprep.subr.msk.bf16.mxu0 %vm6497_vm2, %v5697_v20 }
 0x635   : > { %v1503_v29 = vmul.f32 %v6132_v24, %v6116_v55  ;;  %v1671_v55 = vpop.permute.xlu0 %1670 }
 0x637   : > { %5242 = vmatprep.mubr.msk.f32.mxu0 %vm1030_vm3, %v1503_v29 }
 0x638   : > { %5243 = vmatmul.mubr.msk.f32.gmra.mrb[22].mxu0 %vm1030_vm3, %v1504_v59 }
 0x639   : > { %5261 = vmatprep.mubr.msk.f32.mxu0 %vm884_vm1, %v1667_v60  ;;  %v1675_v8 = vpop.permute.xlu0 %1674 }
 0x63b   : > { %5702 = vmatpush3.bf16.xpose.msk.msra.mxu0 %vm6497_vm2, %v5697_v20 }
 0x63c   : > { %5705 = vmatprep.subr.msk.bf16.mxu0 %vm6497_vm2, %v5703_v62 }
 0x63d   : > { %v1679_v21 = vpop.permute.xlu0 %1678 }
 0x643   : > { %5708 = vmatpush3.bf16.xpose.msk.msra.mxu0 %vm6497_vm2, %v5703_v62 }
 0x64a   : > { %5262 = vmatmul.mubr.msk.f32.vlgmr.msra.gmra.mrb[24].mxu0 %vm884_vm1, %v1669_v7 }
 0x64b   : > { %5264 = vmatprep.mubr.msk.f32.mxu0 %vm884_vm1, %v1671_v55 }
 0x64e   : > { %5265 = vmatmul.mubr.msk.f32.gmra.mrb[26].mxu0 %vm884_vm1, %v1673_v42 }
 0x64f   : > { %5267 = vmatprep.mubr.msk.f32.mxu0 %vm884_vm1, %v1675_v8 }
 0x652   : > { %5268 = vmatmul.mubr.msk.f32.gmra.mrb[28].mxu0 %vm884_vm1, %v1677_v10 }
 0x653   : > { %5270 = vmatprep.mubr.msk.f32.mxu0 %vm884_vm1, %v1679_v21 }
 0x656   : > { %5271 = vmatmul.mubr.msk.f32.gmra.mrb[30].mxu0 %vm884_vm1, %v1681_v18 }
 0x6a2   : > { %v6830_v27 = vpop.f32.mrb[16].mxu0 }
 0x6a3   : > { %v6832_v31 = vpop.f32.mrb[17].mxu0 }
 0x6d6   : > { %v6834_v26 = vpop.f32.mrb[18].mxu0 }
 0x6d7   : > { %v6836_v33 = vpop.f32.mrb[19].mxu0 }
 0x6da   : > { %v6838_v40 = vpop.f32.mrb[20].mxu0 }
 0x6db   : > { %v6840_v47 = vpop.f32.mrb[21].mxu0 }
 0x70b   : > { %v6842_v34 = vpop.f32.mrb[22].mxu0 }
 0x70c   : > { %v6844_v54 = vpop.f32.mrb[23].mxu0 }
 0x71d   : > { %v5263_v50 = vpop.f32.mrb[24].mxu0 }
 0x71e   : > { %v1796_v25 = vpop.f32.mrb[25].mxu0  ;;  %v1838_v37 = vsel %vm1030_vm3, %v5263_v50, -inf }
 0x71f   : > { %1839 = vmax.xlane.f32.xlu1 %v1838_v37  ;;  %v1835_v52 = vsel %vm1030_vm3, %v1796_v25, -inf }
 0x720   : > { %1836 = vmax.xlane.f32.xlu0 %v1835_v52 }
 0x721   : > { %v6848_v9 = vpop.f32.mrb[26].mxu0 }
 0x722   : > { %v1806_v53 = vpop.f32.mrb[27].mxu0  ;;  %v1844_v28 = vsel %vm1030_vm3, %v6848_v9, -inf }
 0x723   : > { %v1841_v30 = vsel %vm1030_vm3, %v1806_v53, -inf }
 0x724   : > { %1845 = vmax.xlane.f32.xlu0 %v1844_v28 }
 0x725   : > { %v5269_v19 = vpop.f32.mrb[28].mxu0 }
 0x726   : > { %v6852_v43 = vpop.f32.mrb[29].mxu0  ;;  %v1850_v48 = vsel %vm1030_vm3, %v5269_v19, -inf }
 0x727   : > { %v1847_v20 = vsel %vm1030_vm3, %v6852_v43, -inf }
 0x728   : > { %1842 = vmax.xlane.f32.xlu0 %v1841_v30 }
 0x729   : > { %v6855_v44 = vpop.f32.mrb[30].mxu0 }
 0x72a   : > { %v6857_v38 = vpop.f32.mrb[31].mxu0  ;;  %v1856_v57 = vsel %vm1030_vm3, %v6855_v44, -inf }
 0x72b   : > { %v1853_v58 = vsel %vm1030_vm3, %v6857_v38, -inf }
 0x72c   : > { %1851 = vmax.xlane.f32.xlu0 %v1850_v48 }
 0x730   : > { %5980 = vrot.lane.b32.xlu1 %v6706_v22, %s6281_s30  ;;  %1857 = vmax.xlane.f32.xlu0 %v1856_v57 }
 0x746   : > { %5985 = vrot.lane.b32.xlu0 %v6714_v32, %s6281_s30 }
 0x754   : > { %1848 = vmax.xlane.f32.xlu1 %v1847_v20 }
 0x765   : > { %5990 = vrot.lane.b32.xlu1 %v6722_v39, %s6281_s30 }
 0x789   : > { %1854 = vmax.xlane.f32.xlu1 %v1853_v58 }
 0x79a   : > { %5995 = vrot.lane.b32.xlu1 %v6730_v45, %s6281_s30 }
 0x7ac   : > { %v1840_v49 = vpop.xlane.xlu1 %1839 }
 0x7ad   : > { %v1860_v24 = vsub.f32 %v5263_v50, %v1840_v49  ;;  %v1837_v29 = vpop.xlane.xlu0 %1836 }
 0x7ae   : > { %v1859_v56 = vsub.f32 %v1796_v25, %v1837_v29 }
 0x7af   : > { %v1869_v23 = vmul.f32 1.442695, %v1860_v24 }
 0x7b0   : > { %v1867_v59 = vmul.f32 1.442695, %v1859_v56  ;;  %v5981_v60 = vpop.permute.xlu1 %5980 }
 0x7b1   : > { %6133 = vpow2.f32 %v1869_v23  ;;  %v5983_v62 = vunpack.i.h.bf16 %v5981_v60  ;;  %v5982_v7 = vunpack.i.l.bf16 %v5981_v60  ;;  %v1846_v55 = vpop.xlane.xlu0 %1845 }
 0x7b2   : > { %6135 = vpow2.f32 %v1867_v59  ;;  %v1862_v56 = vsub.f32 %v6848_v9, %v1846_v55 }
 0x7b3   : > { %v5709_v42 = vpack.c.bf16 %v5983_v62, %v5982_v7 }
 0x7b4   : > { %v1873_v59 = vmul.f32 1.442695, %v1862_v56 }
 0x7b5   : > { %5710 = vmatprep.subr.bf16.mxu1 %v5709_v42  ;;  %v1843_v8 = vpop.xlane.xlu0 %1842 }
 0x7b6   : > { %v1861_v10 = vsub.f32 %v1806_v53, %v1843_v8  ;;  %5712 = vmatpush3.bf16.msra.mxu1 %v5709_v42 }
 0x7b8   : > { %v1871_v21 = vmul.f32 1.442695, %v1861_v10 }
 0x7b9   : > { %v1852_v18 = vpop.xlane.xlu0 %1851 }
 0x7ba   : > { %6137 = vpow2.f32 %v1871_v21  ;;  %v1864_v37 = vsub.f32 %v5269_v19, %v1852_v18 }
 0x7bb   : > { %v6874_v50 = vpop.eup %6133 }
 0x7bc   : > { %v6876_v25 = vpop.eup %6135  ;;  %v1877_v52 = vmul.f32 1.442695, %v1864_v37  ;;  %v1886_v28 = vsel %vm1030_vm3, %v6874_v50, 0.0 }
 0x7bd   : > { %1887 = vadd.xlane.f32.xlu0 %v1886_v28  ;;  %v1858_v30 = vpop.xlane.xlu0 %1857  ;;  %v1883_v48 = vsel %vm1030_vm3, %v6876_v25, 0.0 }
 0x7be   : > { %6139 = vpow2.f32 %v1877_v52  ;;  %1884 = vadd.xlane.f32.xlu1 %v1883_v48  ;;  %v1866_v23 = vsub.f32 %v6855_v44, %v1858_v30 }
 0x7bf   : > { %6141 = vpow2.f32 %v1873_v59 }
 0x7c0   : > { %v1881_v7 = vmul.f32 1.442695, %v1866_v23 }
 0x7c1   : > { %v5986_v53 = vpop.permute.xlu0 %5985 }
 0x7c2   : > { %v5988_v57 = vunpack.i.h.bf16 %v5986_v53  ;;  %v5987_v20 = vunpack.i.l.bf16 %v5986_v53 }
 0x7c4   : > { %v6882_v58 = vpop.eup %6137  ;;  %v5713_v19 = vpack.c.bf16 %v5988_v57, %v5987_v20 }
 0x7c5   : > { %v1889_v49 = vsel %vm1030_vm3, %v6882_v58, 0.0 }
 0x7c6   : > { %1890 = vadd.xlane.f32.xlu0 %v1889_v49  ;;  %5714 = vmatprep.subr.bf16.mxu1 %v5713_v19 }
 0x7c7   : > { %5716 = vmatpush3.bf16.msra.mxu1 %v5713_v19 }
 0x7c8   : > { %v6886_v24 = vpop.eup %6139 }
 0x7c9   : > { %v1898_v29 = vsel %vm1030_vm3, %v6886_v24, 0.0 }
 0x7ca   : > { %1899 = vadd.xlane.f32.xlu0 %v1898_v29 }
 0x7cf   : > { %6000 = vrot.lane.b32.xlu1 %v6453_v35, %s6282_s0  ;;  %v6895_v35 = vpop.eup %6141 }
 0x7e1   : > { %v1849_v60 = vpop.xlane.xlu1 %1848 }
 0x7e2   : > { %v1863_v62 = vsub.f32 %v6852_v43, %v1849_v60  ;;  %v1892_v43 = vsel %vm1030_vm3, %v6895_v35, 0.0 }
 0x7e4   : > { %v1875_v42 = vmul.f32 1.442695, %v1863_v62 }
 0x7e5   : > { %v5991_v8 = vpop.permute.xlu1 %5990 }
 0x7e6   : > { %6143 = vpow2.f32 %v1875_v42  ;;  %v5993_v10 = vunpack.i.h.bf16 %v5991_v8  ;;  %v5992_v21 = vunpack.i.l.bf16 %v5991_v8 }
 0x7e7   : > { %6145 = vpow2.f32 %v1881_v7 }
 0x7e8   : > { %v5717_v18 = vpack.c.bf16 %v5993_v10, %v5992_v21 }
 0x7ea   : > { %5718 = vmatprep.subr.bf16.mxu1 %v5717_v18 }
 0x7eb   : > { %5720 = vmatpush3.bf16.msra.mxu1 %v5717_v18 }
 0x7f0   : > { %v6897_v9 = vpop.eup %6143 }
 0x7f1   : > { %v1895_v44 = vsel %vm1030_vm3, %v6897_v9, 0.0  ;;  %v6901_v55 = vpop.eup %6145 }
 0x7f2   : > { %1896 = vadd.xlane.f32.xlu0 %v1895_v44  ;;  %v1904_v37 = vsel %vm1030_vm3, %v6901_v55, 0.0 }
 0x7f3   : > { %1893 = vadd.xlane.f32.xlu1 %v1892_v43 }
 0x7f6   : > { %1905 = vadd.xlane.f32.xlu0 %v1904_v37 }
 0x804   : > { %6010 = vrot.lane.b32.xlu1 %v6466_v46, %s6282_s0 }
 0x808   : > { %6015 = vrot.lane.b32.xlu1 %v6469_v51, %s6282_s0 }
 0x80c   : > { %2076 = vrot.lane.b32.xlu1 %v6455_v36, %s6283_s18 }
 0x810   : > { %2078 = vrot.lane.b32.xlu1 %v6518_v11, %s6283_s18 }
 0x814   : > { %2082 = vrot.lane.b32.xlu1 %v6527_v13, %s6283_s18 }
 0x816   : > { %v1855_v52 = vpop.xlane.xlu1 %1854 }
 0x817   : > { %v1865_v28 = vsub.f32 %v6857_v38, %v1855_v52 }
 0x818   : > { %2086 = vrot.lane.b32.xlu1 %v6535_v15, %s6283_s18 }
 0x819   : > { %v1879_v46 = vmul.f32 1.442695, %v1865_v28 }
 0x81a   : > { %v5996_v30 = vpop.permute.xlu1 %5995 }
 0x81b   : > { %6147 = vpow2.f32 %v1879_v46  ;;  %v5998_v51 = vunpack.i.h.bf16 %v5996_v30  ;;  %v5997_v48 = vunpack.i.l.bf16 %v5996_v30 }
 0x81c   : > { %2090 = vrot.lane.b32.xlu1 %v6543_v17, %s6283_s18 }
 0x81d   : > { %v5721_v36 = vpack.c.bf16 %v5998_v51, %v5997_v48 }
 0x81f   : > { %5722 = vmatprep.subr.bf16.mxu1 %v5721_v36 }
 0x820   : > { %5724 = vmatpush3.bf16.msra.mxu1 %v5721_v36 }
 0x825   : > { %v6148_v11 = vpop.eup %6147 }
 0x826   : > { %v1901_v13 = vsel %vm1030_vm3, %v6148_v11, 0.0 }
 0x827   : > { %1902 = vadd.xlane.f32.xlu0 %v1901_v13 }
 0x83d   : > { %6005 = vrot.lane.b32.xlu0 %v6463_v41, %s6282_s0  ;;  %s6286_s0 = smov 24  }
 0x841   : > { %2080 = vrot.lane.b32.xlu0 %v6520_v12, %s6283_s18 }
 0x845   : > { %2084 = vrot.lane.b32.xlu0 %v6529_v14, %s6283_s18 }
 0x849   : > { %2088 = vrot.lane.b32.xlu0 %v6537_v16, %s6283_s18 }
 0x84a   : > { %v1888_v15 = vpop.xlane.xlu0 %1887 }
 0x84b   : > { %6149 = vrcp.f32 %v1888_v15  ;;  %v1885_v17 = vpop.xlane.xlu1 %1884 }
 0x84c   : > { %6151 = vrcp.f32 %v1885_v17 }
 0x84f   : > { %v6001_v38 = vpop.permute.xlu1 %6000 }
 0x850   : > { %v6003_v53 = vunpack.i.h.bf16 %v6001_v38  ;;  %v6002_v57 = vunpack.i.l.bf16 %v6001_v38 }
 0x852   : > { %v5725_v20 = vpack.c.bf16 %v6003_v53, %v6002_v57 }
 0x853   : > { %v1891_v19 = vpop.xlane.xlu0 %1890 }
 0x854   : > { %6153 = vrcp.f32 %v1891_v19  ;;  %5727 = vmatprep.subr.msk.bf16.mxu1 %vm6497_vm2, %v5725_v20 }
 0x855   : > { %v6150_v41 = vpop.eup %6149 }
 0x856   : > { %v6152_v12 = vpop.eup %6151  ;;  %v1916_v49 = vmul.f32 %v6150_v41, %v6874_v50 }
 0x857   : > { %v1915_v14 = vmul.f32 %v6152_v12, %v6876_v25  ;;  %v1900_v56 = vpop.xlane.xlu0 %1899 }
 0x859   : > { %5289 = vmatprep.mubr.msk.f32.mxu1 %vm1030_vm3, %v1915_v14 }
 0x85a   : > { %5290 = vmatmul.mubr.msk.f32.vlgmr.msra.gmra.mrb[24].mxu1 %vm1030_vm3, %v1916_v49 }
 0x85b   : > { %5730 = vmatpush3.bf16.xpose.msk.msra.mxu1 %vm6497_vm2, %v5725_v20 }
 0x85e   : > { %v6154_v16 = vpop.eup %6153 }
 0x85f   : > { %v1917_v29 = vmul.f32 %v6154_v16, %v6882_v58 }
 0x861   : > { %5292 = vmatprep.mubr.msk.f32.mxu1 %vm1030_vm3, %v1917_v29 }
 0x87f   : > { %v1897_v23 = vpop.xlane.xlu0 %1896 }
 0x880   : > { %6155 = vrcp.f32 %v1897_v23  ;;  %v1894_v59 = vpop.xlane.xlu1 %1893 }
 0x881   : > { %6157 = vrcp.f32 %v1894_v59 }
 0x882   : > { %6159 = vrcp.f32 %v1900_v56 }
 0x883   : > { %v1906_v42 = vpop.xlane.xlu0 %1905 }
 0x884   : > { %6161 = vrcp.f32 %v1906_v42  ;;  %v6011_v10 = vpop.permute.xlu1 %6010 }
 0x885   : > { %v6013_v18 = vunpack.i.h.bf16 %v6011_v10  ;;  %v6012_v44 = vunpack.i.l.bf16 %v6011_v10 }
 0x888   : > { %v6016_v52 = vpop.permute.xlu1 %6015 }
 0x889   : > { %v6018_v30 = vunpack.i.h.bf16 %v6016_v52  ;;  %v6017_v51 = vunpack.i.l.bf16 %v6016_v52 }
 0x88a   : > { %v6156_v25 = vpop.eup %6155 }
 0x88b   : > { %v6158_v50 = vpop.eup %6157  ;;  %v1919_v7 = vmul.f32 %v6156_v25, %v6897_v9  ;;  %v5737_v9 = vpack.c.bf16 %v6013_v18, %v6012_v44  ;;  %v5743_v13 = vpack.c.bf16 %v6018_v30, %v6017_v51 }
 0x88c   : > { %v1918_v60 = vmul.f32 %v6158_v50, %v6895_v35  ;;  %v6160_v62 = vpop.eup %6159  ;;  %v2077_v36 = vpop.permute.xlu1 %2076 }
 0x88d   : > { %v1920_v58 = vmul.f32 %v6160_v62, %v6886_v24 }
 0x88e   : > { %5293 = vmatmul.mubr.msk.f32.gmra.mrb[26].mxu1 %vm1030_vm3, %v1918_v60  ;;  %v6162_v28 = vpop.eup %6161 }
 0x88f   : > { %5295 = vmatprep.mubr.msk.f32.mxu1 %vm1030_vm3, %v1919_v7  ;;  %v1922_v48 = vmul.f32 %v6162_v28, %v6901_v55 }
 0x890   : > { %v2079_v15 = vpop.permute.xlu1 %2078 }
 0x892   : > { %5296 = vmatmul.mubr.msk.f32.gmra.mrb[28].mxu1 %vm1030_vm3, %v1920_v58 }
 0x894   : > { %v2083_v55 = vpop.permute.xlu1 %2082 }
 0x898   : > { %v2087_v38 = vpop.permute.xlu1 %2086 }
 0x89c   : > { %v2091_v57 = vpop.permute.xlu1 %2090 }
 0x8b4   : > { %v1903_v8 = vpop.xlane.xlu0 %1902 }
 0x8b5   : > { %6163 = vrcp.f32 %v1903_v8 }
 0x8b8   : > { %v6006_v21 = vpop.permute.xlu0 %6005 }
 0x8b9   : > { %v6008_v35 = vunpack.i.h.bf16 %v6006_v21  ;;  %v6007_v43 = vunpack.i.l.bf16 %v6006_v21 }
 0x8bb   : > { %v5731_v37 = vpack.c.bf16 %v6008_v35, %v6007_v43 }
 0x8bd   : > { %5733 = vmatprep.subr.msk.bf16.mxu1 %vm6497_vm2, %v5731_v37 }
 0x8be   : > { %5736 = vmatpush3.bf16.xpose.msk.msra.mxu1 %vm6497_vm2, %v5731_v37 }
 0x8bf   : > { %v6164_v24 = vpop.eup %6163  ;;  %5739 = vmatprep.subr.msk.bf16.mxu1 %vm6497_vm2, %v5737_v9 }
 0x8c0   : > { %v1921_v46 = vmul.f32 %v6164_v24, %v6148_v11  ;;  %v2081_v11 = vpop.permute.xlu0 %2080 }
 0x8c2   : > { %5298 = vmatprep.mubr.msk.f32.mxu1 %vm1030_vm3, %v1921_v46 }
 0x8c3   : > { %5299 = vmatmul.mubr.msk.f32.gmra.mrb[30].mxu1 %vm1030_vm3, %v1922_v48 }
 0x8c4   : > { %5317 = vmatprep.mubr.msk.f32.mxu1 %vm884_vm1, %v2077_v36  ;;  %v2085_v17 = vpop.permute.xlu0 %2084 }
 0x8c6   : > { %5742 = vmatpush3.bf16.xpose.msk.msra.mxu1 %vm6497_vm2, %v5737_v9 }
 0x8c7   : > { %5745 = vmatprep.subr.msk.bf16.mxu1 %vm6497_vm2, %v5743_v13 }
 0x8c8   : > { %v2089_v53 = vpop.permute.xlu0 %2088 }
 0x8ce   : > { %5748 = vmatpush3.bf16.xpose.msk.msra.mxu1 %vm6497_vm2, %v5743_v13 }
 0x8d5   : > { %5318 = vmatmul.mubr.msk.f32.vlgmr.msra.gmra.mrb[32].mxu1 %vm884_vm1, %v2079_v15 }
 0x8d6   : > { %5320 = vmatprep.mubr.msk.f32.mxu1 %vm884_vm1, %v2081_v11 }
 0x8d9   : > { %5321 = vmatmul.mubr.msk.f32.gmra.mrb[34].mxu1 %vm884_vm1, %v2083_v55 }
 0x8da   : > { %5323 = vmatprep.mubr.msk.f32.mxu1 %vm884_vm1, %v2085_v17 }
 0x8dd   : > { %5324 = vmatmul.mubr.msk.f32.gmra.mrb[36].mxu1 %vm884_vm1, %v2087_v38 }
 0x8de   : > { %5326 = vmatprep.mubr.msk.f32.mxu1 %vm884_vm1, %v2089_v53 }
 0x8e1   : > { %5327 = vmatmul.mubr.msk.f32.gmra.mrb[38].mxu1 %vm884_vm1, %v2091_v57 }
 0x92d   : > { %v6970_v61 = vpop.f32.mrb[24].mxu1 }
 0x92e   : > { %v6972_v20 = vpop.f32.mrb[25].mxu1 }
 0x961   : > { %v6974_v19 = vpop.f32.mrb[26].mxu1 }
 0x962   : > { %v6976_v41 = vpop.f32.mrb[27].mxu1 }
 0x965   : > { %v6978_v12 = vpop.f32.mrb[28].mxu1 }
 0x966   : > { %v6980_v14 = vpop.f32.mrb[29].mxu1 }
 0x996   : > { %v6982_v49 = vpop.f32.mrb[30].mxu1 }
 0x997   : > { %v6984_v16 = vpop.f32.mrb[31].mxu1 }
 0x9a8   : > { %v5319_v29 = vpop.f32.mrb[32].mxu1 }
 0x9a9   : > { %v2206_v56 = vpop.f32.mrb[33].mxu1  ;;  %v2248_v23 = vsel %vm1030_vm3, %v5319_v29, -inf }
 0x9aa   : > { %2249 = vmax.xlane.f32.xlu1 %v2248_v23  ;;  %v2245_v59 = vsel %vm1030_vm3, %v2206_v56, -inf }
 0x9ab   : > { %2246 = vmax.xlane.f32.xlu0 %v2245_v59 }
 0x9ac   : > { %v5322_v25 = vpop.f32.mrb[34].mxu1 }
 0x9ad   : > { %v2216_v50 = vpop.f32.mrb[35].mxu1  ;;  %v2254_v58 = vsel %vm1030_vm3, %v5322_v25, -inf }
 0x9ae   : > { %v2251_v60 = vsel %vm1030_vm3, %v2216_v50, -inf }
 0x9af   : > { %2252 = vmax.xlane.f32.xlu0 %v2251_v60 }
 0x9b0   : > { %v5325_v62 = vpop.f32.mrb[36].mxu1 }
 0x9b1   : > { %v2226_v7 = vpop.f32.mrb[37].mxu1  ;;  %v2260_v21 = vsel %vm1030_vm3, %v5325_v62, -inf }
 0x9b2   : > { %v2257_v42 = vsel %vm1030_vm3, %v2226_v7, -inf }
 0x9b3   : > { %2255 = vmax.xlane.f32.xlu0 %v2254_v58  ;;  %2258 = vmax.xlane.f32.xlu1 %v2257_v42 }
 0x9b4   : > { %v5328_v8 = vpop.f32.mrb[38].mxu1 }
 0x9b5   : > { %v2236_v10 = vpop.f32.mrb[39].mxu1  ;;  %v2266_v44 = vsel %vm1030_vm3, %v5328_v8, -inf }
 0x9b6   : > { %v2263_v18 = vsel %vm1030_vm3, %v2236_v10, -inf }
 0x9b7   : > { %2261 = vmax.xlane.f32.xlu0 %v2260_v21  ;;  %2264 = vmax.xlane.f32.xlu1 %v2263_v18 }
 0x9bb   : > { %2267 = vmax.xlane.f32.xlu0 %v2266_v44 }
 0x9c8   : > { %6020 = vrot.lane.b32.xlu1 %v6706_v22, %s6283_s18 }
 0xa37   : > { %v2250_v35 = vpop.xlane.xlu1 %2249 }
 0xa38   : > { %v2270_v43 = vsub.f32 %v5319_v29, %v2250_v35  ;;  %v2247_v37 = vpop.xlane.xlu0 %2246 }
 0xa39   : > { %v2269_v9 = vsub.f32 %v2206_v56, %v2247_v37 }
 0xa3a   : > { %v2279_v52 = vmul.f32 1.442695, %v2270_v43 }
 0xa3b   : > { %v2277_v28 = vmul.f32 1.442695, %v2269_v9 }
 0xa3c   : > { %6165 = vpow2.f32 %v2279_v52  ;;  %v2253_v24 = vpop.xlane.xlu0 %2252 }
 0xa3d   : > { %6167 = vpow2.f32 %v2277_v28  ;;  %v2271_v46 = vsub.f32 %v2216_v50, %v2253_v24 }
 0xa3f   : > { %v2281_v30 = vmul.f32 1.442695, %v2271_v46 }
 0xa40   : > { %v2256_v51 = vpop.xlane.xlu0 %2255  ;;  %v2259_v48 = vpop.xlane.xlu1 %2258 }
 0xa41   : > { %6169 = vpow2.f32 %v2281_v30  ;;  %v2272_v36 = vsub.f32 %v5322_v25, %v2256_v51  ;;  %v2273_v13 = vsub.f32 %v2226_v7, %v2259_v48 }
 0xa43   : > { %v2283_v15 = vmul.f32 1.442695, %v2272_v36  ;;  %v2285_v11 = vmul.f32 1.442695, %v2273_v13 }
 0xa44   : > { %v2262_v55 = vpop.xlane.xlu0 %2261  ;;  %v2265_v22 = vpop.xlane.xlu1 %2264 }
 0xa45   : > { %6171 = vpow2.f32 %v2283_v15  ;;  %v2274_v17 = vsub.f32 %v5325_v62, %v2262_v55  ;;  %v2275_v29 = vsub.f32 %v2236_v10, %v2265_v22 }
 0xa46   : > { %v6996_v38 = vpop.eup %6165  ;;  %6173 = vpow2.f32 %v2285_v11 }
 0xa47   : > { %v6998_v53 = vpop.eup %6167  ;;  %v2287_v57 = vmul.f32 1.442695, %v2274_v17  ;;  %v2296_v56 = vsel %vm1030_vm3, %v6996_v38, 0.0  ;;  %v2289_v58 = vmul.f32 1.442695, %v2275_v29 }
 0xa48   : > { %2297 = vadd.xlane.f32.xlu0 %v2296_v56  ;;  %v2268_v23 = vpop.xlane.xlu0 %2267  ;;  %v6021_v59 = vpop.permute.xlu1 %6020  ;;  %v2293_v25 = vsel %vm1030_vm3, %v6998_v53, 0.0 }
 0xa49   : > { %6175 = vpow2.f32 %v2287_v57  ;;  %v2276_v50 = vsub.f32 %v5328_v8, %v2268_v23  ;;  %v6023_v60 = vunpack.i.h.bf16 %v6021_v59  ;;  %v6022_v62 = vunpack.i.l.bf16 %v6021_v59  ;;  %2294 = vadd.xlane.f32.xlu1 %v2293_v25  ;;  %v2608_v59 = vld [vmem:[%s7895_s6] sm:$0xff]  ;;  %v2609_v25 = vld [vmem:[%s7895_s6 + $0x8] sm:$0xff] }
 0xa4b   : > { %v7004_v7 = vpop.eup %6169  ;;  %v2291_v42 = vmul.f32 1.442695, %v2276_v50  ;;  %v5749_v21 = vpack.c.bf16 %v6023_v60, %v6022_v62  ;;  %v2610_v50 = vld [vmem:[%s7895_s6 + $0x10] sm:$0xff]  ;;  %v5765_v60 = vpack.c.bf16 %v2609_v25, %v2608_v59  ;;  %v2611_v62 = vld [vmem:[%s7895_s6 + $0x18] sm:$0xff] }
 0xa4c   : > { %v2299_v10 = vsel %vm1030_vm3, %v7004_v7, 0.0 }
 0xa4d   : > { %6177 = vpow2.f32 %v2291_v42  ;;  %2300 = vadd.xlane.f32.xlu1 %v2299_v10  ;;  %5750 = vmatprep.subr.bf16.mxu0 %v5749_v21 }
 0xa4e   : > { %5752 = vmatpush3.bf16.msra.mxu0 %v5749_v21  ;;  %6179 = vpow2.f32 %v2289_v58 }
 0xa4f   : > { %v7008_v18 = vpop.eup %6171 }
 0xa50   : > { %v7010_v44 = vpop.eup %6173  ;;  %v2302_v8 = vsel %vm1030_vm3, %v7008_v18, 0.0 }
 0xa51   : > { %2303 = vadd.xlane.f32.xlu0 %v2302_v8  ;;  %v2305_v35 = vsel %vm1030_vm3, %v7010_v44, 0.0 }
 0xa52   : > { %2306 = vadd.xlane.f32.xlu1 %v2305_v35 }
 0xa53   : > { %v7016_v43 = vpop.eup %6175 }
 0xa54   : > { %v2308_v37 = vsel %vm1030_vm3, %v7016_v43, 0.0 }
 0xa55   : > { %2309 = vadd.xlane.f32.xlu0 %v2308_v37 }
 0xa57   : > { %v7020_v9 = vpop.eup %6177 }
 0xa58   : > { %v2314_v52 = vsel %vm1030_vm3, %v7020_v9, 0.0  ;;  %v7024_v28 = vpop.eup %6179 }
 0xa59   : > { %2315 = vadd.xlane.f32.xlu0 %v2314_v52  ;;  %v2311_v24 = vsel %vm1030_vm3, %v7024_v28, 0.0 }
 0xa5d   : > { %2312 = vadd.xlane.f32.xlu0 %v2311_v24 }
 0xa63   : > { %6030 = vrot.lane.b32.xlu1 %v6722_v39, %s6283_s18 }
 0xa67   : > { %6035 = vrot.lane.b32.xlu1 %v6730_v45, %s6283_s18 }
 0xa6b   : > { %2494 = vrot.lane.b32.xlu1 %v6832_v31, %s6284_s19 }
 0xa6f   : > { %2496 = vrot.lane.b32.xlu1 %v6830_v27, %s6284_s19 }
 0xa73   : > { %2528 = vrot.lane.b32.xlu1 %v6970_v61, %s6285_s20  ;;  %6025 = vrot.lane.b32.xlu0 %v6714_v32, %s6283_s18  ;;  %s7817_s18 = scalar_lea.vmem %s7905_s16, %s6396_s17 }
 0xa77   : > { %2500 = vrot.lane.b32.xlu1 %v6834_v26, %s6284_s19  ;;  %2526 = vrot.lane.b32.xlu0 %v6972_v20, %s6285_s20 }
 0xa7b   : > { %2532 = vrot.lane.b32.xlu1 %v6974_v19, %s6285_s20  ;;  %2498 = vrot.lane.b32.xlu0 %v6836_v33, %s6284_s19 }
 0xa7f   : > { %2504 = vrot.lane.b32.xlu1 %v6838_v40, %s6284_s19  ;;  %2530 = vrot.lane.b32.xlu0 %v6976_v41, %s6285_s20 }
 0xa83   : > { %2536 = vrot.lane.b32.xlu1 %v6978_v12, %s6285_s20  ;;  %2502 = vrot.lane.b32.xlu0 %v6840_v47, %s6284_s19 }
 0xa87   : > { %2508 = vrot.lane.b32.xlu1 %v6842_v34, %s6284_s19  ;;  %2534 = vrot.lane.b32.xlu0 %v6980_v14, %s6285_s20 }
 0xa8b   : > { %2540 = vrot.lane.b32.xlu1 %v6982_v49, %s6285_s20  ;;  %2506 = vrot.lane.b32.xlu0 %v6844_v54, %s6284_s19 }
 0xa8f   : > { %2538 = vrot.lane.b32.xlu0 %v6984_v16, %s6285_s20 }
 0xad5   : > { %v2298_v39 = vpop.xlane.xlu0 %2297 }
 0xad6   : > { %v2295_v32 = vpop.xlane.xlu1 %2294 }
 0xad7   : > { %6181 = vrcp.f32 %v2295_v32 }
 0xad8   : > { %6183 = vrcp.f32 %v2298_v39 }
 0xada   : > { %v2301_v45 = vpop.xlane.xlu1 %2300 }
 0xadb   : > { %6185 = vrcp.f32 %v2301_v45 }
 0xade   : > { %v2304_v27 = vpop.xlane.xlu0 %2303 }
 0xadf   : > { %v2307_v40 = vpop.xlane.xlu1 %2306  ;;  %6187 = vrcp.f32 %v2304_v27 }
 0xae0   : > { %6189 = vrcp.f32 %v2307_v40 }
 0xae1   : > { %v6182_v31 = vpop.eup %6181 }
 0xae2   : > { %v2310_v26 = vpop.xlane.xlu0 %2309  ;;  %v2325_v33 = vmul.f32 %v6182_v31, %v6998_v53  ;;  %v6184_v48 = vpop.eup %6183 }
 0xae3   : > { %v6031_v34 = vpop.permute.xlu1 %6030  ;;  %6191 = vrcp.f32 %v2310_v26  ;;  %v2326_v13 = vmul.f32 %v6184_v48, %v6996_v38 }
 0xae4   : > { %5345 = vmatprep.mubr.msk.f32.mxu0 %vm1030_vm3, %v2325_v33  ;;  %v6033_v19 = vunpack.i.h.bf16 %v6031_v34  ;;  %v6032_v54 = vunpack.i.l.bf16 %v6031_v34 }
 0xae5   : > { %v6186_v36 = vpop.eup %6185 }
 0xae6   : > { %v2316_v47 = vpop.xlane.xlu0 %2315  ;;  %v5757_v30 = vpack.c.bf16 %v6033_v19, %v6032_v54  ;;  %v2327_v11 = vmul.f32 %v6186_v36, %v7004_v7  ;;  %v5769_v7 = vpack.c.bf16 %v2611_v62, %v2610_v50 }
 0xae7   : > { %v6036_v14 = vpop.permute.xlu1 %6035 }
 0xae8   : > { %v6038_v16 = vunpack.i.h.bf16 %v6036_v14  ;;  %v6037_v46 = vunpack.i.l.bf16 %v6036_v14 }
 0xae9   : > { %v6188_v15 = vpop.eup %6187 }
 0xaea   : > { %v2313_v61 = vpop.xlane.xlu0 %2312  ;;  %v5761_v51 = vpack.c.bf16 %v6038_v16, %v6037_v46  ;;  %v6190_v55 = vpop.eup %6189  ;;  %v2328_v22 = vmul.f32 %v6188_v15, %v7008_v18 }
 0xaeb   : > { %6193 = vrcp.f32 %v2313_v61  ;;  %v2329_v53 = vmul.f32 %v6190_v55, %v7010_v44 }
 0xaec   : > { %6195 = vrcp.f32 %v2316_v47 }
 0xaed   : > { %v6192_v17 = vpop.eup %6191 }
 0xaee   : > { %v6026_v20 = vpop.permute.xlu0 %6025  ;;  %v2330_v38 = vmul.f32 %v6192_v17, %v7016_v43  ;;  %v2495_v43 = vpop.permute.xlu1 %2494 }
 0xaef   : > { %v6028_v41 = vunpack.i.h.bf16 %v6026_v20  ;;  %v6027_v12 = vunpack.i.l.bf16 %v6026_v20  ;;  %v2582_v61 = vsel %vm884_vm1, %v6676_v0, %v2495_v43 }
 0xaf1   : > { %v5753_v49 = vpack.c.bf16 %v6028_v41, %v6027_v12 }
 0xaf2   : > { %v2497_v37 = vpop.permute.xlu1 %2496  ;;  %v2527_v52 = vpop.permute.xlu0 %2526 }
 0xaf3   : > { %5754 = vmatprep.subr.bf16.mxu0 %v5753_v49  ;;  %v2583_v19 = vsel %vm884_vm1, %v6674_v63, %v2497_v37  ;;  %v2591_v54 = vsel %vm2590_vm4, %v2582_v61, %v2527_v52 }
 0xaf4   : > { %5756 = vmatpush3.bf16.msra.mxu0 %v5753_v49 }
 0xaf5   : > { %5758 = vmatprep.subr.bf16.mxu0 %v5757_v30  ;;  %v6194_v57 = vpop.eup %6193 }
 0xaf6   : > { %v6196_v29 = vpop.eup %6195  ;;  %v2331_v56 = vmul.f32 %v6194_v57, %v7024_v28  ;;  %v2499_v24 = vpop.permute.xlu0 %2498 }
 0xaf7   : > { %v2332_v23 = vmul.f32 %v6196_v29, %v7020_v9  ;;  %v2529_v9 = vpop.permute.xlu1 %2528  ;;  %v2584_v16 = vsel %vm884_vm1, %v6680_v2, %v2499_v24 }
 0xaf8   : > { %5760 = vmatpush3.bf16.msra.mxu0 %v5757_v30  ;;  %v2592_v12 = vsel %vm2590_vm4, %v2583_v19, %v2529_v9  ;;  %v6264_v9 = vld [vmem:[%s6402_s23 + $0x18] sm:$0xff]  ;;  %v6267_v19 = vld [vmem:[%s6402_s23 + $0x30] sm:$0xff] }
 0xaf9   : > { %5762 = vmatprep.subr.bf16.mxu0 %v5761_v51 }
 0xafa   : > { %v2531_v39 = vpop.permute.xlu0 %2530 }
 0xafb   : > { %v2501_v28 = vpop.permute.xlu1 %2500  ;;  %v2593_v46 = vsel %vm2590_vm4, %v2584_v16, %v2531_v39 }
 0xafc   : > { %5764 = vmatpush3.bf16.msra.mxu0 %v5761_v51  ;;  %v2585_v63 = vsel %vm884_vm1, %v6678_v1, %v2501_v28 }
 0xafd   : > { %5766 = vmatprep.subr.bf16.mxu0 %v5765_v60 }
 0xafe   : > { %v2503_v27 = vpop.permute.xlu0 %2502 }
 0xaff   : > { %5346 = vmatmul.mubr.msk.f32.vlgmr.msra.gmra.mrb[32].mxu0 %vm1030_vm3, %v2326_v13  ;;  %v2533_v32 = vpop.permute.xlu1 %2532  ;;  %v2586_v2 = vsel %vm884_vm1, %v6684_v4, %v2503_v27 }
 0xb00   : > { %5348 = vmatprep.mubr.msk.f32.mxu0 %vm1030_vm3, %v2327_v11  ;;  %5768 = vmatpush3.bf16.msra.mxu0 %v5765_v60  ;;  %v2594_v51 = vsel %vm2590_vm4, %v2585_v63, %v2533_v32  ;;  %v6261_v60 = vld [vmem:[%s6402_s23 + $0x8] sm:$0xff] }
 0xb01   : > { %5770 = vmatprep.subr.bf16.mxu0 %v5769_v7 }
 0xb02   : > { %v2535_v26 = vpop.permute.xlu0 %2534 }
 0xb03   : > { %5349 = vmatmul.mubr.msk.f32.gmra.mrb[34].mxu0 %vm1030_vm3, %v2328_v22  ;;  %v2505_v45 = vpop.permute.xlu1 %2504  ;;  %v2595_v15 = vsel %vm2590_vm4, %v2586_v2, %v2535_v26 }
 0xb04   : > { %5351 = vmatprep.mubr.msk.f32.mxu0 %vm1030_vm3, %v2329_v53  ;;  %5772 = vmatpush3.bf16.msra.mxu0 %v5769_v7  ;;  %v2587_v1 = vsel %vm884_vm1, %v6682_v3, %v2505_v45  ;;  %v6262_v7 = vld [vmem:[%s6402_s23] sm:$0xff] }
 0xb05   : > { %v6265_v45 = vld [vmem:[%s6402_s23 + $0x20] sm:$0xff] }
 0xb06   : > { %v2507_v40 = vpop.permute.xlu0 %2506 }
 0xb07   : > { %5352 = vmatmul.mubr.msk.f32.gmra.mrb[36].mxu0 %vm1030_vm3, %v2330_v38  ;;  %v2537_v31 = vpop.permute.xlu1 %2536  ;;  %v2588_v4 = vsel %vm884_vm1, %v6688_v6, %v2507_v40  ;;  %v4669_v6 = vld [vmem:[%s7896_s7] ss:$0 sm:$0xff]  ;;  %v6266_v40 = vld [vmem:[%s6402_s23 + $0x28] sm:$0xff] }
 0xb08   : > { %5354 = vmatprep.mubr.msk.f32.mxu0 %vm1030_vm3, %v2331_v56  ;;  %v2596_v55 = vsel %vm2590_vm4, %v2587_v1, %v2537_v31 }
 0xb0a   : > { %v2539_v34 = vpop.permute.xlu0 %2538 }
 0xb0b   : > { %5355 = vmatmul.mubr.msk.f32.gmra.mrb[38].mxu0 %vm1030_vm3, %v2332_v23  ;;  %v2509_v33 = vpop.permute.xlu1 %2508  ;;  %v2597_v57 = vsel %vm2590_vm4, %v2588_v4, %v2539_v34 }
 0xb0c   : > { %v2589_v3 = vsel %vm884_vm1, %v6686_v5, %v2509_v33 }
 0xb0f   : > { %v2541_v47 = vpop.permute.xlu1 %2540 }
 0xb10   : > { %v2598_v29 = vsel %vm2590_vm4, %v2589_v3, %v2541_v47 }
 0xbd2   : > { %v5347_v58 = vpop.f32.mrb[32].mxu0 }
 0xbd3   : > { %2560 = vrot.lane.b32.xlu1 %v5347_v58, %s6286_s0  ;;  %v2447_v42 = vpop.f32.mrb[33].mxu0 }
 0xbd4   : > { %2558 = vrot.lane.b32.xlu0 %v2447_v42, %s6286_s0 }
 0xbd6   : > { %v5350_v21 = vpop.f32.mrb[34].mxu0 }
 0xbd7   : > { %2564 = vrot.lane.b32.xlu1 %v5350_v21, %s6286_s0  ;;  %v2457_v10 = vpop.f32.mrb[35].mxu0 }
 0xbd8   : > { %2562 = vrot.lane.b32.xlu0 %v2457_v10, %s6286_s0 }
 0xbda   : > { %v5353_v18 = vpop.f32.mrb[36].mxu0 }
 0xbdb   : > { %2568 = vrot.lane.b32.xlu1 %v5353_v18, %s6286_s0  ;;  %v2467_v44 = vpop.f32.mrb[37].mxu0 }
 0xbdc   : > { %2566 = vrot.lane.b32.xlu0 %v2467_v44, %s6286_s0 }
 0xbde   : > { %v5356_v8 = vpop.f32.mrb[38].mxu0 }
 0xbdf   : > { %2572 = vrot.lane.b32.xlu1 %v5356_v8, %s6286_s0  ;;  %v2477_v35 = vpop.f32.mrb[39].mxu0 }
 0xbe0   : > { %2570 = vrot.lane.b32.xlu0 %v2477_v35, %s6286_s0  ;;  %v6263_v35 = vld [vmem:[%s6402_s23 + $0x10] sm:$0xff] }
 0xc45   : > { %v2561_v20 = vpop.permute.xlu1 %2560 }
 0xc46   : > { %v2559_v41 = vpop.permute.xlu0 %2558  ;;  %v2601_v49 = vsel %vm2599_vm5, %v2592_v12, %v2561_v20 }
 0xc47   : > { %v2600_v14 = vsel %vm2599_vm5, %v2591_v54, %v2559_v41  ;;  %v6268_v41 = vld [vmem:[%s6402_s23 + $0x38] sm:$0xff] }
 0xc48   : > { %5365 = vmatprep.mubr.msk.f32.mxu0 %vm582_vm0, %v2600_v14 }
 0xc49   : > { %5366 = vmatmul.mubr.msk.f32.vlgmr.msra.gmra.mrb[40].mxu0 %vm582_vm0, %v2601_v49  ;;  %v2565_v0 = vpop.permute.xlu1 %2564 }
 0xc4a   : > { %v2563_v30 = vpop.permute.xlu0 %2562  ;;  %v2603_v36 = vsel %vm2599_vm5, %v2594_v51, %v2565_v0 }
 0xc4b   : > { %v2602_v48 = vsel %vm2599_vm5, %v2593_v46, %v2563_v30 }
 0xc4c   : > { %5368 = vmatprep.mubr.msk.f32.mxu0 %vm582_vm0, %v2602_v48 }
 0xc4d   : > { %5369 = vmatmul.mubr.msk.f32.gmra.mrb[42].mxu0 %vm582_vm0, %v2603_v36  ;;  %v2569_v13 = vpop.permute.xlu1 %2568 }
 0xc4e   : > { %v2567_v11 = vpop.permute.xlu0 %2566  ;;  %v2605_v17 = vsel %vm2599_vm5, %v2596_v55, %v2569_v13 }
 0xc4f   : > { %v2604_v22 = vsel %vm2599_vm5, %v2595_v15, %v2567_v11 }
 0xc50   : > { %5371 = vmatprep.mubr.msk.f32.mxu0 %vm582_vm0, %v2604_v22 }
 0xc51   : > { %5372 = vmatmul.mubr.msk.f32.gmra.mrb[44].mxu0 %vm582_vm0, %v2605_v17  ;;  %v2573_v53 = vpop.permute.xlu1 %2572 }
 0xc52   : > { %v2571_v38 = vpop.permute.xlu0 %2570  ;;  %v2607_v23 = vsel %vm2599_vm5, %v2598_v29, %v2573_v53 }
 0xc53   : > { %v2606_v56 = vsel %vm2599_vm5, %v2597_v57, %v2571_v38 }
 0xc54   : > { %5374 = vmatprep.mubr.msk.f32.mxu0 %vm582_vm0, %v2606_v56 }
 0xc55   : > { %5375 = vmatmul.mubr.msk.f32.gmra.mrb[46].mxu0 %vm582_vm0, %v2607_v23 }
 0xd1c   : > { %v5367_v59 = vpop.f32.mrb[40].mxu0 }
 0xd1d   : > { %v2715_v5 = vadd.f32 %v5367_v59, %v4669_v6  ;;  %v2709_v25 = vpop.f32.mrb[41].mxu0 }
 0xd1e   : > { %v2710_v50 = vadd.f32 %v4669_v6, %v2709_v25 }
 0xd1f   : > { %v2749_v62 = vadd.f32 %v6261_v60, %v2715_v5 }
 0xd20   : > { %v2748_v58 = vadd.f32 %v6262_v7, %v2710_v50  ;;  %v5370_v42 = vpop.f32.mrb[42].mxu0 }
 0xd21   : > { %v2725_v21 = vadd.f32 %v5370_v42, %v4669_v6  ;;  %v2719_v10 = vpop.f32.mrb[43].mxu0  ;;  %v2759_v18 = vsel %vm582_vm0, %v2749_v62, 0.0 }
 0xd22   : > { %v2720_v44 = vadd.f32 %v4669_v6, %v2719_v10  ;;  %2760 = vadd.xlane.f32.xlu1 %v2759_v18  ;;  %v2756_v8 = vsel %vm582_vm0, %v2748_v58, 0.0 }
 0xd23   : > { %2757 = vadd.xlane.f32.xlu0 %v2756_v8  ;;  %v2751_v52 = vadd.f32 %v6264_v9, %v2725_v21  ;;  %v2892_v9 = vld [vmem:[%s7899_s10 + $0x8] sm:$0xff] }
 0xd24   : > { %v2750_v43 = vadd.f32 %v6263_v35, %v2720_v44  ;;  %v5373_v37 = vpop.f32.mrb[44].mxu0 }
 0xd25   : > { %v2729_v28 = vpop.f32.mrb[45].mxu0  ;;  %v2735_v24 = vadd.f32 %v5373_v37, %v4669_v6  ;;  %v2765_v33 = vsel %vm582_vm0, %v2751_v52, 0.0  ;;  %v2891_v37 = vld [vmem:[%s7899_s10] sm:$0xff] }
 0xd26   : > { %v2730_v32 = vadd.f32 %v4669_v6, %v2729_v28  ;;  %v2762_v39 = vsel %vm582_vm0, %v2750_v43, 0.0  ;;  %v5773_v28 = vpack.c.bf16 %v2892_v9, %v2891_v37  ;;  %v4739_v9 = vld [vmem:[%s7901_s12 + $0x40] sm:$0xff] }
 0xd27   : > { %2763 = vadd.xlane.f32.xlu0 %v2762_v39  ;;  %v2753_v47 = vadd.f32 %v6266_v40, %v2735_v24  ;;  %v3185_v24 = vld [vmem:[%s7901_s12 + $0x8] sm:$0xff]  ;;  %v2893_v39 = vld [vmem:[%s7899_s10 + $0x10] sm:$0xff]  ;;  %v4707_v40 = vld [vmem:[%s7901_s12 + $0x20] sm:$0xff] }
 0xd28   : > { %v2752_v27 = vadd.f32 %v6265_v45, %v2730_v32  ;;  %v5376_v31 = vpop.f32.mrb[46].mxu0  ;;  %5774 = vmatprep.subr.bf16.mxu1 %v5773_v28  ;;  %v2894_v45 = vld [vmem:[%s7899_s10 + $0x18] sm:$0xff] }
 0xd29   : > { %v2739_v26 = vpop.f32.mrb[47].mxu0  ;;  %v2745_v34 = vadd.f32 %v5376_v31, %v4669_v6  ;;  %v2771_v49 = vsel %vm582_vm0, %v2753_v47, 0.0  ;;  %5776 = vmatpush3.bf16.msra.mxu1 %v5773_v28  ;;  %v5777_v31 = vpack.c.bf16 %v2894_v45, %v2893_v39 }
 0xd2a   : > { %v2740_v61 = vadd.f32 %v4669_v6, %v2739_v26  ;;  %v2768_v20 = vsel %vm582_vm0, %v2752_v27, 0.0  ;;  %v3187_v26 = vld [vmem:[%s7901_s12 + $0x18] sm:$0xff] }
 0xd2b   : > { %2769 = vadd.xlane.f32.xlu1 %v2768_v20  ;;  %2766 = vadd.xlane.f32.xlu0 %v2765_v33  ;;  %v2755_v12 = vadd.f32 %v6268_v41, %v2745_v34  ;;  %v3309_v20 = vld [vmem:[%s7903_s14 + $0x8] sm:$0xff] }
 0xd2c   : > { %v2754_v54 = vadd.f32 %v6267_v19, %v2740_v61  ;;  %5778 = vmatprep.subr.bf16.mxu1 %v5777_v31  ;;  %v3308_v61 = vld [vmem:[%s7903_s14] sm:$0xff] }
 0xd2d   : > { %v2777_v16 = vsel %vm582_vm0, %v2755_v12, 0.0  ;;  %5780 = vmatpush3.bf16.msra.mxu1 %v5777_v31  ;;  %v7216_v19 = vpack.c.bf16 %v3309_v20, %v3308_v61 }
 0xd2e   : > { %v2774_v14 = vsel %vm582_vm0, %v2754_v54, 0.0 }
 0xd2f   : > { %2775 = vadd.xlane.f32.xlu1 %v2774_v14  ;;  %2772 = vadd.xlane.f32.xlu0 %v2771_v49 }
 0xd30   : > { %5790 = vmatprep.subr.bf16.mxu1 %v7216_v19 }
 0xd33   : > { %2778 = vadd.xlane.f32.xlu0 %v2777_v16 }
 0xdaf   : > { %v2761_v0 = vpop.xlane.xlu1 %2760 }
 0xdb0   : > { %v2782_v63 = vmul.f32 0.03125, %v2761_v0  ;;  %v2758_v46 = vpop.xlane.xlu0 %2757 }
 0xdb1   : > { %v2781_v30 = vmul.f32 0.03125, %v2758_v46 }
 0xdb2   : > { %v7137_v51 = vsub.f32 %v2749_v62, %v2782_v63 }
 0xdb3   : > { %v7139_v48 = vsub.f32 %v2748_v58, %v2781_v30 }
 0xdb4   : > { %v2764_v36 = vpop.xlane.xlu0 %2763  ;;  %v2798_v2 = vmul.f32 %v7137_v51, %v7137_v51 }
 0xdb5   : > { %v2783_v13 = vmul.f32 0.03125, %v2764_v36  ;;  %v2797_v1 = vmul.f32 %v7139_v48, %v7139_v48 }
 0xdb6   : > { %v2808_v15 = vsel %vm582_vm0, %v2798_v2, 0.0 }
 0xdb7   : > { %v7146_v11 = vsub.f32 %v2750_v43, %v2783_v13  ;;  %2809 = vadd.xlane.f32.xlu0 %v2808_v15  ;;  %v2805_v55 = vsel %vm582_vm0, %v2797_v1, 0.0 }
 0xdb8   : > { %v2770_v22 = vpop.xlane.xlu1 %2769  ;;  %2806 = vadd.xlane.f32.xlu1 %v2805_v55  ;;  %v2767_v17 = vpop.xlane.xlu0 %2766 }
 0xdb9   : > { %v2785_v4 = vmul.f32 0.03125, %v2770_v22  ;;  %v2784_v53 = vmul.f32 0.03125, %v2767_v17  ;;  %v2799_v3 = vmul.f32 %v7146_v11, %v7146_v11 }
 0xdbb   : > { %v7151_v57 = vsub.f32 %v2752_v27, %v2785_v4  ;;  %v7153_v38 = vsub.f32 %v2751_v52, %v2784_v53  ;;  %v2811_v29 = vsel %vm582_vm0, %v2799_v3, 0.0  ;;  %v3184_v52 = vld [vmem:[%s7901_s12] sm:$0xff]  ;;  %v3186_v27 = vld [vmem:[%s7901_s12 + $0x10] sm:$0xff] }
 0xdbc   : > { %v2776_v56 = vpop.xlane.xlu1 %2775  ;;  %2812 = vadd.xlane.f32.xlu1 %v2811_v29  ;;  %v2773_v23 = vpop.xlane.xlu0 %2772  ;;  %v5781_v32 = vpack.c.bf16 %v3185_v24, %v3184_v52  ;;  %v5785_v33 = vpack.c.bf16 %v3187_v26, %v3186_v27  ;;  %v7222_v3 = vld [vmem:[%s7897_s8] ss:$0 sm:$0xff] }
 0xdbd   : > { %v2787_v6 = vmul.f32 0.03125, %v2776_v56  ;;  %v2786_v59 = vmul.f32 0.03125, %v2773_v23  ;;  %v2801_v5 = vmul.f32 %v7151_v57, %v7151_v57  ;;  %v2800_v25 = vmul.f32 %v7153_v38, %v7153_v38  ;;  %v3312_v24 = vld [vmem:[%s7903_s14 + $0x20] sm:$0xff] }
 0xdbe   : > { %5782 = vmatprep.subr.bf16.mxu0 %v5781_v32 }
 0xdbf   : > { %v7160_v50 = vsub.f32 %v2754_v54, %v2787_v6  ;;  %v7162_v60 = vsub.f32 %v2753_v47, %v2786_v59  ;;  %v2817_v62 = vsel %vm582_vm0, %v2801_v5, 0.0  ;;  %v2814_v7 = vsel %vm582_vm0, %v2800_v25, 0.0  ;;  %5784 = vmatpush3.bf16.msra.mxu0 %v5781_v32  ;;  %v4708_v47 = vld [vmem:[%s7901_s12 + $0x28] sm:$0xff]  ;;  %v7229_v25 = vld [vmem:[%s7898_s9] ss:$0 sm:$0xff] }
 0xdc0   : > { %2818 = vadd.xlane.f32.xlu1 %v2817_v62  ;;  %2815 = vadd.xlane.f32.xlu0 %v2814_v7  ;;  %v2779_v58 = vpop.xlane.xlu0 %2778  ;;  %v7207_v34 = vpack.c.bf16 %v4708_v47, %v4707_v40  ;;  %v3313_v32 = vld [vmem:[%s7903_s14 + $0x28] sm:$0xff] }
 0xdc1   : > { %v2788_v42 = vmul.f32 0.03125, %v2779_v58  ;;  %v2803_v21 = vmul.f32 %v7160_v50, %v7160_v50  ;;  %v2802_v10 = vmul.f32 %v7162_v60, %v7162_v60  ;;  %5786 = vmatprep.subr.bf16.mxu0 %v5785_v33  ;;  %v4709_v58 = vld [vmem:[%s7901_s12 + $0x30] sm:$0xff]  ;;  %v5797_v40 = vpack.c.bf16 %v3313_v32, %v3312_v24 }
 0xdc3   : > { %v7170_v18 = vsub.f32 %v2755_v12, %v2788_v42  ;;  %v2823_v44 = vsel %vm582_vm0, %v2803_v21, 0.0  ;;  %v2820_v8 = vsel %vm582_vm0, %v2802_v10, 0.0  ;;  %5788 = vmatpush3.bf16.msra.mxu0 %v5785_v33  ;;  %v3310_v42 = vld [vmem:[%s7903_s14 + $0x10] sm:$0xff]  ;;  %v3311_v21 = vld [vmem:[%s7903_s14 + $0x18] sm:$0xff] }
 0xdc4   : > { %2824 = vadd.xlane.f32.xlu1 %v2823_v44  ;;  %2821 = vadd.xlane.f32.xlu0 %v2820_v8  ;;  %v5793_v52 = vpack.c.bf16 %v3311_v21, %v3310_v42 }
 0xdc5   : > { %v2804_v35 = vmul.f32 %v7170_v18, %v7170_v18  ;;  %5806 = vmatprep.subr.bf16.mxu0 %v7207_v34 }
 0xdc7   : > { %v2826_v43 = vsel %vm582_vm0, %v2804_v35, 0.0 }
 0xdc8   : > { %2827 = vadd.xlane.f32.xlu0 %v2826_v43 }
 0xe44   : > { %v2810_v54 = vpop.xlane.xlu0 %2809 }
 0xe45   : > { %v2830_v41 = vmul.f32 0.03125, %v2810_v54  ;;  %v2807_v12 = vpop.xlane.xlu1 %2806 }
 0xe46   : > { %v2829_v14 = vmul.f32 0.03125, %v2807_v12 }
 0xe47   : > { %v2838_v49 = vadd.f32 1e-05, %v2830_v41 }
 0xe48   : > { %v2837_v16 = vadd.f32 1e-05, %v2829_v14 }
 0xe49   : > { %6197 = vrsqrt.f32 %v2838_v49  ;;  %v2813_v0 = vpop.xlane.xlu1 %2812 }
 0xe4a   : > { %6199 = vrsqrt.f32 %v2837_v16  ;;  %v2831_v63 = vmul.f32 0.03125, %v2813_v0  ;;  %v4741_v0 = vld [vmem:[%s7901_s12 + $0x50] sm:$0xff] }
 0xe4c   : > { %v2839_v46 = vadd.f32 1e-05, %v2831_v63  ;;  %v4742_v63 = vld [vmem:[%s7901_s12 + $0x58] sm:$0xff] }
 0xe4d   : > { %v2819_v30 = vpop.xlane.xlu1 %2818  ;;  %v2816_v36 = vpop.xlane.xlu0 %2815 }
 0xe4e   : > { %6201 = vrsqrt.f32 %v2839_v46  ;;  %v2833_v2 = vmul.f32 0.03125, %v2819_v30  ;;  %v2832_v13 = vmul.f32 0.03125, %v2816_v36  ;;  %v5833_v46 = vpack.c.bf16 %v4742_v63, %v4741_v0  ;;  %v4771_v30 = vld [vmem:[%s7901_s12 + $0x60] sm:$0xff]  ;;  %v4772_v36 = vld [vmem:[%s7901_s12 + $0x68] sm:$0xff] }
 0xe50   : > { %v2841_v1 = vadd.f32 1e-05, %v2833_v2  ;;  %v2840_v15 = vadd.f32 1e-05, %v2832_v13  ;;  %v5853_v2 = vpack.c.bf16 %v4772_v36, %v4771_v30  ;;  %v4773_v13 = vld [vmem:[%s7901_s12 + $0x70] sm:$0xff]  ;;  %v4754_v30 = vld [vmem:[%s7903_s14 + $0x88] sm:$0xff] }
 0xe51   : > { %v2825_v55 = vpop.xlane.xlu1 %2824  ;;  %v2822_v22 = vpop.xlane.xlu0 %2821 }
 0xe52   : > { %6203 = vrsqrt.f32 %v2841_v1  ;;  %v2835_v17 = vmul.f32 0.03125, %v2825_v55  ;;  %v2834_v4 = vmul.f32 0.03125, %v2822_v22  ;;  %v4774_v1 = vld [vmem:[%s7901_s12 + $0x78] sm:$0xff]  ;;  %v3314_v55 = vld [vmem:[%s7903_s14 + $0x30] sm:$0xff] }
 0xe53   : > { %v6198_v53 = vpop.eup %6197  ;;  %6205 = vrsqrt.f32 %v2840_v15  ;;  %v5857_v15 = vpack.c.bf16 %v4774_v1, %v4773_v13  ;;  %v3315_v22 = vld [vmem:[%s7903_s14 + $0x38] sm:$0xff] }
 0xe54   : > { %v6200_v29 = vpop.eup %6199  ;;  %v2854_v56 = vmul.f32 %v6198_v53, %v7137_v51  ;;  %v2843_v23 = vadd.f32 1e-05, %v2835_v17  ;;  %v2842_v6 = vadd.f32 1e-05, %v2834_v4  ;;  %v5801_v17 = vpack.c.bf16 %v3315_v22, %v3314_v55  ;;  %v4721_v4 = vld [vmem:[%s7903_s14 + $0x40] sm:$0xff]  ;;  %v4722_v53 = vld [vmem:[%s7903_s14 + $0x48] sm:$0xff] }
 0xe55   : > { %v2853_v59 = vmul.f32 %v6200_v29, %v7139_v48  ;;  %v2828_v5 = vpop.xlane.xlu0 %2827  ;;  %v4710_v48 = vld [vmem:[%s7901_s12 + $0x38] sm:$0xff]  ;;  %v7408_v29 = vld [vmem:[%s7900_s11] ss:$0 sm:$0xff] }
 0xe56   : > { %v2869_v62 = vmul.f32 %v7222_v3, %v2854_v56  ;;  %6207 = vrsqrt.f32 %v2843_v23  ;;  %v2836_v7 = vmul.f32 0.03125, %v2828_v5  ;;  %v5809_v37 = vpack.c.bf16 %v4710_v48, %v4709_v58  ;;  %v7413_v56 = vld [vmem:[%s7902_s13] ss:$0 sm:$0xff]  ;;  %v4724_v48 = vld [vmem:[%s7903_s14 + $0x58] sm:$0xff] }
 0xe57   : > { %v2868_v51 = vmul.f32 %v7222_v3, %v2853_v59  ;;  %6209 = vrsqrt.f32 %v2842_v6 }
 0xe58   : > { %v6202_v10 = vpop.eup %6201  ;;  %v2844_v44 = vadd.f32 1e-05, %v2836_v7  ;;  %v7250_v43 = vadd.f32 %v7229_v25, %v2869_v62 }
 0xe59   : > { %v7246_v8 = vadd.f32 %v7229_v25, %v2868_v51  ;;  %v2855_v35 = vmul.f32 %v6202_v10, %v7146_v11  ;;  %v4740_v11 = vld [vmem:[%s7901_s12 + $0x48] sm:$0xff]  ;;  %v4723_v51 = vld [vmem:[%s7903_s14 + $0x50] sm:$0xff] }
 0xe5a   : > { %6211 = vrsqrt.f32 %v2844_v44  ;;  %v5829_v33 = vpack.c.bf16 %v4740_v11, %v4739_v9  ;;  %v4726_v9 = vld [vmem:[%s7903_s14 + $0x68] sm:$0xff] }
 0xe5b   : > { %v2870_v28 = vmul.f32 %v7222_v3, %v2855_v35  ;;  %5385 = vmatprep.mubr.msk.f32.mxu1 %vm582_vm0, %v7246_v8  ;;  %5405 = vmatprep.mubr.msk.f32.mxu0 %vm582_vm0, %v7246_v8  ;;  %v5817_v35 = vpack.c.bf16 %v4724_v48, %v4723_v51 }
 0xe5c   : > { %v6204_v39 = vpop.eup %6203  ;;  %5386 = vmatmul.mubr.msk.f32.vlgmr.msra.gmra.mrb[40].mxu1 %vm582_vm0, %v7250_v43  ;;  %5406 = vmatmul.mubr.msk.f32.vlgmr.msra.gmra.mrb[48].mxu0 %vm582_vm0, %v7250_v43 }
 0xe5d   : > { %v6206_v45 = vpop.eup %6205  ;;  %v7274_v27 = vadd.f32 %v7229_v25, %v2870_v28  ;;  %v2857_v31 = vmul.f32 %v6204_v39, %v7151_v57  ;;  %5808 = vmatpush3.bf16.msra.mxu0 %v7207_v34  ;;  %5792 = vmatpush3.bf16.msra.mxu1 %v7216_v19 }
 0xe5e   : > { %v2856_v26 = vmul.f32 %v6206_v45, %v7153_v38  ;;  %5810 = vmatprep.subr.bf16.mxu0 %v5809_v37  ;;  %5794 = vmatprep.subr.bf16.mxu1 %v5793_v52 }
 0xe5f   : > { %v2872_v47 = vmul.f32 %v7222_v3, %v2857_v31  ;;  %5388 = vmatprep.mubr.msk.f32.mxu1 %vm582_vm0, %v7274_v27  ;;  %5408 = vmatprep.mubr.msk.f32.mxu0 %vm582_vm0, %v7274_v27 }
 0xe60   : > { %v6208_v61 = vpop.eup %6207  ;;  %v2871_v57 = vmul.f32 %v7222_v3, %v2856_v26 }
 0xe61   : > { %v6210_v34 = vpop.eup %6209  ;;  %v7287_v20 = vadd.f32 %v7229_v25, %v2872_v47  ;;  %v2859_v38 = vmul.f32 %v6208_v61, %v7160_v50  ;;  %5812 = vmatpush3.bf16.msra.mxu0 %v5809_v37  ;;  %5796 = vmatpush3.bf16.msra.mxu1 %v5793_v52  ;;  %v4725_v37 = vld [vmem:[%s7903_s14 + $0x60] sm:$0xff] }
 0xe62   : > { %v7291_v19 = vadd.f32 %v7229_v25, %v2871_v57  ;;  %v2858_v54 = vmul.f32 %v6210_v34, %v7162_v60  ;;  %5830 = vmatprep.subr.bf16.mxu0 %v5829_v33  ;;  %5798 = vmatprep.subr.bf16.mxu1 %v5797_v40  ;;  %v5821_v45 = vpack.c.bf16 %v4726_v9, %v4725_v37 }
 0xe63   : > { %7917 = vst [vmem:[#allocation2_spill] sm:$0xff] %v7287_v20  ;;  %v2874_v41 = vmul.f32 %v7222_v3, %v2859_v38 }
 0xe64   : > { %v6212_v12 = vpop.eup %6211  ;;  %v2873_v14 = vmul.f32 %v7222_v3, %v2858_v54  ;;  %5389 = vmatmul.mubr.msk.f32.gmra.mrb[42].mxu1 %vm582_vm0, %v7291_v19  ;;  %5409 = vmatmul.mubr.msk.f32.gmra.mrb[50].mxu0 %vm582_vm0, %v7291_v19 }
 0xe65   : > { %v7301_v50 = vadd.f32 %v7229_v25, %v2874_v41  ;;  %v2860_v49 = vmul.f32 %v6212_v12, %v7170_v18  ;;  %5391 = vmatprep.mubr.msk.f32.mxu1 %vm582_vm0, %v7287_v20  ;;  %5411 = vmatprep.mubr.msk.f32.mxu0 %vm582_vm0, %v7287_v20 }
 0xe66   : > { %v7309_v60 = vadd.f32 %v7229_v25, %v2873_v14  ;;  %5800 = vmatpush3.bf16.msra.mxu1 %v5797_v40  ;;  %v4728_v40 = vld [vmem:[%s7903_s14 + $0x78] sm:$0xff] }
 0xe67   : > { %7918 = vst [vmem:[#allocation3_spill] sm:$0xff] %v7301_v50  ;;  %v2875_v16 = vmul.f32 %v7222_v3, %v2860_v49  ;;  %5802 = vmatprep.subr.bf16.mxu1 %v5801_v17  ;;  %v5813_v3 = vpack.c.bf16 %v4722_v53, %v4721_v4 }
 0xe68   : > { %5392 = vmatmul.mubr.msk.f32.gmra.mrb[44].mxu1 %vm582_vm0, %v7309_v60  ;;  %5412 = vmatmul.mubr.msk.f32.gmra.mrb[52].mxu0 %vm582_vm0, %v7309_v60 }
 0xe69   : > { %v7317_v18 = vadd.f32 %v7229_v25, %v2875_v16  ;;  %5394 = vmatprep.mubr.msk.f32.mxu1 %vm582_vm0, %v7301_v50  ;;  %5414 = vmatprep.mubr.msk.f32.mxu0 %vm582_vm0, %v7301_v50 }
 0xe6a   : > { %5804 = vmatpush3.bf16.msra.mxu1 %v5801_v17 }
 0xe6b   : > { %7919 = vst [vmem:[#allocation4_spill] sm:$0xff] %v7317_v18  ;;  %5814 = vmatprep.subr.bf16.mxu1 %v5813_v3 }
 0xe6c   : > { %5395 = vmatmul.mubr.msk.f32.gmra.mrb[46].mxu1 %vm582_vm0, %v7317_v18  ;;  %5415 = vmatmul.mubr.msk.f32.gmra.mrb[54].mxu0 %vm582_vm0, %v7317_v18 }
 0xe6d   : > { %5453 = vmatprep.mubr.msk.f32.mxu0 %vm582_vm0, %v7246_v8 }
 0xe70   : > { %5454 = vmatmul.mubr.msk.f32.vlgmr.msra.gmra.mrb[56].mxu0 %vm582_vm0, %v7250_v43 }
 0xe71   : > { %5456 = vmatprep.mubr.msk.f32.mxu0 %vm582_vm0, %v7274_v27  ;;  %5832 = vmatpush3.bf16.msra.mxu0 %v5829_v33  ;;  %v4727_v33 = vld [vmem:[%s7903_s14 + $0x70] sm:$0xff] }
 0xe72   : > { %5834 = vmatprep.subr.bf16.mxu0 %v5833_v46  ;;  %v5825_v16 = vpack.c.bf16 %v4728_v40, %v4727_v33 }
 0xe74   : > { %5457 = vmatmul.mubr.msk.f32.gmra.mrb[58].mxu0 %vm582_vm0, %v7291_v19 }
 0xe75   : > { %5459 = vmatprep.mubr.msk.f32.mxu0 %vm582_vm0, %v7287_v20  ;;  %5836 = vmatpush3.bf16.msra.mxu0 %v5833_v46  ;;  %v4753_v46 = vld [vmem:[%s7903_s14 + $0x80] sm:$0xff] }
 0xe76   : > { %5854 = vmatprep.subr.bf16.mxu0 %v5853_v2 }
 0xe78   : > { %5460 = vmatmul.mubr.msk.f32.gmra.mrb[60].mxu0 %vm582_vm0, %v7309_v60 }
 0xe79   : > { %5462 = vmatprep.mubr.msk.f32.mxu0 %vm582_vm0, %v7301_v50 }
 0xe7c   : > { %5463 = vmatmul.mubr.msk.f32.gmra.mrb[62].mxu0 %vm582_vm0, %v7317_v18 }
 0xe7d   : > { %5501 = vmatprep.mubr.msk.f32.mxu0 %vm582_vm0, %v7246_v8 }
 0xe80   : > { %5502 = vmatmul.mubr.msk.f32.vlgmr.msra.gmra.mrb[64].mxu0 %vm582_vm0, %v7250_v43 }
 0xe81   : > { %5504 = vmatprep.mubr.msk.f32.mxu0 %vm582_vm0, %v7274_v27  ;;  %5856 = vmatpush3.bf16.msra.mxu0 %v5853_v2 }
 0xe82   : > { %5858 = vmatprep.subr.bf16.mxu0 %v5857_v15 }
 0xe84   : > { %5505 = vmatmul.mubr.msk.f32.gmra.mrb[66].mxu0 %vm582_vm0, %v7291_v19 }
 0xe85   : > { %5507 = vmatprep.mubr.msk.f32.mxu0 %vm582_vm0, %v7287_v20  ;;  %5860 = vmatpush3.bf16.msra.mxu0 %v5857_v15 }
 0xe88   : > { %5508 = vmatmul.mubr.msk.f32.gmra.mrb[68].mxu0 %vm582_vm0, %v7309_v60 }
 0xe89   : > { %5510 = vmatprep.mubr.msk.f32.mxu0 %vm582_vm0, %v7301_v50 }
 0xe8c   : > { %5511 = vmatmul.mubr.msk.f32.gmra.mrb[70].mxu0 %vm582_vm0, %v7317_v18 }
 0xe8d   : > { %5549 = vmatprep.mubr.msk.f32.mxu0 %vm582_vm0, %v7246_v8 }
 0xe90   : > { %5550 = vmatmul.mubr.msk.f32.vlgmr.msra.gmra.mrb[72].mxu0 %vm582_vm0, %v7250_v43 }
 0xe91   : > { %5552 = vmatprep.mubr.msk.f32.mxu0 %vm582_vm0, %v7274_v27 }
 0xe94   : > { %5553 = vmatmul.mubr.msk.f32.gmra.mrb[74].mxu0 %vm582_vm0, %v7291_v19 }
 0xe95   : > { %5555 = vmatprep.mubr.msk.f32.mxu0 %vm582_vm0, %v7287_v20 }
 0xe98   : > { %5556 = vmatmul.mubr.msk.f32.gmra.mrb[76].mxu0 %vm582_vm0, %v7309_v60 }
 0xe99   : > { %5558 = vmatprep.mubr.msk.f32.mxu0 %vm582_vm0, %v7301_v50 }
 0xe9c   : > { %5559 = vmatmul.mubr.msk.f32.gmra.mrb[78].mxu0 %vm582_vm0, %v7317_v18 }
 0xf2f   : > { %v5387_v23 = vpop.f32.mrb[40].mxu1  ;;  %v5407_v6 = vpop.f32.mrb[48].mxu0 }
 0xf30   : > { %v7416_v59 = vadd.f32 %v5387_v23, %v7408_v29  ;;  %v3267_v5 = vadd.f32 %v5407_v6, %v7413_v56  ;;  %v2992_v25 = vpop.f32.mrb[41].mxu1  ;;  %v3261_v62 = vpop.f32.mrb[49].mxu0 }
 0xf31   : > { %v7420_v7 = vadd.f32 %v7408_v29, %v2992_v25  ;;  %v3262_v58 = vadd.f32 %v7413_v56, %v3261_v62 }
 0xf32   : > { %v3035_v42 = vsel %vm3031_vm6, %v7416_v59, -inf  ;;  %v3301_v44 = vmax.f32 %v3267_v5, 0.0  ;;  %v4712_v5 = vld [vmem:[%s7902_s13 + $0x1] ss:$0 sm:$0xff] }
 0xf33   : > { %v3300_v21 = vmax.f32 %v3262_v58, 0.0  ;;  %3036 = vmax.xlane.f32.xlu0 %v3035_v42  ;;  %v3032_v10 = vsel %vm3031_vm6, %v7420_v7, -inf }
 0xf34   : > { %3033 = vmax.xlane.f32.xlu1 %v3032_v10  ;;  %v4756_v10 = vld [vmem:[%s7903_s14 + $0x98] sm:$0xff] }
 0xf35   : > { %5433 = vmatprep.mubr.msk.f32.mxu1 %vm1030_vm3, %v3300_v21  ;;  %v4755_v21 = vld [vmem:[%s7903_s14 + $0x90] sm:$0xff] }
 0xf36   : > { %5434 = vmatmul.mubr.msk.f32.vlgmr.msra.gmra.mrb[48].mxu1 %vm1030_vm3, %v3301_v44 }
 0xf37   : > { %v5390_v52 = vpop.f32.mrb[42].mxu1  ;;  %v5410_v28 = vpop.f32.mrb[50].mxu0  ;;  %5816 = vmatpush3.bf16.msra.mxu1 %v5813_v3  ;;  %v5837_v3 = vpack.c.bf16 %v4754_v30, %v4753_v46  ;;  %v4744_v30 = vld [vmem:[%s7902_s13 + $0x2] ss:$0 sm:$0xff] }
 0xf38   : > { %v7442_v11 = vadd.f32 %v5390_v52, %v7408_v29  ;;  %v3277_v24 = vadd.f32 %v5410_v28, %v7413_v56  ;;  %v3002_v32 = vpop.f32.mrb[43].mxu1  ;;  %v3271_v39 = vpop.f32.mrb[51].mxu0  ;;  %5818 = vmatprep.subr.bf16.mxu1 %v5817_v35  ;;  %v5841_v28 = vpack.c.bf16 %v4756_v10, %v4755_v21 }
 0xf39   : > { %v7446_v31 = vadd.f32 %v7408_v29, %v3002_v32  ;;  %v3272_v26 = vadd.f32 %v7413_v56, %v3271_v39  ;;  %v4757_v32 = vld [vmem:[%s7903_s14 + $0xa0] sm:$0xff]  ;;  %v4758_v39 = vld [vmem:[%s7903_s14 + $0xa8] sm:$0xff] }
 0xf3a   : > { %v3041_v47 = vsel %vm3031_vm6, %v7442_v11, -inf  ;;  %v3303_v54 = vmax.f32 %v3277_v24, 0.0 }
 0xf3b   : > { %v3302_v61 = vmax.f32 %v3272_v26, 0.0  ;;  %3042 = vmax.xlane.f32.xlu0 %v3041_v47  ;;  %v5393_v57 = vpop.f32.mrb[44].mxu1  ;;  %v5413_v34 = vpop.f32.mrb[52].mxu0  ;;  %v3038_v38 = vsel %vm3031_vm6, %v7446_v31, -inf  ;;  %5820 = vmatpush3.bf16.msra.mxu1 %v5817_v35 }
 0xf3c   : > { %v7460_v41 = vadd.f32 %v5393_v57, %v7408_v29  ;;  %v3287_v12 = vadd.f32 %v5413_v34, %v7413_v56  ;;  %3039 = vmax.xlane.f32.xlu1 %v3038_v38  ;;  %v3012_v14 = vpop.f32.mrb[45].mxu1  ;;  %v3281_v49 = vpop.f32.mrb[53].mxu0  ;;  %5822 = vmatprep.subr.bf16.mxu1 %v5821_v45  ;;  %v4759_v34 = vld [vmem:[%s7903_s14 + $0xb0] sm:$0xff]  ;;  %v4760_v38 = vld [vmem:[%s7903_s14 + $0xb8] sm:$0xff] }
 0xf3d   : > { %v7464_v0 = vadd.f32 %v7408_v29, %v3012_v14  ;;  %v3282_v63 = vadd.f32 %v7413_v56, %v3281_v49  ;;  %5436 = vmatprep.mubr.msk.f32.mxu1 %vm1030_vm3, %v3302_v61  ;;  %v5845_v61 = vpack.c.bf16 %v4758_v39, %v4757_v32 }
 0xf3e   : > { %5437 = vmatmul.mubr.msk.f32.gmra.mrb[50].mxu1 %vm1030_vm3, %v3303_v54  ;;  %v3047_v36 = vsel %vm3031_vm6, %v7460_v41, -inf  ;;  %v3305_v55 = vmax.f32 %v3287_v12, 0.0 }
 0xf3f   : > { %v3304_v2 = vmax.f32 %v3282_v63, 0.0  ;;  %3048 = vmax.xlane.f32.xlu0 %v3047_v36  ;;  %v5396_v13 = vpop.f32.mrb[46].mxu1  ;;  %v5416_v1 = vpop.f32.mrb[54].mxu0  ;;  %v3044_v15 = vsel %vm3031_vm6, %v7464_v0, -inf  ;;  %5824 = vmatpush3.bf16.msra.mxu1 %v5821_v45  ;;  %v5849_v63 = vpack.c.bf16 %v4760_v38, %v4759_v34  ;;  %v4785_v36 = vld [vmem:[%s7903_s14 + $0xc0] sm:$0xff] }
 0xf40   : > { %v7480_v22 = vadd.f32 %v5396_v13, %v7408_v29  ;;  %v3297_v17 = vadd.f32 %v5416_v1, %v7413_v56  ;;  %3045 = vmax.xlane.f32.xlu1 %v3044_v15  ;;  %v3022_v4 = vpop.f32.mrb[47].mxu1  ;;  %v3291_v53 = vpop.f32.mrb[55].mxu0  ;;  %5826 = vmatprep.subr.bf16.mxu1 %v5825_v16 }
 0xf41   : > { %v7484_v23 = vadd.f32 %v7408_v29, %v3022_v4  ;;  %v3292_v6 = vadd.f32 %v7413_v56, %v3291_v53  ;;  %5439 = vmatprep.mubr.msk.f32.mxu1 %vm1030_vm3, %v3304_v2  ;;  %v4786_v2 = vld [vmem:[%s7903_s14 + $0xc8] sm:$0xff] }
 0xf42   : > { %5440 = vmatmul.mubr.msk.f32.gmra.mrb[52].mxu1 %vm1030_vm3, %v3305_v55  ;;  %v3053_v25 = vsel %vm3031_vm6, %v7480_v22, -inf  ;;  %v3307_v51 = vmax.f32 %v3297_v17, 0.0  ;;  %v5861_v4 = vpack.c.bf16 %v4786_v2, %v4785_v36 }
 0xf43   : > { %v3306_v62 = vmax.f32 %v3292_v6, 0.0  ;;  %v5455_v58 = vpop.f32.mrb[56].mxu0  ;;  %3054 = vmax.xlane.f32.xlu0 %v3053_v25  ;;  %v3050_v29 = vsel %vm3031_vm6, %v7484_v23, -inf  ;;  %5828 = vmatpush3.bf16.msra.mxu1 %v5825_v16  ;;  %v4788_v6 = vld [vmem:[%s7903_s14 + $0xd8] sm:$0xff] }
 0xf44   : > { %v3593_v56 = vadd.f32 %v5455_v58, %v4712_v5  ;;  %v3587_v48 = vpop.f32.mrb[57].mxu0  ;;  %3051 = vmax.xlane.f32.xlu1 %v3050_v29  ;;  %5838 = vmatprep.subr.bf16.mxu1 %v5837_v3 }
 0xf45   : > { %v3588_v42 = vadd.f32 %v4712_v5, %v3587_v48  ;;  %5442 = vmatprep.mubr.msk.f32.mxu1 %vm1030_vm3, %v3306_v62  ;;  %v4789_v48 = vld [vmem:[%s7903_s14 + $0xe0] sm:$0xff] }
 0xf46   : > { %5443 = vmatmul.mubr.msk.f32.gmra.mrb[54].mxu1 %vm1030_vm3, %v3307_v51  ;;  %v3627_v37 = vmax.f32 %v3593_v56, 0.0 }
 0xf47   : > { %v3626_v44 = vmax.f32 %v3588_v42, 0.0  ;;  %v5458_v35 = vpop.f32.mrb[58].mxu0  ;;  %v4790_v42 = vld [vmem:[%s7903_s14 + $0xe8] sm:$0xff] }
 0xf48   : > { %v3603_v9 = vadd.f32 %v5458_v35, %v4712_v5  ;;  %v3597_v52 = vpop.f32.mrb[59].mxu0 }
 0xf49   : > { %v3598_v24 = vadd.f32 %v4712_v5, %v3597_v52  ;;  %5481 = vmatprep.mubr.msk.f32.mxu1 %vm1030_vm3, %v3626_v44 }
 0xf4a   : > { %5482 = vmatmul.mubr.msk.f32.vlgmr.msra.gmra.mrb[56].mxu1 %vm1030_vm3, %v3627_v37  ;;  %v3629_v33 = vmax.f32 %v3603_v9, 0.0  ;;  %v5869_v9 = vpack.c.bf16 %v4790_v42, %v4789_v48 }
 0xf4b   : > { %v3628_v45 = vmax.f32 %v3598_v24, 0.0  ;;  %v5461_v26 = vpop.f32.mrb[60].mxu0  ;;  %5840 = vmatpush3.bf16.msra.mxu1 %v5837_v3  ;;  %v4787_v3 = vld [vmem:[%s7903_s14 + $0xd0] sm:$0xff]  ;;  %v4792_v24 = vld [vmem:[%s7903_s14 + $0xf8] sm:$0xff] }
 0xf4c   : > { %v3613_v40 = vadd.f32 %v5461_v26, %v4712_v5  ;;  %v3607_v47 = vpop.f32.mrb[61].mxu0  ;;  %5842 = vmatprep.subr.bf16.mxu1 %v5841_v28  ;;  %v5865_v51 = vpack.c.bf16 %v4788_v6, %v4787_v3 }
 0xf4d   : > { %v3608_v57 = vadd.f32 %v4712_v5, %v3607_v47  ;;  %5484 = vmatprep.mubr.msk.f32.mxu1 %vm1030_vm3, %v3628_v45 }
 0xf4e   : > { %5485 = vmatmul.mubr.msk.f32.gmra.mrb[58].mxu1 %vm1030_vm3, %v3629_v33  ;;  %v3631_v14 = vmax.f32 %v3613_v40, 0.0 }
 0xf4f   : > { %v3630_v54 = vmax.f32 %v3608_v57, 0.0  ;;  %v5464_v12 = vpop.f32.mrb[62].mxu0  ;;  %5844 = vmatpush3.bf16.msra.mxu1 %v5841_v28  ;;  %v4791_v28 = vld [vmem:[%s7903_s14 + $0xf0] sm:$0xff] }
 0xf50   : > { %v3623_v49 = vadd.f32 %v5464_v12, %v4712_v5  ;;  %v3617_v16 = vpop.f32.mrb[63].mxu0  ;;  %5846 = vmatprep.subr.bf16.mxu1 %v5845_v61  ;;  %v5873_v40 = vpack.c.bf16 %v4792_v24, %v4791_v28 }
 0xf51   : > { %v3618_v46 = vadd.f32 %v4712_v5, %v3617_v16  ;;  %5487 = vmatprep.mubr.msk.f32.mxu1 %vm1030_vm3, %v3630_v54 }
 0xf52   : > { %5488 = vmatmul.mubr.msk.f32.gmra.mrb[60].mxu1 %vm1030_vm3, %v3631_v14  ;;  %v3633_v15 = vmax.f32 %v3623_v49, 0.0 }
 0xf53   : > { %v3632_v13 = vmax.f32 %v3618_v46, 0.0  ;;  %v5503_v1 = vpop.f32.mrb[64].mxu0  ;;  %5848 = vmatpush3.bf16.msra.mxu1 %v5845_v61  ;;  %v4776_v61 = vld [vmem:[%s7902_s13 + $0x3] ss:$0 sm:$0xff] }
 0xf54   : > { %v3913_v55 = vadd.f32 %v5503_v1, %v4744_v30  ;;  %v3907_v17 = vpop.f32.mrb[65].mxu0  ;;  %5850 = vmatprep.subr.bf16.mxu1 %v5849_v63 }
 0xf55   : > { %v3908_v53 = vadd.f32 %v4744_v30, %v3907_v17  ;;  %5490 = vmatprep.mubr.msk.f32.mxu1 %vm1030_vm3, %v3632_v13 }
 0xf56   : > { %5491 = vmatmul.mubr.msk.f32.gmra.mrb[62].mxu1 %vm1030_vm3, %v3633_v15  ;;  %v3947_v62 = vmax.f32 %v3913_v55, 0.0 }
 0xf57   : > { %v3946_v5 = vmax.f32 %v3908_v53, 0.0  ;;  %v5506_v25 = vpop.f32.mrb[66].mxu0  ;;  %5852 = vmatpush3.bf16.msra.mxu1 %v5849_v63 }
 0xf58   : > { %v3923_v58 = vadd.f32 %v5506_v25, %v4744_v30  ;;  %v3917_v29 = vpop.f32.mrb[67].mxu0  ;;  %5862 = vmatprep.subr.bf16.mxu1 %v5861_v4 }
 0xf59   : > { %v3918_v56 = vadd.f32 %v4744_v30, %v3917_v29  ;;  %5529 = vmatprep.mubr.msk.f32.mxu1 %vm1030_vm3, %v3946_v5 }
 0xf5a   : > { %5530 = vmatmul.mubr.msk.f32.vlgmr.msra.gmra.mrb[64].mxu1 %vm1030_vm3, %v3947_v62  ;;  %v3949_v44 = vmax.f32 %v3923_v58, 0.0 }
 0xf5b   : > { %v3948_v21 = vmax.f32 %v3918_v56, 0.0  ;;  %v5509_v10 = vpop.f32.mrb[68].mxu0  ;;  %5864 = vmatpush3.bf16.msra.mxu1 %v5861_v4 }
 0xf5c   : > { %v3933_v35 = vadd.f32 %v5509_v10, %v4744_v30  ;;  %v3927_v37 = vpop.f32.mrb[69].mxu0  ;;  %5866 = vmatprep.subr.bf16.mxu1 %v5865_v51 }
 0xf5d   : > { %v3928_v52 = vadd.f32 %v4744_v30, %v3927_v37  ;;  %5532 = vmatprep.mubr.msk.f32.mxu1 %vm1030_vm3, %v3948_v21 }
 0xf5e   : > { %5533 = vmatmul.mubr.msk.f32.gmra.mrb[66].mxu1 %vm1030_vm3, %v3949_v44  ;;  %v3951_v45 = vmax.f32 %v3933_v35, 0.0 }
 0xf5f   : > { %v3950_v32 = vmax.f32 %v3928_v52, 0.0  ;;  %v5512_v39 = vpop.f32.mrb[70].mxu0  ;;  %5868 = vmatpush3.bf16.msra.mxu1 %v5865_v51 }
 0xf60   : > { %v3943_v26 = vadd.f32 %v5512_v39, %v4744_v30  ;;  %v3937_v33 = vpop.f32.mrb[71].mxu0  ;;  %5870 = vmatprep.subr.bf16.mxu1 %v5869_v9 }
 0xf61   : > { %v3938_v47 = vadd.f32 %v4744_v30, %v3937_v33  ;;  %5535 = vmatprep.mubr.msk.f32.mxu1 %vm1030_vm3, %v3950_v32 }
 0xf62   : > { %5536 = vmatmul.mubr.msk.f32.gmra.mrb[68].mxu1 %vm1030_vm3, %v3951_v45  ;;  %v3953_v38 = vmax.f32 %v3943_v26, 0.0 }
 0xf63   : > { %v3952_v57 = vmax.f32 %v3938_v47, 0.0  ;;  %v5551_v34 = vpop.f32.mrb[72].mxu0  ;;  %5872 = vmatpush3.bf16.msra.mxu1 %v5869_v9 }
 0xf64   : > { %v4233_v54 = vadd.f32 %v5551_v34, %v4776_v61  ;;  %v4227_v12 = vpop.f32.mrb[73].mxu0  ;;  %5874 = vmatprep.subr.bf16.mxu1 %v5873_v40 }
 0xf65   : > { %v4228_v14 = vadd.f32 %v4776_v61, %v4227_v12  ;;  %5538 = vmatprep.mubr.msk.f32.mxu1 %vm1030_vm3, %v3952_v57 }
 0xf66   : > { %5539 = vmatmul.mubr.msk.f32.gmra.mrb[70].mxu1 %vm1030_vm3, %v3953_v38  ;;  %v4267_v63 = vmax.f32 %v4233_v54, 0.0  ;;  %v7906_v38 = vmov 1   ;;  %v7908_v54 = vmov 0  }
 0xf67   : > { %v4266_v49 = vmax.f32 %v4228_v14, 0.0  ;;  %v5554_v16 = vpop.f32.mrb[74].mxu0  ;;  %5876 = vmatpush3.bf16.msra.mxu1 %v5873_v40  ;;  %6040 = vset.pattern.permute.xlu1 %v7906_v38 }
 0xf68   : > { %v4243_v46 = vadd.f32 %v5554_v16, %v4776_v61  ;;  %v4237_v30 = vpop.f32.mrb[75].mxu0  ;;  %6039 = vset.pattern.permute.xlu0 %v7908_v54 }
 0xf69   : > { %v4238_v36 = vadd.f32 %v4776_v61, %v4237_v30  ;;  %5577 = vmatprep.mubr.msk.f32.mxu1 %vm1030_vm3, %v4266_v49 }
 0xf6a   : > { %5578 = vmatmul.mubr.msk.f32.vlgmr.msra.gmra.mrb[72].mxu1 %vm1030_vm3, %v4267_v63  ;;  %v4269_v1 = vmax.f32 %v4243_v46, 0.0  ;;  %v7633_v46 = vld [vmem:[%s7904_s15] ss:$0 sm:$0xff] }
 0xf6b   : > { %v4268_v2 = vmax.f32 %v4238_v36, 0.0  ;;  %v5557_v13 = vpop.f32.mrb[76].mxu0 }
 0xf6c   : > { %v4253_v15 = vadd.f32 %v5557_v13, %v4776_v61  ;;  %v4247_v55 = vpop.f32.mrb[77].mxu0 }
 0xf6d   : > { %v4248_v17 = vadd.f32 %v4776_v61, %v4247_v55  ;;  %5580 = vmatprep.mubr.msk.f32.mxu1 %vm1030_vm3, %v4268_v2 }
 0xf6e   : > { %5581 = vmatmul.mubr.msk.f32.gmra.mrb[74].mxu1 %vm1030_vm3, %v4269_v1  ;;  %v4271_v3 = vmax.f32 %v4253_v15, 0.0 }
 0xf6f   : > { %v4270_v4 = vmax.f32 %v4248_v17, 0.0  ;;  %v5560_v53 = vpop.f32.mrb[78].mxu0 }
 0xf70   : > { %v4263_v6 = vadd.f32 %v5560_v53, %v4776_v61  ;;  %v4257_v5 = vpop.f32.mrb[79].mxu0 }
 0xf71   : > { %v4258_v25 = vadd.f32 %v4776_v61, %v4257_v5  ;;  %5583 = vmatprep.mubr.msk.f32.mxu1 %vm1030_vm3, %v4270_v4 }
 0xf72   : > { %5584 = vmatmul.mubr.msk.f32.gmra.mrb[76].mxu1 %vm1030_vm3, %v4271_v3  ;;  %v4273_v58 = vmax.f32 %v4263_v6, 0.0  ;;  %v7657_v6 = vld [vmem:[%s7904_s15 + $0x1] ss:$0 sm:$0xff] }
 0xf73   : > { %v4272_v62 = vmax.f32 %v4258_v25, 0.0 }
 0xf75   : > { %5586 = vmatprep.mubr.msk.f32.mxu1 %vm1030_vm3, %v4272_v62 }
 0xf76   : > { %5587 = vmatmul.mubr.msk.f32.gmra.mrb[78].mxu1 %vm1030_vm3, %v4273_v58 }
 0xfc0   : > { %v7570_v29 = vpop.xlane.xlu0 %3036 }
 0xfc1   : > { %vm3057_vm7 = vcmp.ge.f32.partialorder %v7416_v59, %v7570_v29  ;;  %v7574_v51 = vpop.xlane.xlu1 %3033 }
 0xfc2   : > { %vm3056_vm8 = vcmp.ge.f32.partialorder %v7420_v7, %v7574_v51  ;;  %v3065_v56 = vsel %vm3057_vm7, -inf, %v7416_v59 }
 0xfc3   : > { %v3075_v48 = vsel %vm3031_vm6, %v3065_v56, -inf  ;;  %v3064_v42 = vsel %vm3056_vm8, -inf, %v7420_v7 }
 0xfc4   : > { %3076 = vmax.xlane.f32.xlu0 %v3075_v48  ;;  %v3072_v21 = vsel %vm3031_vm6, %v3064_v42, -inf }
 0xfc5   : > { %3073 = vmax.xlane.f32.xlu1 %v3072_v21 }
 0xfc8   : > { %v7582_v10 = vpop.xlane.xlu0 %3042 }
 0xfc9   : > { %vm3059_vm9 = vcmp.ge.f32.partialorder %v7442_v11, %v7582_v10  ;;  %v7586_v44 = vpop.xlane.xlu1 %3039 }
 0xfca   : > { %vm3058_vm10 = vcmp.ge.f32.partialorder %v7446_v31, %v7586_v44  ;;  %v3067_v35 = vsel %vm3059_vm9, -inf, %v7442_v11 }
 0xfcb   : > { %v3081_v37 = vsel %vm3031_vm6, %v3067_v35, -inf  ;;  %v3066_v9 = vsel %vm3058_vm10, -inf, %v7446_v31 }
 0xfcc   : > { %3082 = vmax.xlane.f32.xlu0 %v3081_v37  ;;  %v7593_v52 = vpop.xlane.xlu0 %3048  ;;  %v3078_v28 = vsel %vm3031_vm6, %v3066_v9, -inf }
 0xfcd   : > { %vm3061_vm11 = vcmp.ge.f32.partialorder %v7460_v41, %v7593_v52  ;;  %v7598_v24 = vpop.xlane.xlu1 %3045  ;;  %3079 = vmax.xlane.f32.xlu1 %v3078_v28  ;;  %v7681_v28 = vld [vmem:[%s7904_s15 + $0x2] ss:$0 sm:$0xff] }
 0xfce   : > { %vm3060_vm12 = vcmp.ge.f32.partialorder %v7464_v0, %v7598_v24  ;;  %v3069_v32 = vsel %vm3061_vm11, -inf, %v7460_v41 }
 0xfcf   : > { %v3087_v39 = vsel %vm3031_vm6, %v3069_v32, -inf  ;;  %v3068_v45 = vsel %vm3060_vm12, -inf, %v7464_v0 }
 0xfd0   : > { %3088 = vmax.xlane.f32.xlu0 %v3087_v39  ;;  %v7605_v26 = vpop.xlane.xlu0 %3054  ;;  %v3084_v33 = vsel %vm3031_vm6, %v3068_v45, -inf }
 0xfd1   : > { %vm3063_vm13 = vcmp.ge.f32.partialorder %v7480_v22, %v7605_v26  ;;  %3085 = vmax.xlane.f32.xlu1 %v3084_v33  ;;  %v7610_v40 = vpop.xlane.xlu1 %3051 }
 0xfd2   : > { %vm3062_vm14 = vcmp.ge.f32.partialorder %v7484_v23, %v7610_v40  ;;  %v3071_v47 = vsel %vm3063_vm13, -inf, %v7480_v22 }
 0xfd3   : > { %v3093_v61 = vsel %vm3031_vm6, %v3071_v47, -inf  ;;  %v3070_v57 = vsel %vm3062_vm14, -inf, %v7484_v23 }
 0xfd4   : > { %3094 = vmax.xlane.f32.xlu0 %v3093_v61  ;;  %v3090_v34 = vsel %vm3031_vm6, %v3070_v57, -inf }
 0xfd5   : > { %3091 = vmax.xlane.f32.xlu1 %v3090_v34 }
0x1009   : > { %v7620_v12 = vpop.f32.mrb[48].mxu1 }
0x100a   : > { %v7622_v14 = vpop.f32.mrb[49].mxu1 }
0x1011   : > { %v7624_v49 = vpop.f32.mrb[50].mxu1 }
0x1012   : > { %v7626_v16 = vpop.f32.mrb[51].mxu1 }
0x1015   : > { %v7628_v63 = vpop.f32.mrb[52].mxu1 }
0x1016   : > { %v3433_v30 = vpop.f32.mrb[53].mxu1 }
0x1017   : > { %v7636_v36 = vadd.f32 %v7633_v46, %v3433_v30 }
0x1019   : > { %7920 = vst [vmem:[#allocation5_spill] sm:$0xff] %v7636_v36  ;;  %v5444_v2 = vpop.f32.mrb[54].mxu1 }
0x101a   : > { %v7639_v13 = vadd.f32 %v5444_v2, %v7633_v46  ;;  %v3443_v1 = vpop.f32.mrb[55].mxu1 }
0x101b   : > { %v7642_v15 = vadd.f32 %v7633_v46, %v3443_v1 }
0x101c   : > { %7921 = vst [vmem:[#allocation6_spill] sm:$0xff] %v7639_v13 }
0x101d   : > { %7922 = vst [vmem:[#allocation7_spill] sm:$0xff] %v7642_v15  ;;  %v7644_v55 = vpop.f32.mrb[56].mxu1 }
0x101e   : > { %v7646_v17 = vpop.f32.mrb[57].mxu1 }
0x1021   : > { %v7648_v4 = vpop.f32.mrb[58].mxu1 }
0x1022   : > { %v7650_v53 = vpop.f32.mrb[59].mxu1 }
0x1025   : > { %v7652_v3 = vpop.f32.mrb[60].mxu1 }
0x1026   : > { %v3761_v5 = vpop.f32.mrb[61].mxu1 }
0x1027   : > { %v7660_v25 = vadd.f32 %v7657_v6, %v3761_v5  ;;  %v7705_v5 = vld [vmem:[%s7904_s15 + $0x3] ss:$0 sm:$0xff] }
0x1029   : > { %7923 = vst [vmem:[#allocation8_spill] sm:$0xff] %v7660_v25  ;;  %v5492_v62 = vpop.f32.mrb[62].mxu1 }
0x102a   : > { %v7663_v58 = vadd.f32 %v5492_v62, %v7657_v6  ;;  %v3771_v56 = vpop.f32.mrb[63].mxu1 }
0x102b   : > { %v7666_v48 = vadd.f32 %v7657_v6, %v3771_v56 }
0x102c   : > { %7924 = vst [vmem:[#allocation9_spill] sm:$0xff] %v7663_v58 }
0x102d   : > { %7925 = vst [vmem:[#allocation10_spill] sm:$0xff] %v7666_v48  ;;  %v7668_v42 = vpop.f32.mrb[64].mxu1 }
0x102e   : > { %v7670_v21 = vpop.f32.mrb[65].mxu1 }
0x1031   : > { %v7672_v35 = vpop.f32.mrb[66].mxu1 }
0x1032   : > { %v7674_v37 = vpop.f32.mrb[67].mxu1 }
0x1035   : > { %v7676_v9 = vpop.f32.mrb[68].mxu1 }
0x1036   : > { %v4081_v32 = vpop.f32.mrb[69].mxu1 }
0x1037   : > { %v7684_v39 = vadd.f32 %v7681_v28, %v4081_v32 }
0x1039   : > { %7926 = vst [vmem:[#allocation11_spill] sm:$0xff] %v7684_v39  ;;  %v5540_v45 = vpop.f32.mrb[70].mxu1  ;;  %v3136_v39 = vsub.f32 %v7420_v7, %v7574_v51 }
0x103a   : > { %v7687_v33 = vadd.f32 %v5540_v45, %v7681_v28  ;;  %v4091_v47 = vpop.f32.mrb[71].mxu1 }
0x103b   : > { %v7690_v61 = vadd.f32 %v7681_v28, %v4091_v47 }
0x103c   : > { %7927 = vst [vmem:[#allocation12_spill] sm:$0xff] %v7687_v33  ;;  %v3137_v33 = vsub.f32 %v7416_v59, %v7570_v29 }
0x103d   : > { %7928 = vst [vmem:[#allocation13_spill] sm:$0xff] %v7690_v61  ;;  %v7692_v57 = vpop.f32.mrb[72].mxu1 }
0x103e   : > { %v7694_v34 = vpop.f32.mrb[73].mxu1  ;;  %v3146_v58 = vmul.f32 1.442695, %v3137_v33 }
0x1041   : > { %v7696_v30 = vpop.f32.mrb[74].mxu1 }
0x1042   : > { %v7698_v2 = vpop.f32.mrb[75].mxu1 }
0x1045   : > { %v7700_v1 = vpop.f32.mrb[76].mxu1 }
0x1046   : > { %v4401_v62 = vpop.f32.mrb[77].mxu1 }
0x1047   : > { %v7708_v56 = vadd.f32 %v7705_v5, %v4401_v62 }
0x1049   : > { %7929 = vst [vmem:[#allocation14_spill] sm:$0xff] %v7708_v56  ;;  %v5588_v32 = vpop.f32.mrb[78].mxu1 }
0x104a   : > { %v7711_v45 = vadd.f32 %v5588_v32, %v7705_v5  ;;  %v4411_v47 = vpop.f32.mrb[79].mxu1 }
0x104b   : > { %v7714_v38 = vadd.f32 %v7705_v5, %v4411_v47 }
0x104c   : > { %7930 = vst [vmem:[#allocation15_spill] sm:$0xff] %v7711_v45 }
0x104d   : > { %7931 = vst [vmem:[#allocation16_spill] sm:$0xff] %v7714_v38 }
0x1051   : > { %v3077_v54 = vpop.xlane.xlu0 %3076 }
0x1052   : > { %v3097_v61 = vsub.f32 %v3077_v54, %v7570_v29  ;;  %v7717_v48 = vpop.xlane.xlu1 %3073  ;;  %vm3129_vm15 = vcmp.ge.f32.partialorder %v7416_v59, %v3077_v54 }
0x1053   : > { %v3096_v50 = vsub.f32 %v7717_v48, %v7574_v51  ;;  %vm3128_vm1 = vcmp.ge.f32.partialorder %v7420_v7, %v7717_v48  ;;  %v7932_v48 = vmov 0  }
0x1054   : > { %v3106_v15 = vmul.f32 1.442695, %v3097_v61 }
0x1055   : > { %v3104_v62 = vmul.f32 1.442695, %v3096_v50 }
0x1056   : > { %6213 = vpow2.f32 %v3106_v15 }
0x1057   : > { %6215 = vpow2.f32 %v3104_v62 }
0x1059   : > { %v7723_v32 = vpop.xlane.xlu0 %3082 }
0x105a   : > { %v3099_v47 = vsub.f32 %v7723_v32, %v7582_v10  ;;  %v7727_v38 = vpop.xlane.xlu1 %3079  ;;  %vm3131_vm2 = vcmp.ge.f32.partialorder %v7442_v11, %v7723_v32 }
0x105b   : > { %v3098_v45 = vsub.f32 %v7727_v38, %v7586_v44  ;;  %vm3130_vm3 = vcmp.ge.f32.partialorder %v7446_v31, %v7727_v38 }
0x105c   : > { %v3110_v18 = vmul.f32 1.442695, %v3099_v47 }
0x105d   : > { %v7731_v13 = vpop.xlane.xlu0 %3088  ;;  %v3108_v50 = vmul.f32 1.442695, %v3098_v45  ;;  %v3139_v45 = vsub.f32 %v7442_v11, %v7582_v10 }
0x105e   : > { %6217 = vpow2.f32 %v3110_v18  ;;  %v3101_v29 = vsub.f32 %v7731_v13, %v7593_v52  ;;  %v7737_v25 = vpop.xlane.xlu1 %3085  ;;  %v3144_v18 = vmul.f32 1.442695, %v3136_v39  ;;  %vm3133_vm4 = vcmp.ge.f32.partialorder %v7460_v41, %v7731_v13 }
0x105f   : > { %6219 = vpow2.f32 %v3146_v58  ;;  %v3100_v58 = vsub.f32 %v7737_v25, %v7598_v24  ;;  %vm3132_vm5 = vcmp.ge.f32.partialorder %v7464_v0, %v7737_v25 }
0x1060   : > { %v6214_v15 = vpop.eup %6213  ;;  %6221 = vpow2.f32 %v3108_v50  ;;  %v3114_v62 = vmul.f32 1.442695, %v3101_v29 }
0x1061   : > { %v3121_v61 = vadd.f32 1.0, %v6214_v15  ;;  %v6216_v56 = vpop.eup %6215  ;;  %v7744_v15 = vpop.xlane.xlu0 %3094  ;;  %v3112_v20 = vmul.f32 1.442695, %v3100_v58 }
0x1062   : > { %v3120_v33 = vadd.f32 1.0, %v6216_v56  ;;  %v3138_v56 = vsub.f32 %v7446_v31, %v7586_v44  ;;  %v3103_v36 = vsub.f32 %v7744_v15, %v7605_v26  ;;  %vm3135_vm6 = vcmp.ge.f32.partialorder %v7480_v22, %v7744_v15 }
0x1063   : > { %6223 = vrcp.f32 %v3121_v61  ;;  %v3150_v61 = vmul.f32 1.442695, %v3139_v45 }
0x1064   : > { %6225 = vpow2.f32 %v3114_v62  ;;  %v3148_v59 = vmul.f32 1.442695, %v3138_v56  ;;  %v3118_v44 = vmul.f32 1.442695, %v3103_v36 }
0x1065   : > { %6227 = vrcp.f32 %v3120_v33  ;;  %v7750_v33 = vpop.xlane.xlu1 %3091 }
0x1066   : > { %6229 = vpow2.f32 %v3144_v18  ;;  %v3141_v18 = vsub.f32 %v7460_v41, %v7593_v52  ;;  %v3102_v45 = vsub.f32 %v7750_v33, %v7610_v40  ;;  %vm3134_vm7 = vcmp.ge.f32.partialorder %v7484_v23, %v7750_v33 }
0x1068   : > { %v6218_v47 = vpop.eup %6217  ;;  %v3116_v36 = vmul.f32 1.442695, %v3102_v45 }
0x1069   : > { %v6220_v50 = vpop.eup %6219  ;;  %v3123_v29 = vadd.f32 1.0, %v6218_v47 }
0x106a   : > { %v6222_v51 = vpop.eup %6221  ;;  %v3161_v62 = vsel %vm3129_vm15, %v6220_v50, 0.0  ;;  %v6289_v50 = vmov 3  }
0x106b   : > { %6231 = vrcp.f32 %v3123_v29  ;;  %v3122_v54 = vadd.f32 1.0, %v6222_v51  ;;  %v6290_v29 = vmov 2  }
0x106c   : > { %6233 = vpow2.f32 %v3150_v61  ;;  %v3154_v61 = vmul.f32 1.442695, %v3141_v18 }
0x106d   : > { %v6224_v39 = vpop.eup %6223  ;;  %6235 = vpow2.f32 %v3112_v20 }
0x106e   : > { %v3177_v10 = vmul.f32 %v6224_v39, %v3161_v62  ;;  %v6226_v47 = vpop.eup %6225  ;;  %6237 = vrcp.f32 %v3122_v54 }
0x106f   : > { %v3125_v58 = vadd.f32 1.0, %v6226_v47  ;;  %v6228_v51 = vpop.eup %6227  ;;  %6239 = vpow2.f32 %v3148_v59  ;;  %v7933_v47 = vmov 1  }
0x1070   : > { %3785 = vperm.xlu1 %6040, %v3177_v10   ;;  %3459 = vperm.xlu0 %6039, %v3177_v10   ;;  %v6230_v20 = vpop.eup %6229  ;;  %6241 = vpow2.f32 %v3118_v44 }
0x1071   : > { %v3160_v52 = vsel %vm3128_vm1, %v6230_v20, 0.0  ;;  %6243 = vrcp.f32 %v3125_v58  ;;  %v3143_v58 = vsub.f32 %v7480_v22, %v7605_v26  ;;  %v3142_v26 = vsub.f32 %v7484_v23, %v7610_v40 }
0x1072   : > { %v3176_v56 = vmul.f32 %v6228_v51, %v3160_v52  ;;  %6245 = vpow2.f32 %v3154_v61  ;;  %v3419_v23 = vadd.f32 %v7620_v12, %v7633_v46 }
0x1073   : > { %6247 = vpow2.f32 %v3116_v36  ;;  %v3158_v20 = vmul.f32 1.442695, %v3143_v58  ;;  %v3156_v13 = vmul.f32 1.442695, %v3142_v26  ;;  %v4062_v26 = vadd.f32 %v7681_v28, %v7670_v21 }
0x1074   : > { %6042 = vset.pattern.permute.xlu1 %v6289_v50  ;;  %6041 = vset.pattern.permute.xlu0 %v6290_v29 }
0x1075   : > { %4425 = vperm.xlu1 %6042, %v3177_v10   ;;  %4105 = vperm.xlu0 %6041, %v3177_v10   ;;  %v6232_v7 = vpop.eup %6231  ;;  %v3140_v10 = vsub.f32 %v7464_v0, %v7598_v24 }
0x1076   : > { %v6234_v39 = vpop.eup %6233 }
0x1077   : > { %v6236_v62 = vpop.eup %6235  ;;  %v3163_v59 = vsel %vm3131_vm2, %v6234_v39, 0.0  ;;  %v3152_v44 = vmul.f32 1.442695, %v3140_v10 }
0x1078   : > { %v3179_v54 = vmul.f32 %v6232_v7, %v3163_v59  ;;  %v6238_v11 = vpop.eup %6237  ;;  %v3124_v32 = vadd.f32 1.0, %v6236_v62 }
0x1079   : > { %6043 = vset.pattern.permute.xlu1 %v7932_v48  ;;  %6046 = vset.pattern.permute.xlu0 %v6289_v50  ;;  %v6240_v18 = vpop.eup %6239 }
0x107a   : > { %3454 = vperm.xlu1 %6043, %v3176_v56   ;;  %4421 = vperm.xlu0 %6046, %v3176_v56   ;;  %v6242_v45 = vpop.eup %6241  ;;  %v3162_v51 = vsel %vm3130_vm3, %v6240_v18, 0.0  ;;  %6249 = vrcp.f32 %v3124_v32  ;;  %v3747_v18 = vadd.f32 %v7644_v55, %v7657_v6 }
0x107b   : > { %v3178_v24 = vmul.f32 %v6238_v11, %v3162_v51  ;;  %v6244_v61 = vpop.eup %6243  ;;  %6251 = vpow2.f32 %v3152_v44  ;;  %v3127_v38 = vadd.f32 1.0, %v6242_v45  ;;  %v4387_v51 = vadd.f32 %v7692_v57, %v7705_v5 }
0x107c   : > { %v6246_v31 = vpop.eup %6245  ;;  %v3742_v57 = vadd.f32 %v7657_v6, %v7646_v17 }
0x107d   : > { %v3165_v52 = vsel %vm3133_vm4, %v6246_v31, 0.0  ;;  %v6248_v36 = vpop.eup %6247  ;;  %6253 = vrcp.f32 %v3127_v38 }
0x107e   : > { %6044 = vset.pattern.permute.xlu1 %v7933_v47  ;;  %4433 = vperm.xlu0 %6046, %v3179_v54   ;;  %v3181_v7 = vmul.f32 %v6244_v61, %v3165_v52  ;;  %6255 = vpow2.f32 %v3158_v20  ;;  %v3126_v41 = vadd.f32 1.0, %v6248_v36 }
0x107f   : > { %3781 = vperm.xlu1 %6044, %v3176_v56  }
0x1080   : > { %6257 = vrcp.f32 %v3126_v41 }
0x1081   : > { %6259 = vpow2.f32 %v3156_v13 }
0x1082   : > { %6051 = vset.pattern.permute.xlu0 %v7933_v47 }
0x1083   : > { %6045 = vset.pattern.permute.xlu1 %v6290_v29  ;;  %3789 = vperm.xlu0 %6051, %v3178_v24  }
0x1084   : > { %4101 = vperm.xlu1 %6045, %v3176_v56   ;;  %v6250_v39 = vpop.eup %6249 }
0x1085   : > { %v6252_v56 = vpop.eup %6251 }
0x1086   : > { %v3164_v40 = vsel %vm3132_vm5, %v6252_v56, 0.0 }
0x1087   : > { %3801 = vperm.xlu0 %6051, %v3181_v7   ;;  %v3180_v62 = vmul.f32 %v6250_v39, %v3164_v40  ;;  %v6254_v10 = vpop.eup %6253  ;;  %v3429_v40 = vadd.f32 %v7624_v49, %v7633_v46  ;;  %v4397_v49 = vadd.f32 %v7696_v30, %v7705_v5  ;;  %v4072_v30 = vadd.f32 %v7681_v28, %v7674_v37 }
0x1088   : > { %6047 = vset.pattern.permute.xlu1 %v7932_v48  ;;  %v6256_v0 = vpop.eup %6255  ;;  %v3767_v37 = vadd.f32 %v7652_v3, %v7657_v6 }
0x1089   : > { %3469 = vperm.xlu1 %6047, %v3179_v54   ;;  %v3167_v25 = vsel %vm3135_vm6, %v6256_v0, 0.0 }
0x108a   : > { %v3183_v59 = vmul.f32 %v6254_v10, %v3167_v25  ;;  %v6258_v11 = vpop.eup %6257  ;;  %v3757_v10 = vadd.f32 %v7648_v4, %v7657_v6  ;;  %v3424_v4 = vadd.f32 %v7633_v46, %v7626_v16 }
0x108b   : > { %6056 = vset.pattern.permute.xlu0 %v6289_v50  ;;  %v6260_v32 = vpop.eup %6259 }
0x108c   : > { %4441 = vperm.xlu0 %6056, %v3181_v7   ;;  %v3166_v22 = vsel %vm3134_vm7, %v6260_v32, 0.0 }
0x108d   : > { %6048 = vset.pattern.permute.xlu1 %v7933_v47  ;;  %v3182_v15 = vmul.f32 %v6258_v11, %v3166_v22 }
0x108e   : > { %3793 = vperm.xlu1 %6048, %v3179_v54  }
0x1090   : > { %6059 = vset.pattern.permute.xlu0 %v6290_v29 }
0x1091   : > { %4117 = vperm.xlu0 %6059, %v3180_v62  }
0x1092   : > { %6049 = vset.pattern.permute.xlu1 %v6290_v29 }
0x1093   : > { %4113 = vperm.xlu1 %6049, %v3179_v54  }
0x1095   : > { %6062 = vset.pattern.permute.xlu0 %v7933_v47 }
0x1096   : > { %3809 = vperm.xlu0 %6062, %v3183_v59  }
0x1097   : > { %6050 = vset.pattern.permute.xlu1 %v7932_v48 }
0x1098   : > { %3464 = vperm.xlu1 %6050, %v3178_v24  }
0x109a   : > { %6066 = vset.pattern.permute.xlu0 %v6290_v29 }
0x109b   : > { %4125 = vperm.xlu0 %6066, %v3182_v15  }
0x109c   : > { %6052 = vset.pattern.permute.xlu1 %v6290_v29 }
0x109d   : > { %4109 = vperm.xlu1 %6052, %v3178_v24  }
0x109f   : > { %6068 = vset.pattern.permute.xlu0 %v6289_v50 }
0x10a0   : > { %4449 = vperm.xlu0 %6068, %v3183_v59  }
0x10a1   : > { %6053 = vset.pattern.permute.xlu1 %v6289_v50 }
0x10a2   : > { %4429 = vperm.xlu1 %6053, %v3178_v24  }
0x10a6   : > { %6054 = vset.pattern.permute.xlu1 %v7932_v48 }
0x10a7   : > { %3479 = vperm.xlu1 %6054, %v3181_v7  }
0x10ab   : > { %6055 = vset.pattern.permute.xlu1 %v6290_v29 }
0x10ac   : > { %4121 = vperm.xlu1 %6055, %v3181_v7  }
0x10b0   : > { %6057 = vset.pattern.permute.xlu1 %v7932_v48 }
0x10b1   : > { %3474 = vperm.xlu1 %6057, %v3180_v62  }
0x10b5   : > { %6058 = vset.pattern.permute.xlu1 %v7933_v47 }
0x10b6   : > { %3797 = vperm.xlu1 %6058, %v3180_v62  }
0x10ba   : > { %6060 = vset.pattern.permute.xlu1 %v6289_v50 }
0x10bb   : > { %4437 = vperm.xlu1 %6060, %v3180_v62  }
0x10bf   : > { %6061 = vset.pattern.permute.xlu1 %v7932_v48 }
0x10c0   : > { %3489 = vperm.xlu1 %6061, %v3183_v59  }
0x10c4   : > { %6063 = vset.pattern.permute.xlu1 %v6290_v29 }
0x10c5   : > { %4129 = vperm.xlu1 %6063, %v3183_v59   ;;  %v4077_v59 = vadd.f32 %v7672_v35, %v7681_v28 }
0x10c9   : > { %6064 = vset.pattern.permute.xlu1 %v7932_v48 }
0x10ca   : > { %3484 = vperm.xlu1 %6064, %v3182_v15  }
0x10ce   : > { %6065 = vset.pattern.permute.xlu1 %v7933_v47  ;;  %v4067_v47 = vadd.f32 %v7668_v42, %v7681_v28 }
0x10cf   : > { %3805 = vperm.xlu1 %6065, %v3182_v15  }
0x10d3   : > { %6067 = vset.pattern.permute.xlu1 %v6289_v50 }
0x10d4   : > { %4445 = vperm.xlu1 %6067, %v3182_v15  }
0x10ef   : > { %v3786_v33 = vpop.permute.xlu1 %3785  ;;  %v3460_v54 = vpop.permute.xlu0 %3459 }
0x10f0   : > { %v3493_v29 = vmul.f32 %v3460_v54, %v3419_v23  ;;  %v3813_v44 = vmul.f32 %v3786_v33, %v3747_v18  ;;  %v3752_v18 = vadd.f32 %v7657_v6, %v7650_v53  ;;  %v7934_v6 = vld [vmem:[#allocation5_spill] sm:$0xff] }
0x10f2   : > { %v3501_v48 = vadd.f32 %v3493_v29, %v7250_v43  ;;  %v3414_v43 = vadd.f32 %v7633_v46, %v7622_v14  ;;  %v4382_v14 = vadd.f32 %v7705_v5, %v7694_v34 }
0x10f4   : > { %v4426_v45 = vpop.permute.xlu1 %4425  ;;  %v3821_v58 = vadd.f32 %v3813_v44, %v3501_v48  ;;  %v4106_v50 = vpop.permute.xlu0 %4105 }
0x10f5   : > { %v4133_v24 = vmul.f32 %v4106_v50, %v4067_v47  ;;  %v4453_v12 = vmul.f32 %v4426_v45, %v4387_v51 }
0x10f7   : > { %v4141_v61 = vadd.f32 %v4133_v24, %v3821_v58  ;;  %v4392_v58 = vadd.f32 %v7705_v5, %v7698_v2  ;;  %v3439_v24 = vadd.f32 %v7628_v63, %v7633_v46  ;;  %v4087_v2 = vadd.f32 %v7676_v9, %v7681_v28  ;;  %v7936_v28 = vld [vmem:[#allocation8_spill] sm:$0xff] }
0x10f8   : > { %v4407_v63 = vadd.f32 %v7700_v1, %v7705_v5 }
0x10f9   : > { %v4461_v55 = vadd.f32 %v4453_v12, %v4141_v61  ;;  %v3455_v42 = vpop.permute.xlu1 %3454  ;;  %v4422_v7 = vpop.permute.xlu0 %4421 }
0x10fa   : > { %v3492_v31 = vmul.f32 %v3455_v42, %v3414_v43  ;;  %v4452_v39 = vmul.f32 %v4422_v7, %v4382_v14  ;;  %v7935_v7 = vld [vmem:[#allocation2_spill] sm:$0xff]  ;;  %v7937_v14 = vld [vmem:[#allocation11_spill] sm:$0xff] }
0x10fb   : > { %4469 = vst.msk [vmem:[%s7817_s18 + $0x8] sm:$0xff] %vm582_vm0, %v4461_v55 }
0x10fc   : > { %v3500_v20 = vadd.f32 %v3492_v31, %v7246_v8 }
0x10fd   : > { %v4434_v11 = vpop.permute.xlu0 %4433 }
0x10fe   : > { %v3782_v38 = vpop.permute.xlu1 %3781  ;;  %v4455_v15 = vmul.f32 %v4434_v11, %v4397_v49 }
0x10ff   : > { %v3812_v52 = vmul.f32 %v3782_v38, %v3742_v57 }
0x1101   : > { %v3820_v36 = vadd.f32 %v3812_v52, %v3500_v20 }
0x1102   : > { %v3790_v33 = vpop.permute.xlu0 %3789 }
0x1103   : > { %v4102_v41 = vpop.permute.xlu1 %4101  ;;  %v3814_v35 = vmul.f32 %v3790_v33, %v3752_v18 }
0x1104   : > { %v4132_v13 = vmul.f32 %v4102_v41, %v4062_v26 }
0x1106   : > { %v4140_v56 = vadd.f32 %v4132_v13, %v3820_v36  ;;  %v3802_v12 = vpop.permute.xlu0 %3801 }
0x1107   : > { %v3817_v43 = vmul.f32 %v3802_v12, %v3767_v37 }
0x1108   : > { %v4460_v17 = vadd.f32 %v4452_v39, %v4140_v56  ;;  %v3470_v62 = vpop.permute.xlu1 %3469 }
0x1109   : > { %v3495_v8 = vmul.f32 %v3470_v62, %v3429_v40  ;;  %v7938_v40 = vld [vmem:[#allocation14_spill] sm:$0xff] }
0x110a   : > { %4468 = vst.msk [vmem:[%s7817_s18] sm:$0xff] %vm582_vm0, %v4460_v17 }
0x110b   : > { %v3503_v0 = vadd.f32 %v3495_v8, %v7291_v19  ;;  %v4442_v42 = vpop.permute.xlu0 %4441 }
0x110c   : > { %v4457_v38 = vmul.f32 %v4442_v42, %v4407_v63 }
0x110d   : > { %v3794_v21 = vpop.permute.xlu1 %3793 }
0x110e   : > { %v3815_v25 = vmul.f32 %v3794_v21, %v3757_v10  ;;  %v7939_v21 = vld [vmem:[#allocation6_spill] sm:$0xff] }
0x1110   : > { %v3823_v34 = vadd.f32 %v3815_v25, %v3503_v0  ;;  %v4118_v3 = vpop.permute.xlu0 %4117  ;;  %v7940_v25 = vld [vmem:[#allocation9_spill] sm:$0xff] }
0x1111   : > { %v4136_v13 = vmul.f32 %v4118_v3, %v7937_v14 }
0x1112   : > { %v4114_v32 = vpop.permute.xlu1 %4113 }
0x1113   : > { %v4135_v22 = vmul.f32 %v4114_v32, %v4077_v59  ;;  %v7941_v59 = vld [vmem:[#allocation4_spill] sm:$0xff] }
0x1115   : > { %v4143_v23 = vadd.f32 %v4135_v22, %v3823_v34  ;;  %v3810_v39 = vpop.permute.xlu0 %3809 }
0x1116   : > { %v3819_v34 = vmul.f32 %v3810_v39, %v7940_v25 }
0x1117   : > { %v4463_v54 = vadd.f32 %v4455_v15, %v4143_v23  ;;  %v3465_v19 = vpop.permute.xlu1 %3464  ;;  %v7942_v15 = vld [vmem:[#allocation12_spill] sm:$0xff] }
0x1118   : > { %v3494_v29 = vmul.f32 %v3465_v19, %v3424_v4  ;;  %v7943_v4 = vld [vmem:[#allocation15_spill] sm:$0xff] }
0x1119   : > { %4471 = vst.msk [vmem:[%s7817_s18 + $0x18] sm:$0xff] %vm582_vm0, %v4463_v54 }
0x111a   : > { %v3502_v44 = vadd.f32 %v3494_v29, %v7274_v27  ;;  %v4126_v8 = vpop.permute.xlu0 %4125  ;;  %v7944_v29 = vld [vmem:[#allocation7_spill] sm:$0xff] }
0x111c   : > { %v4110_v48 = vpop.permute.xlu1 %4109  ;;  %v3822_v47 = vadd.f32 %v3814_v35, %v3502_v44 }
0x111d   : > { %v4134_v45 = vmul.f32 %v4110_v48, %v4072_v30  ;;  %v7945_v30 = vld [vmem:[#allocation3_spill] sm:$0xff] }
0x111f   : > { %v4142_v16 = vadd.f32 %v4134_v45, %v3822_v47  ;;  %v4450_v32 = vpop.permute.xlu0 %4449  ;;  %v7946_v47 = vld [vmem:[#allocation10_spill] sm:$0xff] }
0x1120   : > { %v4459_v33 = vmul.f32 %v4450_v32, %v7943_v4 }
0x1121   : > { %v4430_v50 = vpop.permute.xlu1 %4429 }
0x1122   : > { %v4454_v51 = vmul.f32 %v4430_v50, %v4392_v58 }
0x1124   : > { %v4462_v53 = vadd.f32 %v4454_v51, %v4142_v16  ;;  %v7947_v16 = vld [vmem:[#allocation13_spill] sm:$0xff] }
0x1125   : > { %v4138_v58 = vmul.f32 %v4126_v8, %v7947_v16 }
0x1126   : > { %4470 = vst.msk [vmem:[%s7817_s18 + $0x10] sm:$0xff] %vm582_vm0, %v4462_v53  ;;  %v3480_v27 = vpop.permute.xlu1 %3479 }
0x1127   : > { %v3497_v61 = vmul.f32 %v3480_v27, %v3439_v24  ;;  %v7948_v24 = vld [vmem:[#allocation16_spill] sm:$0xff] }
0x1129   : > { %v3505_v55 = vadd.f32 %v3497_v61, %v7309_v60 }
0x112b   : > { %v4122_v31 = vpop.permute.xlu1 %4121  ;;  %v3825_v57 = vadd.f32 %v3817_v43, %v3505_v55 }
0x112c   : > { %v4137_v46 = vmul.f32 %v4122_v31, %v4087_v2 }
0x112e   : > { %v4145_v20 = vadd.f32 %v4137_v46, %v3825_v57 }
0x1130   : > { %v4465_v52 = vadd.f32 %v4457_v38, %v4145_v20  ;;  %v3475_v36 = vpop.permute.xlu1 %3474 }
0x1131   : > { %v3496_v60 = vmul.f32 %v3475_v36, %v7934_v6 }
0x1132   : > { %4473 = vst.msk [vmem:[%s7817_s18 + $0x28] sm:$0xff] %vm582_vm0, %v4465_v52 }
0x1133   : > { %v3504_v9 = vadd.f32 %v3496_v60, %v7935_v7 }
0x1135   : > { %v3798_v26 = vpop.permute.xlu1 %3797 }
0x1136   : > { %v3816_v41 = vmul.f32 %v3798_v26, %v7936_v28 }
0x1138   : > { %v3824_v1 = vadd.f32 %v3816_v41, %v3504_v9 }
0x113a   : > { %v4438_v5 = vpop.permute.xlu1 %4437  ;;  %v4144_v56 = vadd.f32 %v4136_v13, %v3824_v1 }
0x113b   : > { %v4456_v17 = vmul.f32 %v4438_v5, %v7938_v40 }
0x113d   : > { %v4464_v62 = vadd.f32 %v4456_v17, %v4144_v56 }
0x113f   : > { %4472 = vst.msk [vmem:[%s7817_s18 + $0x20] sm:$0xff] %vm582_vm0, %v4464_v62  ;;  %v3490_v10 = vpop.permute.xlu1 %3489 }
0x1140   : > { %v3499_v0 = vmul.f32 %v3490_v10, %v7939_v21 }
0x1142   : > { %v3507_v11 = vadd.f32 %v3499_v0, %v7941_v59 }
0x1144   : > { %v4130_v49 = vpop.permute.xlu1 %4129  ;;  %v3827_v22 = vadd.f32 %v3819_v34, %v3507_v11 }
0x1145   : > { %v4139_v23 = vmul.f32 %v4130_v49, %v7942_v15 }
0x1147   : > { %v4147_v54 = vadd.f32 %v4139_v23, %v3827_v22 }
0x1149   : > { %v4467_v19 = vadd.f32 %v4459_v33, %v4147_v54  ;;  %v3485_v18 = vpop.permute.xlu1 %3484 }
0x114a   : > { %v3498_v35 = vmul.f32 %v3485_v18, %v7944_v29 }
0x114b   : > { %4475 = vst.msk [vmem:[%s7817_s18 + $0x38] sm:$0xff] %vm582_vm0, %v4467_v19 }
0x114c   : > { %v3506_v48 = vadd.f32 %v3498_v35, %v7945_v30 }
0x114e   : > { %v3806_v44 = vpop.permute.xlu1 %3805 }
0x114f   : > { %v3818_v45 = vmul.f32 %v3806_v44, %v7946_v47 }
0x1151   : > { %v3826_v50 = vadd.f32 %v3818_v45, %v3506_v48 }
0x1153   : > { %v4446_v51 = vpop.permute.xlu1 %4445  ;;  %v4146_v53 = vadd.f32 %v4138_v58, %v3826_v50 }
0x1154   : > { %v4458_v12 = vmul.f32 %v4446_v51, %v7948_v24 }
0x1156   : > { %v4466_v27 = vadd.f32 %v4458_v12, %v4146_v53 }
0x1158   : > { %4474 = vst.msk [vmem:[%s7817_s18 + $0x30] sm:$0xff] %vm582_vm0, %v4466_v27 }
0x1159 PF: > { %s26_s21 = sadd.s32 1, %s6275_s21  }
0x115a   : > { %p23_p4 = scmp.ge.s32.totalorder %s26_s21, 4  }
0x115c   :  { %25 = sbr.rel (!%p23_p4) target bundleno = 2 (0x2), region = 129 }

</bundles_post_ra>
